<compile_context>
chip_gen: v7x
topology: tpu7x:2x2x1
jax: 0.10.0
libtpu: 0.0.40
codegen_flags: <defaults>
</compile_context>

<pallas_src>
import functools

import jax
import jax.numpy as jnp
from jax import lax
from jax.experimental import pallas as pl
from jax.experimental.pallas import tpu as pltpu

NEG_SLOPE = 0.2          # GATConv default negative_slope
BN_EPS = 1e-5            # BatchNorm1d default eps
NEG_INF = -1e30          # finite "minus infinity" (avoids inf-inf NaNs)
BIG = 1e30
XP_RESIDENT_BYTES = 8 * 1024 * 1024   # keep x' fully VMEM-resident below this


def round_up(x, m):
    return (x + m - 1) // m * m


def pick_tile(n_pad, cap):
    """Largest multiple of 128 that divides n_pad and is <= cap."""
    cap = max(128, min(cap, n_pad))
    for t in range(cap - cap % 128, 127, -128):
        if n_pad % t == 0:
            return t
    return 128


# ---------------------------------------------------------------------------
# Kernel A: (optional fused BN+ReLU of previous layer) -> one fused matmul
#           producing x' for all heads plus the attention-logit slabs.
# ---------------------------------------------------------------------------
def transform_kernel(x_ref, scale_ref, shift_ref, w_ref,
                     xp_ref, alpha_ref, alphaT_ref,
                     *, f_hid, apply_norm_relu):
    xin = x_ref[...]                                        # [TILE_N, F_in_pad]
    if apply_norm_relu:
        # BatchNorm (precomputed scale/shift from batch stats) + ReLU.
        xin = jnp.maximum(xin * scale_ref[...] + shift_ref[...], 0.0)
    x_bf = xin.astype(jnp.bfloat16)

    # Single fused matmul: [TILE_N, f_hid + 128]; the last 128 columns carry
    # alpha_dst (cols 0..H-1) and alpha_src (cols H..2H-1) via the folded
    # attention vectors, the rest are zero padding.
    y = jnp.dot(x_bf, w_ref[...], preferred_element_type=jnp.float32)

    xp_ref[...] = y[:, :f_hid].astype(jnp.bfloat16)         # lane-dense slab
    alpha = y[:, f_hid:]                                    # [TILE_N, 128]
    alpha_ref[...] = alpha                                  # used per-dst tile
    alphaT_ref[...] = alpha.T                               # used per-src tile


# ---------------------------------------------------------------------------
# Kernel B: masked attention with flash-style online softmax over src tiles,
#           empty-tile skipping via scalar-prefetched per-tile edge counts.
# grid = (dst_tiles "parallel", src_tiles "arbitrary")
# ---------------------------------------------------------------------------
def attention_kernel(counts_ref, adj_ref, alpha_ref, alphaT_ref, xp_ref,
                     bias_ref, out_ref, m_scr, l_scr, acc_scr,
                     *, heads, hc_pad, tile_s, xp_full):
    d = pl.program_id(0)
    s = pl.program_id(1)
    ns = pl.num_programs(1)

    @pl.when(s == 0)
    def _init():
        m_scr[...] = jnp.full(m_scr.shape, NEG_INF, m_scr.dtype)
        l_scr[...] = jnp.zeros(l_scr.shape, l_scr.dtype)
        acc_scr[...] = jnp.zeros(acc_scr.shape, acc_scr.dtype)

    @pl.when(counts_ref[d, s] > 0)      # skip adjacency tiles with no edges
    def _compute():
        # Additive mask directly from the int8 {0,1} adjacency (no cmp+select):
        # adj=1 -> 0, adj=0 -> -1e30.
        neg_mask = (adj_ref[...].astype(jnp.float32) - 1.0) * BIG

        for h in range(heads):                              # static unroll
            e = alpha_ref[:, h:h + 1] + alphaT_ref[heads + h:heads + h + 1, :]
            e = jnp.maximum(e, NEG_SLOPE * e)               # LeakyReLU
            e = e + neg_mask

            m_prev = m_scr[:, h:h + 1]                      # [TILE_D, 1]
            m_new = jnp.maximum(m_prev, jnp.max(e, axis=1, keepdims=True))
            p = jnp.exp(e - m_new)                          # masked -> ~0
            corr = jnp.exp(m_prev - m_new)                  # [TILE_D, 1]

            if xp_full:                                     # x' resident in VMEM
                row0 = pl.multiple_of(s * tile_s, tile_s)
                xp_h = xp_ref[pl.ds(row0, tile_s), h * hc_pad:(h + 1) * hc_pad]
            else:                                           # x' streamed by src
                xp_h = xp_ref[:, h * hc_pad:(h + 1) * hc_pad]

            l_scr[:, h:h + 1] = corr * l_scr[:, h:h + 1] + jnp.sum(
                p, axis=1, keepdims=True)
            acc_scr[h] = corr * acc_scr[h] + jnp.dot(
                p.astype(jnp.bfloat16), xp_h,               # bf16 MXU, f32 acc
                preferred_element_type=jnp.float32)
            m_scr[:, h:h + 1] = m_new

    @pl.when(s == ns - 1)
    def _finalize():
        outs = []
        for h in range(heads):
            # Guard rows with no edges (padded rows): l==0 -> output is bias.
            l_safe = jnp.maximum(l_scr[:, h:h + 1], 1e-30)
            inv_l = pl.reciprocal(l_safe, approx=True)      # EUP reciprocal
            outs.append(acc_scr[h] * inv_l)                 # [TILE_D, hc_pad]
        out_ref[...] = jnp.concatenate(outs, axis=1) + bias_ref[...]


# ---------------------------------------------------------------------------
# Kernel C: fused BN2 + ReLU + global_mean_pool + Linear (reduction grid).
# ---------------------------------------------------------------------------
def pool_linear_kernel(x_ref, scale_ref, shift_ref, pool_ref, wlin_ref,
                       blin_ref, out_ref):
    i = pl.program_id(0)

    @pl.when(i == 0)
    def _init():
        out_ref[...] = jnp.zeros(out_ref.shape, out_ref.dtype)

    y = jnp.maximum(x_ref[...] * scale_ref[...] + shift_ref[...], 0.0)
    pooled = jnp.dot(pool_ref[...], y, preferred_element_type=jnp.float32)
    out_ref[...] += jnp.dot(pooled, wlin_ref[...],
                            preferred_element_type=jnp.float32)

    @pl.when(i == pl.num_programs(0) - 1)
    def _finalize():
        out_ref[...] += blin_ref[...]


# ---------------------------------------------------------------------------
# Wrappers
# ---------------------------------------------------------------------------
def gat_transform(x, scale, shift, w_fused, *, heads, hc_pad, apply_norm_relu,
                  tile):
    n_pad, f_in_pad = x.shape
    f_hid = heads * hc_pad
    f_out = w_fused.shape[1]                  # f_hid + 128
    kernel = functools.partial(transform_kernel, f_hid=f_hid,
                               apply_norm_relu=apply_norm_relu)
    return pl.pallas_call(
        kernel,
        grid=(n_pad // tile,),
        in_specs=[
            pl.BlockSpec((tile, f_in_pad), lambda i: (i, 0)),        # x
            pl.BlockSpec((1, f_in_pad), lambda i: (0, 0)),           # bn scale
            pl.BlockSpec((1, f_in_pad), lambda i: (0, 0)),           # bn shift
            pl.BlockSpec((f_in_pad, f_out), lambda i: (0, 0)),       # fused W
        ],
        out_specs=[
            pl.BlockSpec((tile, f_hid), lambda i: (i, 0)),           # x'
            pl.BlockSpec((tile, 128), lambda i: (i, 0)),             # alpha slab
            pl.BlockSpec((128, tile), lambda i: (0, i)),             # alpha^T slab
        ],
        out_shape=[
            jax.ShapeDtypeStruct((n_pad, f_hid), jnp.bfloat16),
            jax.ShapeDtypeStruct((n_pad, 128), jnp.float32),
            jax.ShapeDtypeStruct((128, n_pad), jnp.float32),
        ],
        compiler_params=pltpu.CompilerParams(
            dimension_semantics=("parallel",)),
    )(x, scale, shift, w_fused)


def gat_attention(counts, adj, alpha, alphaT, xp, bias, *, heads, hc_pad,
                  tile_d, tile_s):
    n_pad = adj.shape[0]
    f_hid = heads * hc_pad
    n_d, n_s = n_pad // tile_d, n_pad // tile_s

    xp_bytes = xp.size * xp.dtype.itemsize
    xp_full = xp_bytes <= XP_RESIDENT_BYTES
    if xp_full:
        # Full-extent block: DMA'd once, stays VMEM-resident for the whole grid.
        xp_spec = pl.BlockSpec((n_pad, f_hid), lambda d, s, c: (0, 0))
    else:
        xp_spec = pl.BlockSpec((tile_s, f_hid), lambda d, s, c: (s, 0))

    kernel = functools.partial(attention_kernel, heads=heads, hc_pad=hc_pad,
                               tile_s=tile_s, xp_full=xp_full)
    return pl.pallas_call(
        kernel,
        grid_spec=pltpu.PrefetchScalarGridSpec(
            num_scalar_prefetch=1,
            grid=(n_d, n_s),
            in_specs=[
                pl.BlockSpec((tile_d, tile_s), lambda d, s, c: (d, s)),   # adj i8
                pl.BlockSpec((tile_d, 128), lambda d, s, c: (d, 0)),      # alpha (dst)
                pl.BlockSpec((128, tile_s), lambda d, s, c: (0, s)),      # alpha^T (src)
                xp_spec,                                                  # x'
                pl.BlockSpec((1, f_hid), lambda d, s, c: (0, 0)),         # bias
            ],
            out_specs=pl.BlockSpec((tile_d, f_hid), lambda d, s, c: (d, 0)),
            scratch_shapes=[
                pltpu.VMEM((tile_d, heads), jnp.float32),         # running max
                pltpu.VMEM((tile_d, heads), jnp.float32),         # running denom
                pltpu.VMEM((heads, tile_d, hc_pad), jnp.float32),  # f32 acc
            ]),
        out_shape=jax.ShapeDtypeStruct((n_pad, f_hid), jnp.float32),
        compiler_params=pltpu.CompilerParams(
            dimension_semantics=("parallel", "arbitrary"),
            vmem_limit_bytes=48 * 1024 * 1024,
        ),
    )(counts, adj, alpha, alphaT, xp, bias)


def pool_and_classify(conv_out, scale, shift, pool, w_lin, b_lin, *, tile):
    n_pad, f_hid = conv_out.shape
    g = pool.shape[0]
    c = w_lin.shape[1]
    return pl.pallas_call(
        pool_linear_kernel,
        grid=(n_pad // tile,),
        in_specs=[
            pl.BlockSpec((tile, f_hid), lambda i: (i, 0)),
            pl.BlockSpec((1, f_hid), lambda i: (0, 0)),
            pl.BlockSpec((1, f_hid), lambda i: (0, 0)),
            pl.BlockSpec((g, tile), lambda i: (0, i)),
            pl.BlockSpec((f_hid, c), lambda i: (0, 0)),
            pl.BlockSpec((1, c), lambda i: (0, 0)),
        ],
        out_specs=pl.BlockSpec((g, c), lambda i: (0, 0)),
        out_shape=jax.ShapeDtypeStruct((g, c), jnp.float32),
        compiler_params=pltpu.CompilerParams(
            dimension_semantics=("arbitrary",)),
    )(conv_out, scale, shift, pool, w_lin, b_lin)


def bn_scale_shift(conv_out, gamma, beta, n_real):
    """BatchNorm1d (training batch stats, biased var) -> scale/shift vectors."""
    xr = conv_out[:n_real]
    mean = jnp.mean(xr, axis=0, keepdims=True)
    var = jnp.maximum(jnp.mean(xr * xr, axis=0, keepdims=True) - mean * mean,
                      0.0)
    scale = gamma * lax.rsqrt(var + BN_EPS)
    shift = beta - mean * scale
    return scale, shift


@functools.partial(jax.jit, static_argnames=("heads", "hc_pad", "n_real"))
def gat_forward(x, adj, pool, p1, p2, w_lin, b_lin, *, heads, hc_pad, n_real):
    n_pad, f_in_pad = x.shape

    # Tile choices (shapes are static under jit).  Keep >=2 dst tiles when
    # possible so both v7x TensorCores get work on the "parallel" axis.
    tile_n = pick_tile(n_pad, 512)
    tile_s = pick_tile(n_pad, 512)
    tile_d = pick_tile(n_pad, min(1024, n_pad // 2 if n_pad >= 256 else n_pad))
    n_d, n_s = n_pad // tile_d, n_pad // tile_s

    # Per-(dst,src)-tile edge counts for sparsity-aware tile skipping (SMEM).
    counts = adj.astype(jnp.int32).reshape(n_d, tile_d, n_s, tile_s).sum(
        axis=(1, 3))

    ones = jnp.ones((1, f_in_pad), jnp.float32)
    zeros = jnp.zeros((1, f_in_pad), jnp.float32)

    # conv1
    xp1, al1, alT1 = gat_transform(x, ones, zeros, p1["w_fused"], heads=heads,
                                   hc_pad=hc_pad, apply_norm_relu=False,
                                   tile=tile_n)
    conv1 = gat_attention(counts, adj, al1, alT1, xp1, p1["bias"], heads=heads,
                          hc_pad=hc_pad, tile_d=tile_d, tile_s=tile_s)
    scale1, shift1 = bn_scale_shift(conv1, p1["gamma"], p1["beta"], n_real)

    # bn1 + relu fused into conv2's transform
    xp2, al2, alT2 = gat_transform(conv1, scale1, shift1, p2["w_fused"],
                                   heads=heads, hc_pad=hc_pad,
                                   apply_norm_relu=True, tile=tile_n)
    conv2 = gat_attention(counts, adj, al2, alT2, xp2, p2["bias"], heads=heads,
                          hc_pad=hc_pad, tile_d=tile_d, tile_s=tile_s)
    scale2, shift2 = bn_scale_shift(conv2, p2["gamma"], p2["beta"], n_real)

    # bn2 + relu fused into pooling + classifier head
    return pool_and_classify(conv2, scale2, shift2, pool, w_lin, b_lin,
                             tile=tile_n)


# ---------------------------------------------------------------------------
# Glue: dense adjacency, pooling matrix, deterministic padded parameter init.
# ---------------------------------------------------------------------------
def build_adj(edge_index, num_nodes):
    src, dst = edge_index[0], edge_index[1]
    adj = jnp.zeros((num_nodes, num_nodes), jnp.float32)
    adj = adj.at[dst, src].set(1.0)            # messages flow src -> dst
    diag = jnp.arange(num_nodes)
    adj = adj.at[diag, diag].set(1.0)          # add_self_loops=True
    return adj


def build_pool(batch, num_graphs):
    onehot = (batch[None, :] == jnp.arange(num_graphs)[:, None]).astype(
        jnp.float32)
    counts = jnp.sum(onehot, axis=1, keepdims=True)
    return onehot / jnp.maximum(counts, 1.0)   # [G, N] mean-pool matrix


def init_gat_layer(key, heads, hc, hc_pad, *, in_real, in_pad, in_index):
    """Build fused, zero-padded, attention-folded parameters for one GATConv."""
    k = jax.random.split(key, 6)
    w = jax.random.normal(k[0], (heads, in_real, hc),
                          jnp.float32) / jnp.sqrt(in_real)
    att_src = 0.1 * jax.random.normal(k[1], (heads, hc), jnp.float32)
    att_dst = 0.1 * jax.random.normal(k[2], (heads, hc), jnp.float32)
    bias = 0.01 * jax.random.normal(k[3], (heads, hc), jnp.float32)
    gamma = 1.0 + 0.1 * jax.random.normal(k[4], (heads, hc), jnp.float32)
    beta = 0.1 * jax.random.normal(k[5], (heads, hc), jnp.float32)

    f_hid = heads * hc_pad
    cols = jnp.arange(hc)
    # Fused weight [in_pad, f_hid + 128]: head-blocks of W plus folded
    # attention columns (col f_hid+h = W_h @ a_dst_h, f_hid+heads+h = W_h @ a_src_h).
    wf = jnp.zeros((in_pad, f_hid + 128), jnp.float32)
    for h in range(heads):
        wf = wf.at[in_index[:, None], (h * hc_pad + cols)[None, :]].set(w[h])
        wf = wf.at[in_index, f_hid + h].set(w[h] @ att_dst[h])
        wf = wf.at[in_index, f_hid + heads + h].set(w[h] @ att_src[h])

    def scatter_vec(v):                        # [heads, hc] -> [1, f_hid]
        out = jnp.zeros((1, f_hid), jnp.float32)
        for h in range(heads):
            out = out.at[0, h * hc_pad + cols].set(v[h])
        return out

    return {
        "w_fused": wf.astype(jnp.bfloat16),
        "bias": scatter_vec(bias),
        "gamma": scatter_vec(gamma),
        "beta": scatter_vec(beta),
    }


if __name__ == "__main__":
    key = jax.random.PRNGKey(0)
    N, F_IN, HEAD_DIM, HEADS, OUT_C, G = 16, 8, 16, 2, 4, 2
    ks = jax.random.split(key, 10)

    # Padded, lane-dense geometry (padding is zero-filled and transparent).
    HC_PAD = round_up(HEAD_DIM, 128)            # 128
    F_HID = HEADS * HC_PAD                      # 256
    F_IN_PAD = round_up(F_IN, 128)              # 128
    N_PAD = round_up(N, 128)                    # 128

    # Node features and two small graphs (8 nodes each).
    x = jax.random.normal(ks[0], (N, F_IN), jnp.float32)
    batch = jnp.concatenate([jnp.zeros(N // 2, jnp.int32),
                             jnp.ones(N - N // 2, jnp.int32)])
    e_per = 24
    src = jnp.concatenate([jax.random.randint(ks[1], (e_per,), 0, N // 2),
                           jax.random.randint(ks[2], (e_per,), N // 2, N)])
    dst = jnp.concatenate([jax.random.randint(ks[3], (e_per,), 0, N // 2),
                           jax.random.randint(ks[4], (e_per,), N // 2, N)])
    edge_index = jnp.stack([src, dst])

    adj = build_adj(edge_index, N)
    adj_i8 = jnp.pad(adj, ((0, N_PAD - N), (0, N_PAD - N))).astype(jnp.int8)
    pool = jnp.pad(build_pool(batch, G), ((0, 0), (0, N_PAD - N)))
    x_pad = jnp.pad(x, ((0, N_PAD - N), (0, F_IN_PAD - F_IN)))

    # Deterministic parameters (shapes implied by GAT.__init__).
    p1 = init_gat_layer(ks[5], HEADS, HEAD_DIM, HC_PAD,
                        in_real=F_IN, in_pad=F_IN_PAD,
                        in_index=jnp.arange(F_IN))
    in_index2 = jnp.concatenate(
        [h * HC_PAD + jnp.arange(HEAD_DIM) for h in range(HEADS)])
    p2 = init_gat_layer(ks[6], HEADS, HEAD_DIM, HC_PAD,
                        in_real=HEADS * HEAD_DIM, in_pad=F_HID,
                        in_index=in_index2)

    w_lin_raw = jax.random.normal(ks[7], (HEADS, HEAD_DIM, OUT_C),
                                  jnp.float32) / jnp.sqrt(HEADS * HEAD_DIM)
    w_lin = jnp.zeros((F_HID, OUT_C), jnp.float32)
    for h in range(HEADS):
        w_lin = w_lin.at[h * HC_PAD + jnp.arange(HEAD_DIM), :].set(w_lin_raw[h])
    b_lin = 0.01 * jax.random.normal(ks[8], (1, OUT_C), jnp.float32)

    out = gat_forward(x_pad, adj_i8, pool, p1, p2, w_lin, b_lin,
                      heads=HEADS, hc_pad=HC_PAD, n_real=N)
    out = jax.block_until_ready(out)
    assert out.shape == (G, OUT_C)
    assert bool(jnp.all(jnp.isfinite(out)))
    print("KERNEL_OK")
</pallas_src>

<mosaic_0001>
module attributes {stable_mosaic.version = 11 : i64} {
  func.func @transform_kernel(%arg0: i32, %arg1: memref<128x128xf32, #tpu.memory_space<vmem>>, %arg2: memref<1x128xf32, #tpu.memory_space<vmem>>, %arg3: memref<1x128xf32, #tpu.memory_space<vmem>>, %arg4: memref<128x384xbf16, #tpu.memory_space<vmem>>, %arg5: memref<128x256xbf16, #tpu.memory_space<vmem>>, %arg6: memref<128x128xf32, #tpu.memory_space<vmem>>, %arg7: memref<128x128xf32, #tpu.memory_space<vmem>>) attributes {dimension_semantics = [#tpu.dimension_semantics<parallel>], iteration_bounds = array<i64: 1>, scalar_prefetch = 0 : i64, scratch_operands = 0 : i64, tpu.core_type = #tpu.core_type<tc>, window_params = [{transform_indices = @transform_0, window_bounds = array<i64: 128, 128>}, {pipeline_mode = #tpu.pipeline_mode<synchronous>, transform_indices = @transform_1, window_bounds = array<i64: 1, 128>}, {pipeline_mode = #tpu.pipeline_mode<synchronous>, transform_indices = @transform_2, window_bounds = array<i64: 1, 128>}, {pipeline_mode = #tpu.pipeline_mode<synchronous>, transform_indices = @transform_3, window_bounds = array<i64: 128, 384>}, {transform_indices = @transform_4, window_bounds = array<i64: 128, 256>}, {transform_indices = @transform_5, window_bounds = array<i64: 128, 128>}, {transform_indices = @transform_6, window_bounds = array<i64: 128, 128>}]} {
    %c0 = arith.constant 0 : index
    %c0_0 = arith.constant 0 : index
    %0 = vector.load %arg1[%c0, %c0_0] : memref<128x128xf32, #tpu.memory_space<vmem>>, vector<128x128xf32>
    %1 = arith.truncf %0 : vector<128x128xf32> to vector<128x128xbf16>
    %c0_1 = arith.constant 0 : index
    %c0_2 = arith.constant 0 : index
    %2 = vector.load %arg4[%c0_1, %c0_2] : memref<128x384xbf16, #tpu.memory_space<vmem>>, vector<128x384xbf16>
    %cst = arith.constant dense<0.000000e+00> : vector<128x384xf32>
    %3 = tpu.matmul %1, %2, %cst {dimension_numbers = #tpu.dot_dimension_numbers<[1], [0], [0], [1], [0, 0, 1, 1], [], []>} : vector<128x128xbf16>, vector<128x384xbf16>, vector<128x384xf32> -> vector<128x384xf32>
    %4 = vector.extract_strided_slice %3 {offsets = [0, 0], sizes = [128, 256], strides = [1, 1]} : vector<128x384xf32> to vector<128x256xf32>
    %5 = arith.truncf %4 : vector<128x256xf32> to vector<128x256xbf16>
    %c0_3 = arith.constant 0 : index
    %c0_4 = arith.constant 0 : index
    %6 = vector.load %arg5[%c0_3, %c0_4] : memref<128x256xbf16, #tpu.memory_space<vmem>>, vector<128x256xbf16>
    tpu.vector_store %arg5[%c0_3, %c0_4], %5 {strides = array<i32>} : memref<128x256xbf16, #tpu.memory_space<vmem>>, vector<128x256xbf16>,
    %7 = vector.extract_strided_slice %3 {offsets = [0, 256], sizes = [128, 128], strides = [1, 1]} : vector<128x384xf32> to vector<128x128xf32>
    %c0_5 = arith.constant 0 : index
    %c0_6 = arith.constant 0 : index
    %8 = vector.load %arg6[%c0_5, %c0_6] : memref<128x128xf32, #tpu.memory_space<vmem>>, vector<128x128xf32>
    tpu.vector_store %arg6[%c0_5, %c0_6], %7 {strides = array<i32>} : memref<128x128xf32, #tpu.memory_space<vmem>>, vector<128x128xf32>,
    %9 = tpu.transpose %7, [1, 0] : vector<128x128xf32> -> vector<128x128xf32>
    %c0_7 = arith.constant 0 : index
    %c0_8 = arith.constant 0 : index
    %10 = vector.load %arg7[%c0_7, %c0_8] : memref<128x128xf32, #tpu.memory_space<vmem>>, vector<128x128xf32>
    tpu.vector_store %arg7[%c0_7, %c0_8], %9 {strides = array<i32>} : memref<128x128xf32, #tpu.memory_space<vmem>>, vector<128x128xf32>,
    return
  }
  func.func @transform_0(%arg0: i32) -> (i32, i32) {
    %c0_i32 = arith.constant 0 : i32
    %c0_i32_0 = arith.constant 0 : i32
    return %arg0, %c0_i32 : i32, i32
  }
  func.func @transform_1(%arg0: i32) -> (i32, i32) {
    %c0_i32 = arith.constant 0 : i32
    %c0_i32_0 = arith.constant 0 : i32
    %c0_i32_1 = arith.constant 0 : i32
    return %c0_i32, %c0_i32_0 : i32, i32
  }
  func.func @transform_2(%arg0: i32) -> (i32, i32) {
    %c0_i32 = arith.constant 0 : i32
    %c0_i32_0 = arith.constant 0 : i32
    %c0_i32_1 = arith.constant 0 : i32
    return %c0_i32, %c0_i32_0 : i32, i32
  }
  func.func @transform_3(%arg0: i32) -> (i32, i32) {
    %c0_i32 = arith.constant 0 : i32
    %c0_i32_0 = arith.constant 0 : i32
    %c0_i32_1 = arith.constant 0 : i32
    return %c0_i32, %c0_i32_0 : i32, i32
  }
  func.func @transform_4(%arg0: i32) -> (i32, i32) {
    %c0_i32 = arith.constant 0 : i32
    %c0_i32_0 = arith.constant 0 : i32
    return %arg0, %c0_i32 : i32, i32
  }
  func.func @transform_5(%arg0: i32) -> (i32, i32) {
    %c0_i32 = arith.constant 0 : i32
    %c0_i32_0 = arith.constant 0 : i32
    return %arg0, %c0_i32 : i32, i32
  }
  func.func @transform_6(%arg0: i32) -> (i32, i32) {
    %c0_i32 = arith.constant 0 : i32
    %c0_i32_0 = arith.constant 0 : i32
    return %c0_i32, %arg0 : i32, i32
  }
}

module attributes {stable_mosaic.version = 11 : i64} {
  func.func @attention_kernel(%arg0: i32, %arg1: i32, %arg2: memref<1x1xi32, #tpu.memory_space<smem>>, %arg3: memref<128x128xi8, #tpu.memory_space<vmem>>, %arg4: memref<128x128xf32, #tpu.memory_space<vmem>>, %arg5: memref<128x128xf32, #tpu.memory_space<vmem>>, %arg6: memref<128x256xbf16, #tpu.memory_space<vmem>>, %arg7: memref<1x256xf32, #tpu.memory_space<vmem>>, %arg8: memref<128x256xf32, #tpu.memory_space<vmem>>, %arg9: memref<128x2xf32, #tpu.memory_space<vmem>>, %arg10: memref<128x2xf32, #tpu.memory_space<vmem>>, %arg11: memref<2x128x128xf32, #tpu.memory_space<vmem>>) attributes {dimension_semantics = [#tpu.dimension_semantics<parallel>, #tpu.dimension_semantics<arbitrary>], iteration_bounds = array<i64: 1, 1>, scalar_prefetch = 1 : i64, scratch_operands = 3 : i64, tpu.core_type = #tpu.core_type<tc>, window_params = [{transform_indices = @transform_0, window_bounds = array<i64: 128, 128>}, {transform_indices = @transform_1, window_bounds = array<i64: 128, 128>}, {transform_indices = @transform_2, window_bounds = array<i64: 128, 128>}, {pipeline_mode = #tpu.pipeline_mode<synchronous>, transform_indices = @transform_3, window_bounds = array<i64: 128, 256>}, {pipeline_mode = #tpu.pipeline_mode<synchronous>, transform_indices = @transform_4, window_bounds = array<i64: 1, 256>}, {transform_indices = @transform_5, window_bounds = array<i64: 128, 256>}]} {
    %c0_i32 = arith.constant 0 : i32
    %0 = arith.cmpi eq, %arg1, %c0_i32 : i32
    %1 = arith.extui %0 : i1 to i32
    %c0_i32_0 = arith.constant 0 : i32
    %2 = arith.cmpi ne, %1, %c0_i32_0 : i32
    scf.if %2 {
      %cst = arith.constant -1.000000e+30 : f32
      %12 = vector.broadcast %cst : f32 to vector<128x2xf32>
      %c0 = arith.constant 0 : index
      %c0_5 = arith.constant 0 : index
      %13 = vector.load %arg9[%c0, %c0_5] : memref<128x2xf32, #tpu.memory_space<vmem>>, vector<128x2xf32>
      tpu.vector_store %arg9[%c0, %c0_5], %12 {strides = array<i32>} : memref<128x2xf32, #tpu.memory_space<vmem>>, vector<128x2xf32>,
      %cst_6 = arith.constant 0.000000e+00 : f32
      %14 = vector.broadcast %cst_6 : f32 to vector<128x2xf32>
      %c0_7 = arith.constant 0 : index
      %c0_8 = arith.constant 0 : index
      %15 = vector.load %arg10[%c0_7, %c0_8] : memref<128x2xf32, #tpu.memory_space<vmem>>, vector<128x2xf32>
      tpu.vector_store %arg10[%c0_7, %c0_8], %14 {strides = array<i32>} : memref<128x2xf32, #tpu.memory_space<vmem>>, vector<128x2xf32>,
      %cst_9 = arith.constant 0.000000e+00 : f32
      %16 = vector.broadcast %cst_9 : f32 to vector<2x128x128xf32>
      %c0_10 = arith.constant 0 : index
      %c0_11 = arith.constant 0 : index
      %c0_12 = arith.constant 0 : index
      %17 = vector.load %arg11[%c0_10, %c0_11, %c0_12] : memref<2x128x128xf32, #tpu.memory_space<vmem>>, vector<2x128x128xf32>
      tpu.vector_store %arg11[%c0_10, %c0_11, %c0_12], %16 {strides = array<i32>} : memref<2x128x128xf32, #tpu.memory_space<vmem>>, vector<2x128x128xf32>,
    } else {
    }
    %3 = arith.index_cast %arg0 : i32 to index
    %4 = arith.index_cast %arg1 : i32 to index
    %5 = memref.load %arg2[%3, %4] : memref<1x1xi32, #tpu.memory_space<smem>>
    %c0_i32_1 = arith.constant 0 : i32
    %6 = arith.cmpi sgt, %5, %c0_i32_1 : i32
    %7 = arith.extui %6 : i1 to i32
    %c0_i32_2 = arith.constant 0 : i32
    %8 = arith.cmpi ne, %7, %c0_i32_2 : i32
    scf.if %8 {
      %c0 = arith.constant 0 : index
      %c0_5 = arith.constant 0 : index
      %12 = vector.load %arg3[%c0, %c0_5] : memref<128x128xi8, #tpu.memory_space<vmem>>, vector<128x128xi8>
      %13 = arith.sitofp %12 : vector<128x128xi8> to vector<128x128xf32>
      %cst = arith.constant 1.000000e+00 : f32
      %14 = vector.broadcast %cst : f32 to vector<128x128xf32>
      %15 = arith.subf %13, %14 : vector<128x128xf32>
      %cst_6 = arith.constant 1.000000e+30 : f32
      %16 = vector.broadcast %cst_6 : f32 to vector<128x128xf32>
      %17 = arith.mulf %15, %16 : vector<128x128xf32>
      %c0_7 = arith.constant 0 : index
      %c0_8 = arith.constant 0 : index
      %18 = vector.load %arg4[%c0_7, %c0_8] : memref<128x128xf32, #tpu.memory_space<vmem>>, vector<128x1xf32>
      %c2 = arith.constant 2 : index
      %c0_9 = arith.constant 0 : index
      %19 = vector.load %arg5[%c2, %c0_9] : memref<128x128xf32, #tpu.memory_space<vmem>>, vector<1x128xf32>
      %20 = vector.broadcast %18 : vector<128x1xf32> to vector<128x128xf32>
      %21 = vector.broadcast %19 : vector<1x128xf32> to vector<128x128xf32>
      %22 = arith.addf %20, %21 : vector<128x128xf32>
      %cst_10 = arith.constant 2.000000e-01 : f32
      %23 = vector.broadcast %cst_10 : f32 to vector<128x128xf32>
      %24 = arith.mulf %23, %22 : vector<128x128xf32>
      %25 = arith.maximumf %22, %24 : vector<128x128xf32>
      %26 = arith.addf %25, %17 : vector<128x128xf32>
      %c0_11 = arith.constant 0 : index
      %c0_12 = arith.constant 0 : index
      %27 = vector.load %arg9[%c0_11, %c0_12] : memref<128x2xf32, #tpu.memory_space<vmem>>, vector<128x1xf32>
      %cst_13 = arith.constant dense<0xFF800000> : vector<128xf32>
      %28 = vector.multi_reduction <maximumf>, %26, %cst_13 [1] : vector<128x128xf32> to vector<128xf32>
      %29 = vector.shape_cast %28 : vector<128xf32> to vector<128x1xf32>
      %30 = arith.maximumf %27, %29 : vector<128x1xf32>
      %31 = vector.broadcast %30 : vector<128x1xf32> to vector<128x128xf32>
      %32 = arith.subf %26, %31 : vector<128x128xf32>
      %33 = math.exp %32 : vector<128x128xf32>
      %34 = arith.subf %27, %30 : vector<128x1xf32>
      %35 = math.exp %34 : vector<128x1xf32>
      %c128_i32 = arith.constant 128 : i32
      %36 = arith.muli %arg1, %c128_i32 : i32
      %37 = tpu.assume_multiple %36, 128 : i32
      %38 = arith.index_cast %37 : i32 to index
      %c0_14 = arith.constant 0 : index
      %39 = vector.load %arg6[%38, %c0_14] : memref<128x256xbf16, #tpu.memory_space<vmem>>, vector<128x128xbf16>
      %c0_15 = arith.constant 0 : index
      %c0_16 = arith.constant 0 : index
      %40 = vector.load %arg10[%c0_15, %c0_16] : memref<128x2xf32, #tpu.memory_space<vmem>>, vector<128x1xf32>
      %41 = arith.mulf %35, %40 : vector<128x1xf32>
      %cst_17 = arith.constant dense<0.000000e+00> : vector<128xf32>
      %42 = vector.multi_reduction <add>, %33, %cst_17 [1] : vector<128x128xf32> to vector<128xf32>
      %43 = vector.shape_cast %42 : vector<128xf32> to vector<128x1xf32>
      %44 = arith.addf %41, %43 : vector<128x1xf32>
      %c0_18 = arith.constant 0 : index
      %c0_19 = arith.constant 0 : index
      %45 = vector.load %arg10[%c0_18, %c0_19] : memref<128x2xf32, #tpu.memory_space<vmem>>, vector<128x1xf32>
      tpu.vector_store %arg10[%c0_18, %c0_19], %44 {strides = array<i32>} : memref<128x2xf32, #tpu.memory_space<vmem>>, vector<128x1xf32>,
      %c0_20 = arith.constant 0 : index
      %c0_21 = arith.constant 0 : index
      %c0_22 = arith.constant 0 : index
      %46 = vector.load %arg11[%c0_20, %c0_21, %c0_22] : memref<2x128x128xf32, #tpu.memory_space<vmem>>, vector<1x128x128xf32>
      %47 = vector.shape_cast %46 : vector<1x128x128xf32> to vector<128x128xf32>
      %48 = vector.broadcast %35 : vector<128x1xf32> to vector<128x128xf32>
      %49 = arith.mulf %48, %47 : vector<128x128xf32>
      %50 = arith.truncf %33 : vector<128x128xf32> to vector<128x128xbf16>
      %cst_23 = arith.constant dense<0.000000e+00> : vector<128x128xf32>
      %51 = tpu.matmul %50, %39, %cst_23 {dimension_numbers = #tpu.dot_dimension_numbers<[1], [0], [0], [1], [0, 0, 1, 1], [], []>} : vector<128x128xbf16>, vector<128x128xbf16>, vector<128x128xf32> -> vector<128x128xf32>
      %52 = arith.addf %49, %51 : vector<128x128xf32>
      %c0_24 = arith.constant 0 : index
      %c0_25 = arith.constant 0 : index
      %c0_26 = arith.constant 0 : index
      %53 = vector.load %arg11[%c0_24, %c0_25, %c0_26] : memref<2x128x128xf32, #tpu.memory_space<vmem>>, vector<1x128x128xf32>
      %54 = vector.shape_cast %53 : vector<1x128x128xf32> to vector<128x128xf32>
      %55 = vector.shape_cast %52 : vector<128x128xf32> to vector<1x128x128xf32>
      tpu.vector_store %arg11[%c0_24, %c0_25, %c0_26], %55 {strides = array<i32>} : memref<2x128x128xf32, #tpu.memory_space<vmem>>, vector<1x128x128xf32>,
      %c0_27 = arith.constant 0 : index
      %c0_28 = arith.constant 0 : index
      %56 = vector.load %arg9[%c0_27, %c0_28] : memref<128x2xf32, #tpu.memory_space<vmem>>, vector<128x1xf32>
      tpu.vector_store %arg9[%c0_27, %c0_28], %30 {strides = array<i32>} : memref<128x2xf32, #tpu.memory_space<vmem>>, vector<128x1xf32>,
      %c0_29 = arith.constant 0 : index
      %c1 = arith.constant 1 : index
      %57 = vector.load %arg4[%c0_29, %c1] : memref<128x128xf32, #tpu.memory_space<vmem>>, vector<128x1xf32>
      %c3 = arith.constant 3 : index
      %c0_30 = arith.constant 0 : index
      %58 = vector.load %arg5[%c3, %c0_30] : memref<128x128xf32, #tpu.memory_space<vmem>>, vector<1x128xf32>
      %59 = vector.broadcast %57 : vector<128x1xf32> to vector<128x128xf32>
      %60 = vector.broadcast %58 : vector<1x128xf32> to vector<128x128xf32>
      %61 = arith.addf %59, %60 : vector<128x128xf32>
      %cst_31 = arith.constant 2.000000e-01 : f32
      %62 = vector.broadcast %cst_31 : f32 to vector<128x128xf32>
      %63 = arith.mulf %62, %61 : vector<128x128xf32>
      %64 = arith.maximumf %61, %63 : vector<128x128xf32>
      %65 = arith.addf %64, %17 : vector<128x128xf32>
      %c0_32 = arith.constant 0 : index
      %c1_33 = arith.constant 1 : index
      %66 = vector.load %arg9[%c0_32, %c1_33] : memref<128x2xf32, #tpu.memory_space<vmem>>, vector<128x1xf32>
      %cst_34 = arith.constant dense<0xFF800000> : vector<128xf32>
      %67 = vector.multi_reduction <maximumf>, %65, %cst_34 [1] : vector<128x128xf32> to vector<128xf32>
      %68 = vector.shape_cast %67 : vector<128xf32> to vector<128x1xf32>
      %69 = arith.maximumf %66, %68 : vector<128x1xf32>
      %70 = vector.broadcast %69 : vector<128x1xf32> to vector<128x128xf32>
      %71 = arith.subf %65, %70 : vector<128x128xf32>
      %72 = math.exp %71 : vector<128x128xf32>
      %73 = arith.subf %66, %69 : vector<128x1xf32>
      %74 = math.exp %73 : vector<128x1xf32>
      %c128_i32_35 = arith.constant 128 : i32
      %75 = arith.muli %arg1, %c128_i32_35 : i32
      %76 = tpu.assume_multiple %75, 128 : i32
      %77 = arith.index_cast %76 : i32 to index
      %c128 = arith.constant 128 : index
      %78 = vector.load %arg6[%77, %c128] : memref<128x256xbf16, #tpu.memory_space<vmem>>, vector<128x128xbf16>
      %c0_36 = arith.constant 0 : index
      %c1_37 = arith.constant 1 : index
      %79 = vector.load %arg10[%c0_36, %c1_37] : memref<128x2xf32, #tpu.memory_space<vmem>>, vector<128x1xf32>
      %80 = arith.mulf %74, %79 : vector<128x1xf32>
      %cst_38 = arith.constant dense<0.000000e+00> : vector<128xf32>
      %81 = vector.multi_reduction <add>, %72, %cst_38 [1] : vector<128x128xf32> to vector<128xf32>
      %82 = vector.shape_cast %81 : vector<128xf32> to vector<128x1xf32>
      %83 = arith.addf %80, %82 : vector<128x1xf32>
      %c0_39 = arith.constant 0 : index
      %c1_40 = arith.constant 1 : index
      %84 = vector.load %arg10[%c0_39, %c1_40] : memref<128x2xf32, #tpu.memory_space<vmem>>, vector<128x1xf32>
      tpu.vector_store %arg10[%c0_39, %c1_40], %83 {strides = array<i32>} : memref<128x2xf32, #tpu.memory_space<vmem>>, vector<128x1xf32>,
      %c1_41 = arith.constant 1 : index
      %c0_42 = arith.constant 0 : index
      %c0_43 = arith.constant 0 : index
      %85 = vector.load %arg11[%c1_41, %c0_42, %c0_43] : memref<2x128x128xf32, #tpu.memory_space<vmem>>, vector<1x128x128xf32>
      %86 = vector.shape_cast %85 : vector<1x128x128xf32> to vector<128x128xf32>
      %87 = vector.broadcast %74 : vector<128x1xf32> to vector<128x128xf32>
      %88 = arith.mulf %87, %86 : vector<128x128xf32>
      %89 = arith.truncf %72 : vector<128x128xf32> to vector<128x128xbf16>
      %cst_44 = arith.constant dense<0.000000e+00> : vector<128x128xf32>
      %90 = tpu.matmul %89, %78, %cst_44 {dimension_numbers = #tpu.dot_dimension_numbers<[1], [0], [0], [1], [0, 0, 1, 1], [], []>} : vector<128x128xbf16>, vector<128x128xbf16>, vector<128x128xf32> -> vector<128x128xf32>
      %91 = arith.addf %88, %90 : vector<128x128xf32>
      %c1_45 = arith.constant 1 : index
      %c0_46 = arith.constant 0 : index
      %c0_47 = arith.constant 0 : index
      %92 = vector.load %arg11[%c1_45, %c0_46, %c0_47] : memref<2x128x128xf32, #tpu.memory_space<vmem>>, vector<1x128x128xf32>
      %93 = vector.shape_cast %92 : vector<1x128x128xf32> to vector<128x128xf32>
      %94 = vector.shape_cast %91 : vector<128x128xf32> to vector<1x128x128xf32>
      tpu.vector_store %arg11[%c1_45, %c0_46, %c0_47], %94 {strides = array<i32>} : memref<2x128x128xf32, #tpu.memory_space<vmem>>, vector<1x128x128xf32>,
      %c0_48 = arith.constant 0 : index
      %c1_49 = arith.constant 1 : index
      %95 = vector.load %arg9[%c0_48, %c1_49] : memref<128x2xf32, #tpu.memory_space<vmem>>, vector<128x1xf32>
      tpu.vector_store %arg9[%c0_48, %c1_49], %69 {strides = array<i32>} : memref<128x2xf32, #tpu.memory_space<vmem>>, vector<128x1xf32>,
    } else {
    }
    %c0_i32_3 = arith.constant 0 : i32
    %9 = arith.cmpi eq, %arg1, %c0_i32_3 : i32
    %10 = arith.extui %9 : i1 to i32
    %c0_i32_4 = arith.constant 0 : i32
    %11 = arith.cmpi ne, %10, %c0_i32_4 : i32
    scf.if %11 {
      %c0 = arith.constant 0 : index
      %c0_5 = arith.constant 0 : index
      %12 = vector.load %arg10[%c0, %c0_5] : memref<128x2xf32, #tpu.memory_space<vmem>>, vector<128x1xf32>
      %cst = arith.constant 1.000000e-30 : f32
      %13 = vector.broadcast %cst : f32 to vector<128x1xf32>
      %14 = arith.maximumf %12, %13 : vector<128x1xf32>
      %15 = tpu.reciprocal %14 {approx = true} : vector<128x1xf32> -> vector<128x1xf32>
      %c0_6 = arith.constant 0 : index
      %c0_7 = arith.constant 0 : index
      %c0_8 = arith.constant 0 : index
      %16 = vector.load %arg11[%c0_6, %c0_7, %c0_8] : memref<2x128x128xf32, #tpu.memory_space<vmem>>, vector<1x128x128xf32>
      %17 = vector.shape_cast %16 : vector<1x128x128xf32> to vector<128x128xf32>
      %18 = vector.broadcast %15 : vector<128x1xf32> to vector<128x128xf32>
      %19 = arith.mulf %17, %18 : vector<128x128xf32>
      %c0_9 = arith.constant 0 : index
      %c1 = arith.constant 1 : index
      %20 = vector.load %arg10[%c0_9, %c1] : memref<128x2xf32, #tpu.memory_space<vmem>>, vector<128x1xf32>
      %cst_10 = arith.constant 1.000000e-30 : f32
      %21 = vector.broadcast %cst_10 : f32 to vector<128x1xf32>
      %22 = arith.maximumf %20, %21 : vector<128x1xf32>
      %23 = tpu.reciprocal %22 {approx = true} : vector<128x1xf32> -> vector<128x1xf32>
      %c1_11 = arith.constant 1 : index
      %c0_12 = arith.constant 0 : index
      %c0_13 = arith.constant 0 : index
      %24 = vector.load %arg11[%c1_11, %c0_12, %c0_13] : memref<2x128x128xf32, #tpu.memory_space<vmem>>, vector<1x128x128xf32>
      %25 = vector.shape_cast %24 : vector<1x128x128xf32> to vector<128x128xf32>
      %26 = vector.broadcast %23 : vector<128x1xf32> to vector<128x128xf32>
      %27 = arith.mulf %25, %26 : vector<128x128xf32>
      %28 = tpu.concatenate %19, %27 in 1 : vector<128x128xf32>, vector<128x128xf32> -> vector<128x256xf32>
      %c0_14 = arith.constant 0 : index
      %c0_15 = arith.constant 0 : index
      %29 = vector.load %arg7[%c0_14, %c0_15] : memref<1x256xf32, #tpu.memory_space<vmem>>, vector<1x256xf32>
      %30 = vector.broadcast %29 : vector<1x256xf32> to vector<128x256xf32>
      %31 = arith.addf %28, %30 : vector<128x256xf32>
      %c0_16 = arith.constant 0 : index
      %c0_17 = arith.constant 0 : index
      %32 = vector.load %arg8[%c0_16, %c0_17] : memref<128x256xf32, #tpu.memory_space<vmem>>, vector<128x256xf32>
      tpu.vector_store %arg8[%c0_16, %c0_17], %31 {strides = array<i32>} : memref<128x256xf32, #tpu.memory_space<vmem>>, vector<128x256xf32>,
    } else {
    }
    return
  }
  func.func @transform_0(%arg0: i32, %arg1: i32, %arg2: memref<1x1xi32, #tpu.memory_space<smem>>) -> (i32, i32) {
    %c0_i32 = arith.constant 0 : i32
    return %arg0, %arg1 : i32, i32
  }
  func.func @transform_1(%arg0: i32, %arg1: i32, %arg2: memref<1x1xi32, #tpu.memory_space<smem>>) -> (i32, i32) {
    %c0_i32 = arith.constant 0 : i32
    %c0_i32_0 = arith.constant 0 : i32
    return %arg0, %c0_i32 : i32, i32
  }
  func.func @transform_2(%arg0: i32, %arg1: i32, %arg2: memref<1x1xi32, #tpu.memory_space<smem>>) -> (i32, i32) {
    %c0_i32 = arith.constant 0 : i32
    %c0_i32_0 = arith.constant 0 : i32
    return %c0_i32, %arg1 : i32, i32
  }
  func.func @transform_3(%arg0: i32, %arg1: i32, %arg2: memref<1x1xi32, #tpu.memory_space<smem>>) -> (i32, i32) {
    %c0_i32 = arith.constant 0 : i32
    %c0_i32_0 = arith.constant 0 : i32
    %c0_i32_1 = arith.constant 0 : i32
    return %c0_i32, %c0_i32_0 : i32, i32
  }
  func.func @transform_4(%arg0: i32, %arg1: i32, %arg2: memref<1x1xi32, #tpu.memory_space<smem>>) -> (i32, i32) {
    %c0_i32 = arith.constant 0 : i32
    %c0_i32_0 = arith.constant 0 : i32
    %c0_i32_1 = arith.constant 0 : i32
    return %c0_i32, %c0_i32_0 : i32, i32
  }
  func.func @transform_5(%arg0: i32, %arg1: i32, %arg2: memref<1x1xi32, #tpu.memory_space<smem>>) -> (i32, i32) {
    %c0_i32 = arith.constant 0 : i32
    %c0_i32_0 = arith.constant 0 : i32
    return %arg0, %c0_i32 : i32, i32
  }
}

module attributes {stable_mosaic.version = 11 : i64} {
  func.func @transform_kernel(%arg0: i32, %arg1: memref<128x256xf32, #tpu.memory_space<vmem>>, %arg2: memref<1x256xf32, #tpu.memory_space<vmem>>, %arg3: memref<1x256xf32, #tpu.memory_space<vmem>>, %arg4: memref<256x384xbf16, #tpu.memory_space<vmem>>, %arg5: memref<128x256xbf16, #tpu.memory_space<vmem>>, %arg6: memref<128x128xf32, #tpu.memory_space<vmem>>, %arg7: memref<128x128xf32, #tpu.memory_space<vmem>>) attributes {dimension_semantics = [#tpu.dimension_semantics<parallel>], iteration_bounds = array<i64: 1>, scalar_prefetch = 0 : i64, scratch_operands = 0 : i64, tpu.core_type = #tpu.core_type<tc>, window_params = [{transform_indices = @transform_0, window_bounds = array<i64: 128, 256>}, {pipeline_mode = #tpu.pipeline_mode<synchronous>, transform_indices = @transform_1, window_bounds = array<i64: 1, 256>}, {pipeline_mode = #tpu.pipeline_mode<synchronous>, transform_indices = @transform_2, window_bounds = array<i64: 1, 256>}, {pipeline_mode = #tpu.pipeline_mode<synchronous>, transform_indices = @transform_3, window_bounds = array<i64: 256, 384>}, {transform_indices = @transform_4, window_bounds = array<i64: 128, 256>}, {transform_indices = @transform_5, window_bounds = array<i64: 128, 128>}, {transform_indices = @transform_6, window_bounds = array<i64: 128, 128>}]} {
    %c0 = arith.constant 0 : index
    %c0_0 = arith.constant 0 : index
    %0 = vector.load %arg1[%c0, %c0_0] : memref<128x256xf32, #tpu.memory_space<vmem>>, vector<128x256xf32>
    %c0_1 = arith.constant 0 : index
    %c0_2 = arith.constant 0 : index
    %1 = vector.load %arg2[%c0_1, %c0_2] : memref<1x256xf32, #tpu.memory_space<vmem>>, vector<1x256xf32>
    %2 = vector.broadcast %1 : vector<1x256xf32> to vector<128x256xf32>
    %3 = arith.mulf %0, %2 : vector<128x256xf32>
    %c0_3 = arith.constant 0 : index
    %c0_4 = arith.constant 0 : index
    %4 = vector.load %arg3[%c0_3, %c0_4] : memref<1x256xf32, #tpu.memory_space<vmem>>, vector<1x256xf32>
    %5 = vector.broadcast %4 : vector<1x256xf32> to vector<128x256xf32>
    %6 = arith.addf %3, %5 : vector<128x256xf32>
    %cst = arith.constant 0.000000e+00 : f32
    %7 = vector.broadcast %cst : f32 to vector<128x256xf32>
    %8 = arith.maximumf %6, %7 : vector<128x256xf32>
    %9 = arith.truncf %8 : vector<128x256xf32> to vector<128x256xbf16>
    %c0_5 = arith.constant 0 : index
    %c0_6 = arith.constant 0 : index
    %10 = vector.load %arg4[%c0_5, %c0_6] : memref<256x384xbf16, #tpu.memory_space<vmem>>, vector<256x384xbf16>
    %cst_7 = arith.constant dense<0.000000e+00> : vector<128x384xf32>
    %11 = tpu.matmul %9, %10, %cst_7 {dimension_numbers = #tpu.dot_dimension_numbers<[1], [0], [0], [1], [0, 0, 1, 1], [], []>} : vector<128x256xbf16>, vector<256x384xbf16>, vector<128x384xf32> -> vector<128x384xf32>
    %12 = vector.extract_strided_slice %11 {offsets = [0, 0], sizes = [128, 256], strides = [1, 1]} : vector<128x384xf32> to vector<128x256xf32>
    %13 = arith.truncf %12 : vector<128x256xf32> to vector<128x256xbf16>
    %c0_8 = arith.constant 0 : index
    %c0_9 = arith.constant 0 : index
    %14 = vector.load %arg5[%c0_8, %c0_9] : memref<128x256xbf16, #tpu.memory_space<vmem>>, vector<128x256xbf16>
    tpu.vector_store %arg5[%c0_8, %c0_9], %13 {strides = array<i32>} : memref<128x256xbf16, #tpu.memory_space<vmem>>, vector<128x256xbf16>,
    %15 = vector.extract_strided_slice %11 {offsets = [0, 256], sizes = [128, 128], strides = [1, 1]} : vector<128x384xf32> to vector<128x128xf32>
    %c0_10 = arith.constant 0 : index
    %c0_11 = arith.constant 0 : index
    %16 = vector.load %arg6[%c0_10, %c0_11] : memref<128x128xf32, #tpu.memory_space<vmem>>, vector<128x128xf32>
    tpu.vector_store %arg6[%c0_10, %c0_11], %15 {strides = array<i32>} : memref<128x128xf32, #tpu.memory_space<vmem>>, vector<128x128xf32>,
    %17 = tpu.transpose %15, [1, 0] : vector<128x128xf32> -> vector<128x128xf32>
    %c0_12 = arith.constant 0 : index
    %c0_13 = arith.constant 0 : index
    %18 = vector.load %arg7[%c0_12, %c0_13] : memref<128x128xf32, #tpu.memory_space<vmem>>, vector<128x128xf32>
    tpu.vector_store %arg7[%c0_12, %c0_13], %17 {strides = array<i32>} : memref<128x128xf32, #tpu.memory_space<vmem>>, vector<128x128xf32>,
    return
  }
  func.func @transform_0(%arg0: i32) -> (i32, i32) {
    %c0_i32 = arith.constant 0 : i32
    %c0_i32_0 = arith.constant 0 : i32
    return %arg0, %c0_i32 : i32, i32
  }
  func.func @transform_1(%arg0: i32) -> (i32, i32) {
    %c0_i32 = arith.constant 0 : i32
    %c0_i32_0 = arith.constant 0 : i32
    %c0_i32_1 = arith.constant 0 : i32
    return %c0_i32, %c0_i32_0 : i32, i32
  }
  func.func @transform_2(%arg0: i32) -> (i32, i32) {
    %c0_i32 = arith.constant 0 : i32
    %c0_i32_0 = arith.constant 0 : i32
    %c0_i32_1 = arith.constant 0 : i32
    return %c0_i32, %c0_i32_0 : i32, i32
  }
  func.func @transform_3(%arg0: i32) -> (i32, i32) {
    %c0_i32 = arith.constant 0 : i32
    %c0_i32_0 = arith.constant 0 : i32
    %c0_i32_1 = arith.constant 0 : i32
    return %c0_i32, %c0_i32_0 : i32, i32
  }
  func.func @transform_4(%arg0: i32) -> (i32, i32) {
    %c0_i32 = arith.constant 0 : i32
    %c0_i32_0 = arith.constant 0 : i32
    return %arg0, %c0_i32 : i32, i32
  }
  func.func @transform_5(%arg0: i32) -> (i32, i32) {
    %c0_i32 = arith.constant 0 : i32
    %c0_i32_0 = arith.constant 0 : i32
    return %arg0, %c0_i32 : i32, i32
  }
  func.func @transform_6(%arg0: i32) -> (i32, i32) {
    %c0_i32 = arith.constant 0 : i32
    %c0_i32_0 = arith.constant 0 : i32
    return %c0_i32, %arg0 : i32, i32
  }
}

module attributes {stable_mosaic.version = 11 : i64} {
  func.func @pool_linear_kernel(%arg0: i32, %arg1: memref<128x256xf32, #tpu.memory_space<vmem>>, %arg2: memref<1x256xf32, #tpu.memory_space<vmem>>, %arg3: memref<1x256xf32, #tpu.memory_space<vmem>>, %arg4: memref<2x128xf32, #tpu.memory_space<vmem>>, %arg5: memref<256x4xf32, #tpu.memory_space<vmem>>, %arg6: memref<1x4xf32, #tpu.memory_space<vmem>>, %arg7: memref<2x4xf32, #tpu.memory_space<vmem>>) attributes {dimension_semantics = [#tpu.dimension_semantics<arbitrary>], iteration_bounds = array<i64: 1>, scalar_prefetch = 0 : i64, scratch_operands = 0 : i64, tpu.core_type = #tpu.core_type<tc>, window_params = [{transform_indices = @transform_0, window_bounds = array<i64: 128, 256>}, {pipeline_mode = #tpu.pipeline_mode<synchronous>, transform_indices = @transform_1, window_bounds = array<i64: 1, 256>}, {pipeline_mode = #tpu.pipeline_mode<synchronous>, transform_indices = @transform_2, window_bounds = array<i64: 1, 256>}, {transform_indices = @transform_3, window_bounds = array<i64: 2, 128>}, {pipeline_mode = #tpu.pipeline_mode<synchronous>, transform_indices = @transform_4, window_bounds = array<i64: 256, 4>}, {pipeline_mode = #tpu.pipeline_mode<synchronous>, transform_indices = @transform_5, window_bounds = array<i64: 1, 4>}, {pipeline_mode = #tpu.pipeline_mode<synchronous>, transform_indices = @transform_6, window_bounds = array<i64: 2, 4>}]} {
    %c0_i32 = arith.constant 0 : i32
    %0 = arith.cmpi eq, %arg0, %c0_i32 : i32
    %1 = arith.extui %0 : i1 to i32
    %c0_i32_0 = arith.constant 0 : i32
    %2 = arith.cmpi ne, %1, %c0_i32_0 : i32
    scf.if %2 {
      %cst_18 = arith.constant 0.000000e+00 : f32
      %22 = vector.broadcast %cst_18 : f32 to vector<2x4xf32>
      %c0_19 = arith.constant 0 : index
      %c0_20 = arith.constant 0 : index
      %23 = vector.load %arg7[%c0_19, %c0_20] : memref<2x4xf32, #tpu.memory_space<vmem>>, vector<2x4xf32>
      tpu.vector_store %arg7[%c0_19, %c0_20], %22 {strides = array<i32>} : memref<2x4xf32, #tpu.memory_space<vmem>>, vector<2x4xf32>,
    } else {
    }
    %c0 = arith.constant 0 : index
    %c0_1 = arith.constant 0 : index
    %3 = vector.load %arg1[%c0, %c0_1] : memref<128x256xf32, #tpu.memory_space<vmem>>, vector<128x256xf32>
    %c0_2 = arith.constant 0 : index
    %c0_3 = arith.constant 0 : index
    %4 = vector.load %arg2[%c0_2, %c0_3] : memref<1x256xf32, #tpu.memory_space<vmem>>, vector<1x256xf32>
    %5 = vector.broadcast %4 : vector<1x256xf32> to vector<128x256xf32>
    %6 = arith.mulf %3, %5 : vector<128x256xf32>
    %c0_4 = arith.constant 0 : index
    %c0_5 = arith.constant 0 : index
    %7 = vector.load %arg3[%c0_4, %c0_5] : memref<1x256xf32, #tpu.memory_space<vmem>>, vector<1x256xf32>
    %8 = vector.broadcast %7 : vector<1x256xf32> to vector<128x256xf32>
    %9 = arith.addf %6, %8 : vector<128x256xf32>
    %cst = arith.constant 0.000000e+00 : f32
    %10 = vector.broadcast %cst : f32 to vector<128x256xf32>
    %11 = arith.maximumf %9, %10 : vector<128x256xf32>
    %c0_6 = arith.constant 0 : index
    %c0_7 = arith.constant 0 : index
    %12 = vector.load %arg4[%c0_6, %c0_7] : memref<2x128xf32, #tpu.memory_space<vmem>>, vector<2x128xf32>
    %cst_8 = arith.constant dense<0.000000e+00> : vector<2x256xf32>
    %13 = tpu.matmul %12, %11, %cst_8 {dimension_numbers = #tpu.dot_dimension_numbers<[1], [0], [0], [1], [0, 0, 1, 1], [], []>} : vector<2x128xf32>, vector<128x256xf32>, vector<2x256xf32> -> vector<2x256xf32>
    %c0_9 = arith.constant 0 : index
    %c0_10 = arith.constant 0 : index
    %14 = vector.load %arg7[%c0_9, %c0_10] : memref<2x4xf32, #tpu.memory_space<vmem>>, vector<2x4xf32>
    %c0_11 = arith.constant 0 : index
    %c0_12 = arith.constant 0 : index
    %15 = vector.load %arg5[%c0_11, %c0_12] : memref<256x4xf32, #tpu.memory_space<vmem>>, vector<256x4xf32>
    %cst_13 = arith.constant dense<0.000000e+00> : vector<2x4xf32>
    %16 = tpu.matmul %13, %15, %cst_13 {dimension_numbers = #tpu.dot_dimension_numbers<[1], [0], [0], [1], [0, 0, 1, 1], [], []>} : vector<2x256xf32>, vector<256x4xf32>, vector<2x4xf32> -> vector<2x4xf32>
    %17 = arith.addf %14, %16 : vector<2x4xf32>
    %c0_14 = arith.constant 0 : index
    %c0_15 = arith.constant 0 : index
    %18 = vector.load %arg7[%c0_14, %c0_15] : memref<2x4xf32, #tpu.memory_space<vmem>>, vector<2x4xf32>
    tpu.vector_store %arg7[%c0_14, %c0_15], %17 {strides = array<i32>} : memref<2x4xf32, #tpu.memory_space<vmem>>, vector<2x4xf32>,
    %c0_i32_16 = arith.constant 0 : i32
    %19 = arith.cmpi eq, %arg0, %c0_i32_16 : i32
    %20 = arith.extui %19 : i1 to i32
    %c0_i32_17 = arith.constant 0 : i32
    %21 = arith.cmpi ne, %20, %c0_i32_17 : i32
    scf.if %21 {
      %c0_18 = arith.constant 0 : index
      %c0_19 = arith.constant 0 : index
      %22 = vector.load %arg7[%c0_18, %c0_19] : memref<2x4xf32, #tpu.memory_space<vmem>>, vector<2x4xf32>
      %c0_20 = arith.constant 0 : index
      %c0_21 = arith.constant 0 : index
      %23 = vector.load %arg6[%c0_20, %c0_21] : memref<1x4xf32, #tpu.memory_space<vmem>>, vector<1x4xf32>
      %24 = vector.broadcast %23 : vector<1x4xf32> to vector<2x4xf32>
      %25 = arith.addf %22, %24 : vector<2x4xf32>
      %c0_22 = arith.constant 0 : index
      %c0_23 = arith.constant 0 : index
      %26 = vector.load %arg7[%c0_22, %c0_23] : memref<2x4xf32, #tpu.memory_space<vmem>>, vector<2x4xf32>
      tpu.vector_store %arg7[%c0_22, %c0_23], %25 {strides = array<i32>} : memref<2x4xf32, #tpu.memory_space<vmem>>, vector<2x4xf32>,
    } else {
    }
    return
  }
  func.func @transform_0(%arg0: i32) -> (i32, i32) {
    %c0_i32 = arith.constant 0 : i32
    %c0_i32_0 = arith.constant 0 : i32
    return %arg0, %c0_i32 : i32, i32
  }
  func.func @transform_1(%arg0: i32) -> (i32, i32) {
    %c0_i32 = arith.constant 0 : i32
    %c0_i32_0 = arith.constant 0 : i32
    %c0_i32_1 = arith.constant 0 : i32
    return %c0_i32, %c0_i32_0 : i32, i32
  }
  func.func @transform_2(%arg0: i32) -> (i32, i32) {
    %c0_i32 = arith.constant 0 : i32
    %c0_i32_0 = arith.constant 0 : i32
    %c0_i32_1 = arith.constant 0 : i32
    return %c0_i32, %c0_i32_0 : i32, i32
  }
  func.func @transform_3(%arg0: i32) -> (i32, i32) {
    %c0_i32 = arith.constant 0 : i32
    %c0_i32_0 = arith.constant 0 : i32
    return %c0_i32, %arg0 : i32, i32
  }
  func.func @transform_4(%arg0: i32) -> (i32, i32) {
    %c0_i32 = arith.constant 0 : i32
    %c0_i32_0 = arith.constant 0 : i32
    %c0_i32_1 = arith.constant 0 : i32
    return %c0_i32, %c0_i32_0 : i32, i32
  }
  func.func @transform_5(%arg0: i32) -> (i32, i32) {
    %c0_i32 = arith.constant 0 : i32
    %c0_i32_0 = arith.constant 0 : i32
    %c0_i32_1 = arith.constant 0 : i32
    return %c0_i32, %c0_i32_0 : i32, i32
  }
  func.func @transform_6(%arg0: i32) -> (i32, i32) {
    %c0_i32 = arith.constant 0 : i32
    %c0_i32_0 = arith.constant 0 : i32
    %c0_i32_1 = arith.constant 0 : i32
    return %c0_i32, %c0_i32_0 : i32, i32
  }
}

</mosaic_0001>

<bundles_post_ra>
// kernel: gat_forward.5
= control target key start
LH: loop header
LB: loop body
LE: loop exit
PB: predicated region body
PF: predicated region fallthrough
CT: control target
= control target key end

     0   :  { %12 = vsyncpa [#allocation3], 0  ;;  %s1046_s0 = inlined_call_operand.hbm [shape: f32[128,128], index: 0, kind: input, shape index: {}]   ;;  %s1047_s1 = inlined_call_operand.vmem [shape: f32[1,128], index: 1, kind: input, shape index: {}]   ;;  %s1048_s2 = inlined_call_operand.vmem [shape: f32[1,128], index: 2, kind: input, shape index: {}]   ;;  %s1049_s3 = inlined_call_operand.hbm [shape: bf16[128,384], index: 3, kind: input, shape index: {}]   ;;  %s1050_s4 = inlined_call_operand.vmem [shape: bf16[128,256], index: 4, kind: output, shape index: {0}]   ;;  %s1051_s5 = inlined_call_operand.vmem [shape: f32[128,128], index: 5, kind: output, shape index: {1}]   ;;  %s1052_s6 = inlined_call_operand.vmem [shape: f32[128,128], index: 6, kind: output, shape index: {2}]  }
   0x1   :  { %13 = vsyncpa [#allocation5], 0  ;;  %s824_s21 = smov [#allocation2]   ;;  %s776_s2 = scalar_lea.hbm %s1046_s0, 2048 }
   0x2   :  { %s19_s22 = sshll.u32 %s824_s21, 4  ;;  %p777_p0 = scmp.ne.s32.totalorder %s1046_s0, %s776_s2  ;;  %s20_s22 = int_to_ptr.vmem [resolvable:$true] %s19_s22 }
   0x3   :  { %p780_p1 = scmp.lt.u32.totalorder %s776_s2, %s1046_s0 }
   0x5   :  { %p782_p2 = pnand %p780_p1, %p777_p0 }
   0x7   :  { %785 = shalt.err (!%p782_p2)
}
   0x8   :  { %s786_s28 = scalar_lea.vmem %s20_s22, 2048  ;;  %p791_p4 = scmp.lt.s32.totalorder %s20_s22, %s20_s22 }
   0x9   :  { %p787_p3 = scmp.ne.s32.totalorder %s20_s22, %s786_s28  ;;  %p792_p5 = scmp.lt.s32.totalorder %s786_s28, %s786_s28 }
   0xb   :  { %p793_p6 = por %p792_p5, %p791_p4 }
   0xd   :  { %p794_p7 = pnand %p793_p6, %p787_p3 }
   0xf   :  { %797 = shalt.err (!%p794_p7)
}
  0x10   :  { %s825_s29 = smov 128   ;;  %s826_s30 = smov 8  }
  0x11   :  { %25 = dma.hbm_to_vmem [thread:$0]  %s1046_s0, 2048, %s20_s22, [#allocation3], %s825_s29, %s825_s29, %s826_s30  }
  0x12   :  { %s827_s9 = smov [#allocation4]   ;;  %s798_s13 = scalar_lea.hbm %s1049_s3, 3072 }
  0x13   :  { %s35_s10 = sshll.u32 %s827_s9, 4  ;;  %p799_p8 = scmp.ne.s32.totalorder %s1049_s3, %s798_s13  ;;  %s36_s10 = int_to_ptr.vmem [resolvable:$true] %s35_s10 }
  0x14   :  { %p802_p9 = scmp.lt.u32.totalorder %s798_s13, %s1049_s3 }
  0x16   :  { %p804_p10 = pnand %p802_p9, %p799_p8 }
  0x18   :  { %807 = shalt.err (!%p804_p10)
}
  0x19   :  { %s808_s18 = scalar_lea.vmem %s36_s10, 3072  ;;  %p813_p12 = scmp.lt.s32.totalorder %s36_s10, %s36_s10 }
  0x1a   :  { %p809_p11 = scmp.ne.s32.totalorder %s36_s10, %s808_s18  ;;  %p814_p13 = scmp.lt.s32.totalorder %s808_s18, %s808_s18 }
  0x1c   :  { %p815_p0 = por %p814_p13, %p813_p12 }
  0x1e   :  { %p816_p1 = pnand %p815_p0, %p809_p11 }
  0x20   :  { %819 = shalt.err (!%p816_p1)
}
  0x21   :  { %s828_s0 = smov 192   ;;  %s829_s19 = smov 12  }
  0x22   :  { %41 = dma.hbm_to_vmem [thread:$0]  %s1049_s3, 3072, %s36_s10, [#allocation5], %s828_s0, %s828_s0, %s829_s19  }
  0x23   :  { %820 = dma.done.wait [#allocation3], 2048  }
  0x24   :  { %821 = vsyncadd [#allocation3], 4294965248 }
  0x25   :  { %822 = dma.done.wait [#allocation5], 3072  }
  0x26   :  { %823 = vsyncadd [#allocation5], 4294964224  ;;  %v830_v0 = vmov 0   ;;  %v744_v1 = vld [vmem:[#allocation4 + $0x8] ss:$12 sps:$4 sm:$0xff]   ;;  %v49_v5 = vld [vmem:[#allocation2] sm:$0xff] }
  0x27   :  { %265 = vmatprep.mubr.bf16.mxu0 %v830_v0  ;;  %v745_v2 = vld [vmem:[#allocation4 + $0x20] ss:$12 sps:$4 sm:$0xff]   ;;  %705 = vmatprep.subr.bf16.mxu1 %v744_v1  ;;  %v746_v3 = vld [vmem:[#allocation4 + $0x38] ss:$12 sps:$4 sm:$0xff]   ;;  %v747_v4 = vld [vmem:[#allocation4 + $0x50] ss:$12 sps:$4 sm:$0xff]  }
  0x28   :  { %706 = vmatpush3.bf16.msra.mxu1 %v744_v1  ;;  %v50_v6 = vld [vmem:[#allocation2 + $0x8] sm:$0xff]  ;;  %v752_v9 = vld [vmem:[#allocation4 + $0x4] ss:$12 sps:$4 sm:$0xff]   ;;  %v758_v14 = vld [vmem:[#allocation4 + $0x34] ss:$12 sps:$4 sm:$0xff]  }
  0x29   :  { %707 = vmatprep.subr.bf16.mxu1 %v745_v2  ;;  %v891_v7 = vpack.c.bf16 %v50_v6, %v49_v5  ;;  %v748_v8 = vld [vmem:[#allocation4 + $0x68] ss:$12 sps:$4 sm:$0xff]   ;;  %v754_v10 = vld [vmem:[#allocation4] ss:$12 sps:$4 sm:$0xff]   ;;  %233 = vmatprep.subr.bf16.mxu0 %v752_v9  ;;  %v757_v13 = vld [vmem:[#allocation4 + $0x18] ss:$12 sps:$4 sm:$0xff]  }
  0x2a   :  { %v755_v11 = vld [vmem:[#allocation4 + $0x1c] ss:$12 sps:$4 sm:$0xff]   ;;  %v749_v12 = vld [vmem:[#allocation4 + $0x80] ss:$12 sps:$4 sm:$0xff]   ;;  %234 = vmatpush1.bf16.msra.mxu0 %v754_v10  ;;  %v750_v15 = vld [vmem:[#allocation4 + $0x98] ss:$12 sps:$4 sm:$0xff]  }
  0x2b   :  { %721 = vmatprep.mubr.bf16.mxu1 %v891_v7  ;;  %235 = vmatprep.subr.bf16.mxu0 %v755_v11  ;;  %v760_v16 = vld [vmem:[#allocation4 + $0x30] ss:$12 sps:$4 sm:$0xff]   ;;  %v761_v17 = vld [vmem:[#allocation4 + $0x4c] ss:$12 sps:$4 sm:$0xff]   ;;  %v763_v19 = vld [vmem:[#allocation4 + $0x48] ss:$12 sps:$4 sm:$0xff]  }
  0x2c   :  { %708 = vmatpush3.bf16.msra.mxu1 %v745_v2  ;;  %v751_v18 = vld [vmem:[#allocation4 + $0xb0] ss:$12 sps:$4 sm:$0xff]   ;;  %v53_v23 = vld [vmem:[#allocation2 + $0x20] sm:$0xff]  ;;  %v54_v24 = vld [vmem:[#allocation2 + $0x28] sm:$0xff] }
  0x2d   :  { %709 = vmatprep.subr.bf16.mxu1 %v746_v3  ;;  %v764_v20 = vld [vmem:[#allocation4 + $0x64] ss:$12 sps:$4 sm:$0xff]   ;;  %v52_v22 = vld [vmem:[#allocation2 + $0x18] sm:$0xff]  ;;  %v766_v25 = vld [vmem:[#allocation4 + $0x60] ss:$12 sps:$4 sm:$0xff]   ;;  %v67_v28 = vpack.c.bf16 %v54_v24, %v53_v23 }
  0x2e   :  { %236 = vmatpush1.bf16.msra.mxu0 %v757_v13  ;;  %v51_v21 = vld [vmem:[#allocation2 + $0x10] sm:$0xff]  ;;  %v767_v27 = vld [vmem:[#allocation4 + $0x7c] ss:$12 sps:$4 sm:$0xff]   ;;  %v769_v29 = vld [vmem:[#allocation4 + $0x78] ss:$12 sps:$4 sm:$0xff]  }
  0x2f   :  { %237 = vmatprep.subr.bf16.mxu0 %v758_v14  ;;  %v66_v26 = vpack.c.bf16 %v52_v22, %v51_v21  ;;  %v770_v30 = vld [vmem:[#allocation4 + $0x94] ss:$12 sps:$4 sm:$0xff]   ;;  %v56_v32 = vld [vmem:[#allocation2 + $0x38] sm:$0xff]  ;;  %v58_v34 = vld [vmem:[#allocation2 + $0x48] sm:$0xff] }
  0x30   :  { %710 = vmatpush3.bf16.msra.mxu1 %v746_v3  ;;  %v55_v31 = vld [vmem:[#allocation2 + $0x30] sm:$0xff]  ;;  %v57_v33 = vld [vmem:[#allocation2 + $0x40] sm:$0xff]  ;;  %v773_v37 = vld [vmem:[#allocation4 + $0xac] ss:$12 sps:$4 sm:$0xff]  }
  0x31   :  { %711 = vmatprep.subr.bf16.mxu1 %v747_v4  ;;  %v772_v35 = vld [vmem:[#allocation4 + $0x90] ss:$12 sps:$4 sm:$0xff]   ;;  %v68_v36 = vpack.c.bf16 %v56_v32, %v55_v31  ;;  %v69_v38 = vpack.c.bf16 %v58_v34, %v57_v33  ;;  %v775_v39 = vld [vmem:[#allocation4 + $0xa8] ss:$12 sps:$4 sm:$0xff]   ;;  %v61_v42 = vld [vmem:[#allocation2 + $0x60] sm:$0xff] }
  0x32   :  { %238 = vmatpush1.bf16.msra.mxu0 %v760_v16  ;;  %v59_v40 = vld [vmem:[#allocation2 + $0x50] sm:$0xff]  ;;  %v60_v41 = vld [vmem:[#allocation2 + $0x58] sm:$0xff]  ;;  %v62_v43 = vld [vmem:[#allocation2 + $0x68] sm:$0xff] }
  0x33   :  { %239 = vmatprep.subr.bf16.mxu0 %v761_v17  ;;  %v70_v44 = vpack.c.bf16 %v60_v41, %v59_v40  ;;  %v71_v45 = vpack.c.bf16 %v62_v43, %v61_v42  ;;  %v63_v46 = vld [vmem:[#allocation2 + $0x70] sm:$0xff]  ;;  %v64_v47 = vld [vmem:[#allocation2 + $0x78] sm:$0xff] }
  0x34   :  { %712 = vmatpush3.bf16.msra.mxu1 %v747_v4  ;;  %v72_v48 = vpack.c.bf16 %v64_v47, %v63_v46 }
  0x35   :  { %713 = vmatprep.subr.bf16.mxu1 %v748_v8 }
  0x36   :  { %240 = vmatpush1.bf16.msra.mxu0 %v763_v19 }
  0x37   :  { %241 = vmatprep.subr.bf16.mxu0 %v764_v20 }
  0x38   :  { %714 = vmatpush3.bf16.msra.mxu1 %v748_v8 }
  0x39   :  { %715 = vmatprep.subr.bf16.mxu1 %v749_v12 }
  0x3a   :  { %242 = vmatpush1.bf16.msra.mxu0 %v766_v25 }
  0x3b   :  { %243 = vmatprep.subr.bf16.mxu0 %v767_v27 }
  0x3c   :  { %716 = vmatpush3.bf16.msra.mxu1 %v749_v12 }
  0x3d   :  { %717 = vmatprep.subr.bf16.mxu1 %v750_v15 }
  0x3e   :  { %244 = vmatpush1.bf16.msra.mxu0 %v769_v29 }
  0x3f   :  { %245 = vmatprep.subr.bf16.mxu0 %v770_v30 }
  0x40   :  { %718 = vmatpush3.bf16.msra.mxu1 %v750_v15 }
  0x41   :  { %719 = vmatprep.subr.bf16.mxu1 %v751_v18 }
  0x42   :  { %246 = vmatpush1.bf16.msra.mxu0 %v772_v35 }
  0x43   :  { %247 = vmatprep.subr.bf16.mxu0 %v773_v37 }
  0x44   :  { %720 = vmatpush3.bf16.msra.mxu1 %v751_v18 }
  0x46   :  { %248 = vmatpush1.bf16.msra.mxu0 %v775_v39 }
  0x47   :  { %722 = vmatmul.mubr.bf16.vlgmr.msra.gmra.mrb[0].mxu1 %v66_v26 }
  0x48   :  { %725 = vmatprep.mubr.bf16.mxu1 %v67_v28 }
  0x49   :  { %266 = vmatmul.mubr.bf16.vlgmr.msra.gmra.mrb[0].mxu0 %v891_v7 }
  0x4a   :  { %275 = vmatprep.mubr.bf16.mxu0 %v830_v0 }
  0x4f   :  { %726 = vmatmul.mubr.bf16.gmra.mrb[4].mxu1 %v68_v36 }
  0x50   :  { %729 = vmatprep.mubr.bf16.mxu1 %v69_v38 }
  0x51   :  { %276 = vmatmul.mubr.bf16.gmra.mrb[4].mxu0 %v66_v26 }
  0x52   :  { %285 = vmatprep.mubr.bf16.mxu0 %v830_v0 }
  0x57   :  { %730 = vmatmul.mubr.bf16.gmra.mrb[8].mxu1 %v70_v44 }
  0x58   :  { %733 = vmatprep.mubr.bf16.mxu1 %v71_v45 }
  0x59   :  { %286 = vmatmul.mubr.bf16.gmra.mrb[8].mxu0 %v67_v28 }
  0x5a   :  { %295 = vmatprep.mubr.bf16.mxu0 %v830_v0 }
  0x5f   :  { %734 = vmatmul.mubr.bf16.gmra.mrb[12].mxu1 %v72_v48 }
  0x61   :  { %296 = vmatmul.mubr.bf16.gmra.mrb[12].mxu0 %v68_v36 }
  0x62   :  { %305 = vmatprep.mubr.bf16.mxu0 %v830_v0 }
  0x69   :  { %306 = vmatmul.mubr.bf16.gmra.mrb[16].mxu0 %v69_v38 }
  0x6a   :  { %315 = vmatprep.mubr.bf16.mxu0 %v830_v0 }
  0x71   :  { %316 = vmatmul.mubr.bf16.gmra.mrb[20].mxu0 %v70_v44 }
  0x72   :  { %325 = vmatprep.mubr.bf16.mxu0 %v830_v0 }
  0x79   :  { %326 = vmatmul.mubr.bf16.gmra.mrb[24].mxu0 %v71_v45 }
  0x7a   :  { %335 = vmatprep.mubr.bf16.mxu0 %v830_v0 }
  0x81   :  { %336 = vmatmul.mubr.bf16.gmra.mrb[28].mxu0 %v72_v48 }
 0x11a   :  { %v723_v49 = vpop.f32.mrb[0].mxu1 }
 0x11b   :  { %557 = vst [vmem:[%s1051_s5 + $0x10] sm:$0xff] %v723_v49  ;;  %v380_v50 = vpop.f32.mrb[1].mxu1 }
 0x11c   :  { %555 = vst [vmem:[%s1051_s5] sm:$0xff] %v380_v50  ;;  %v724_v51 = vpop.f32.mrb[2].mxu1  ;;  %571 = vxpose.xlu0.b32.start [1/16] %v380_v50, 128  ;;  %v267_v57 = vpop.f32.mrb[0].mxu0 }
 0x11d   :  { %558 = vst [vmem:[%s1051_s5 + $0x18] sm:$0xff] %v724_v51  ;;  %v383_v52 = vpop.f32.mrb[3].mxu1  ;;  %v269_v58 = vpop.f32.mrb[1].mxu0 }
 0x11e   :  { %556 = vst [vmem:[%s1051_s5 + $0x8] sm:$0xff] %v383_v52  ;;  %v673_v60 = vpack.c.bf16 %v269_v58, %v267_v57  ;;  %v271_v61 = vpop.f32.mrb[2].mxu0 }
 0x11f   :  { %v273_v63 = vpop.f32.mrb[3].mxu0 }
 0x120   :  { %572 = vxpose.xlu0.b32.cont [2/16] %v383_v52, 128  ;;  %539 = vst [vmem:[%s1050_s4] sm:$0xff] %v673_v60  ;;  %v674_v1 = vpack.c.bf16 %v273_v63, %v271_v61 }
 0x122   :  { %v727_v53 = vpop.f32.mrb[4].mxu1  ;;  %540 = vst [vmem:[%s1050_s4 + $0x8] sm:$0xff] %v674_v1 }
 0x123   :  { %561 = vst [vmem:[%s1051_s5 + $0x30] sm:$0xff] %v727_v53  ;;  %v396_v54 = vpop.f32.mrb[5].mxu1 }
 0x124   :  { %573 = vxpose.xlu0.b32.cont [3/16] %v723_v49, 128  ;;  %559 = vst [vmem:[%s1051_s5 + $0x20] sm:$0xff] %v396_v54  ;;  %v728_v55 = vpop.f32.mrb[6].mxu1  ;;  %v277_v3 = vpop.f32.mrb[4].mxu0 }
 0x125   :  { %562 = vst [vmem:[%s1051_s5 + $0x38] sm:$0xff] %v728_v55  ;;  %v399_v56 = vpop.f32.mrb[7].mxu1  ;;  %v279_v4 = vpop.f32.mrb[5].mxu0 }
 0x126   :  { %560 = vst [vmem:[%s1051_s5 + $0x28] sm:$0xff] %v399_v56  ;;  %v675_v6 = vpack.c.bf16 %v279_v4, %v277_v3  ;;  %v281_v7 = vpop.f32.mrb[6].mxu0 }
 0x127   :  { %v283_v9 = vpop.f32.mrb[7].mxu0 }
 0x128   :  { %574 = vxpose.xlu0.b32.cont [4/16] %v724_v51, 128  ;;  %541 = vst [vmem:[%s1050_s4 + $0x10] sm:$0xff] %v675_v6  ;;  %v676_v11 = vpack.c.bf16 %v283_v9, %v281_v7 }
 0x12a   :  { %v731_v59 = vpop.f32.mrb[8].mxu1  ;;  %542 = vst [vmem:[%s1050_s4 + $0x18] sm:$0xff] %v676_v11 }
 0x12b   :  { %565 = vst [vmem:[%s1051_s5 + $0x50] sm:$0xff] %v731_v59  ;;  %v412_v62 = vpop.f32.mrb[9].mxu1 }
 0x12c   :  { %575 = vxpose.xlu0.b32.cont [5/16] %v396_v54, 128  ;;  %563 = vst [vmem:[%s1051_s5 + $0x40] sm:$0xff] %v412_v62  ;;  %v732_v0 = vpop.f32.mrb[10].mxu1  ;;  %v287_v13 = vpop.f32.mrb[8].mxu0 }
 0x12d   :  { %566 = vst [vmem:[%s1051_s5 + $0x58] sm:$0xff] %v732_v0  ;;  %v415_v2 = vpop.f32.mrb[11].mxu1  ;;  %v289_v14 = vpop.f32.mrb[9].mxu0 }
 0x12e   :  { %564 = vst [vmem:[%s1051_s5 + $0x48] sm:$0xff] %v415_v2  ;;  %v677_v15 = vpack.c.bf16 %v289_v14, %v287_v13  ;;  %v291_v16 = vpop.f32.mrb[10].mxu0 }
 0x12f   :  { %v293_v17 = vpop.f32.mrb[11].mxu0 }
 0x130   :  { %576 = vxpose.xlu0.b32.cont [6/16] %v399_v56, 128  ;;  %543 = vst [vmem:[%s1050_s4 + $0x20] sm:$0xff] %v677_v15  ;;  %v678_v18 = vpack.c.bf16 %v293_v17, %v291_v16 }
 0x132   :  { %v735_v5 = vpop.f32.mrb[12].mxu1  ;;  %544 = vst [vmem:[%s1050_s4 + $0x28] sm:$0xff] %v678_v18 }
 0x133   :  { %569 = vst [vmem:[%s1051_s5 + $0x70] sm:$0xff] %v735_v5  ;;  %v428_v8 = vpop.f32.mrb[13].mxu1 }
 0x134   :  { %577 = vxpose.xlu0.b32.cont [7/16] %v727_v53, 128  ;;  %567 = vst [vmem:[%s1051_s5 + $0x60] sm:$0xff] %v428_v8  ;;  %v736_v10 = vpop.f32.mrb[14].mxu1  ;;  %v297_v19 = vpop.f32.mrb[12].mxu0 }
 0x135   :  { %570 = vst [vmem:[%s1051_s5 + $0x78] sm:$0xff] %v736_v10  ;;  %v431_v12 = vpop.f32.mrb[15].mxu1  ;;  %v299_v20 = vpop.f32.mrb[13].mxu0 }
 0x136   :  { %568 = vst [vmem:[%s1051_s5 + $0x68] sm:$0xff] %v431_v12  ;;  %v679_v21 = vpack.c.bf16 %v299_v20, %v297_v19  ;;  %v301_v22 = vpop.f32.mrb[14].mxu0 }
 0x137   :  { %v303_v23 = vpop.f32.mrb[15].mxu0 }
 0x138   :  { %578 = vxpose.xlu0.b32.cont [8/16] %v728_v55, 128  ;;  %545 = vst [vmem:[%s1050_s4 + $0x30] sm:$0xff] %v679_v21  ;;  %v680_v24 = vpack.c.bf16 %v303_v23, %v301_v22 }
 0x13a   :  { %546 = vst [vmem:[%s1050_s4 + $0x38] sm:$0xff] %v680_v24 }
 0x13c   :  { %579 = vxpose.xlu0.b32.cont [9/16] %v412_v62, 128  ;;  %v307_v25 = vpop.f32.mrb[16].mxu0 }
 0x13d   :  { %v309_v26 = vpop.f32.mrb[17].mxu0 }
 0x13e   :  { %v681_v27 = vpack.c.bf16 %v309_v26, %v307_v25  ;;  %v311_v28 = vpop.f32.mrb[18].mxu0 }
 0x13f   :  { %v313_v29 = vpop.f32.mrb[19].mxu0 }
 0x140   :  { %580 = vxpose.xlu0.b32.cont [10/16] %v415_v2, 128  ;;  %547 = vst [vmem:[%s1050_s4 + $0x40] sm:$0xff] %v681_v27  ;;  %v682_v30 = vpack.c.bf16 %v313_v29, %v311_v28 }
 0x142   :  { %548 = vst [vmem:[%s1050_s4 + $0x48] sm:$0xff] %v682_v30 }
 0x144   :  { %581 = vxpose.xlu0.b32.cont [11/16] %v731_v59, 128  ;;  %v317_v31 = vpop.f32.mrb[20].mxu0 }
 0x145   :  { %v319_v32 = vpop.f32.mrb[21].mxu0 }
 0x146   :  { %v683_v33 = vpack.c.bf16 %v319_v32, %v317_v31  ;;  %v321_v34 = vpop.f32.mrb[22].mxu0 }
 0x147   :  { %v323_v35 = vpop.f32.mrb[23].mxu0 }
 0x148   :  { %582 = vxpose.xlu0.b32.cont [12/16] %v732_v0, 128  ;;  %549 = vst [vmem:[%s1050_s4 + $0x50] sm:$0xff] %v683_v33  ;;  %v684_v36 = vpack.c.bf16 %v323_v35, %v321_v34 }
 0x14a   :  { %550 = vst [vmem:[%s1050_s4 + $0x58] sm:$0xff] %v684_v36 }
 0x14c   :  { %583 = vxpose.xlu0.b32.cont [13/16] %v428_v8, 128  ;;  %v327_v37 = vpop.f32.mrb[24].mxu0 }
 0x14d   :  { %v329_v38 = vpop.f32.mrb[25].mxu0 }
 0x14e   :  { %v685_v39 = vpack.c.bf16 %v329_v38, %v327_v37  ;;  %v331_v40 = vpop.f32.mrb[26].mxu0 }
 0x14f   :  { %v333_v41 = vpop.f32.mrb[27].mxu0 }
 0x150   :  { %584 = vxpose.xlu0.b32.cont [14/16] %v431_v12, 128  ;;  %551 = vst [vmem:[%s1050_s4 + $0x60] sm:$0xff] %v685_v39  ;;  %v686_v42 = vpack.c.bf16 %v333_v41, %v331_v40 }
 0x152   :  { %552 = vst [vmem:[%s1050_s4 + $0x68] sm:$0xff] %v686_v42 }
 0x154   :  { %585 = vxpose.xlu0.b32.cont [15/16] %v735_v5, 128  ;;  %v337_v43 = vpop.f32.mrb[28].mxu0 }
 0x155   :  { %v339_v44 = vpop.f32.mrb[29].mxu0 }
 0x156   :  { %v687_v45 = vpack.c.bf16 %v339_v44, %v337_v43  ;;  %v341_v46 = vpop.f32.mrb[30].mxu0 }
 0x157   :  { %v343_v47 = vpop.f32.mrb[31].mxu0 }
 0x158   :  { %586 = vxpose.xlu0.b32.end [16/16] %v736_v10, 128  ;;  %553 = vst [vmem:[%s1050_s4 + $0x70] sm:$0xff] %v687_v45  ;;  %v688_v48 = vpack.c.bf16 %v343_v47, %v341_v46 }
 0x15a   :  { %554 = vst [vmem:[%s1050_s4 + $0x78] sm:$0xff] %v688_v48 }
 0x19c   :  { %v587_v49 = vpop.trf.xlu0 }
 0x19d   :  { %603 = vst [vmem:[%s1052_s6] sm:$0xff] %v587_v49 }
 0x1a0   :  { %v588_v50 = vpop.trf.xlu0 }
 0x1a1   :  { %604 = vst [vmem:[%s1052_s6 + $0x8] sm:$0xff] %v588_v50 }
 0x1a4   :  { %v589_v51 = vpop.trf.xlu0 }
 0x1a5   :  { %605 = vst [vmem:[%s1052_s6 + $0x10] sm:$0xff] %v589_v51 }
 0x1a8   :  { %v590_v52 = vpop.trf.xlu0 }
 0x1a9   :  { %606 = vst [vmem:[%s1052_s6 + $0x18] sm:$0xff] %v590_v52 }
 0x1ac   :  { %v591_v53 = vpop.trf.xlu0 }
 0x1ad   :  { %607 = vst [vmem:[%s1052_s6 + $0x20] sm:$0xff] %v591_v53 }
 0x1b0   :  { %v592_v54 = vpop.trf.xlu0 }
 0x1b1   :  { %608 = vst [vmem:[%s1052_s6 + $0x28] sm:$0xff] %v592_v54 }
 0x1b4   :  { %v593_v55 = vpop.trf.xlu0 }
 0x1b5   :  { %609 = vst [vmem:[%s1052_s6 + $0x30] sm:$0xff] %v593_v55 }
 0x1b8   :  { %v594_v56 = vpop.trf.xlu0 }
 0x1b9   :  { %610 = vst [vmem:[%s1052_s6 + $0x38] sm:$0xff] %v594_v56 }
 0x1bc   :  { %v595_v57 = vpop.trf.xlu0 }
 0x1bd   :  { %611 = vst [vmem:[%s1052_s6 + $0x40] sm:$0xff] %v595_v57 }
 0x1c0   :  { %v596_v58 = vpop.trf.xlu0 }
 0x1c1   :  { %612 = vst [vmem:[%s1052_s6 + $0x48] sm:$0xff] %v596_v58 }
 0x1c4   :  { %v597_v59 = vpop.trf.xlu0 }
 0x1c5   :  { %613 = vst [vmem:[%s1052_s6 + $0x50] sm:$0xff] %v597_v59 }
 0x1c8   :  { %v598_v60 = vpop.trf.xlu0 }
 0x1c9   :  { %614 = vst [vmem:[%s1052_s6 + $0x58] sm:$0xff] %v598_v60 }
 0x1cc   :  { %v599_v61 = vpop.trf.xlu0 }
 0x1cd   :  { %615 = vst [vmem:[%s1052_s6 + $0x60] sm:$0xff] %v599_v61 }
 0x1d0   :  { %v600_v62 = vpop.trf.xlu0 }
 0x1d1   :  { %616 = vst [vmem:[%s1052_s6 + $0x68] sm:$0xff] %v600_v62 }
 0x1d4   :  { %v601_v63 = vpop.trf.xlu0 }
 0x1d5   :  { %617 = vst [vmem:[%s1052_s6 + $0x70] sm:$0xff] %v601_v63 }
 0x1d8   :  { %v602_v0 = vpop.trf.xlu0 }
 0x1d9   :  { %618 = vst [vmem:[%s1052_s6 + $0x78] sm:$0xff] %v602_v0 }
 0x1da   :  { %631 = vsyncpa [#allocation3], 1 }
 0x1db   :  { %632 = vsyncpa [#allocation5], 1 }

// kernel: gat_forward.7
= control target key start
LH: loop header
LB: loop body
LE: loop exit
PB: predicated region body
PF: predicated region fallthrough
CT: control target
= control target key end

     0   :  { %v55_v9 = vlaneseq  ;;  %s1652_s3 = inlined_call_operand.vmem [shape: bf16[256,384], index: 3, kind: input, shape index: {}]   ;;  %s1653_s1 = inlined_call_operand.vmem [shape: f32[1,256], index: 1, kind: input, shape index: {}]   ;;  %s1654_s2 = inlined_call_operand.vmem [shape: f32[1,256], index: 2, kind: input, shape index: {}]   ;;  %s1655_s0 = inlined_call_operand.vmem [shape: f32[128,256], index: 0, kind: input, shape index: {}]   ;;  %s1656_s5 = inlined_call_operand.vmem [shape: f32[128,128], index: 5, kind: output, shape index: {1}]   ;;  %s1657_s4 = inlined_call_operand.vmem [shape: bf16[128,256], index: 4, kind: output, shape index: {0}]   ;;  %s1658_s6 = inlined_call_operand.vmem [shape: f32[128,128], index: 6, kind: output, shape index: {2}]  }
   0x1   :  { %v1051_v0 = vld [vmem:[%s1652_s3 + $0xc8] ss:$12 sps:$4 sm:$0xff]   ;;  %v1053_v2 = vld [vmem:[%s1652_s3 + $0xe0] ss:$12 sps:$4 sm:$0xff]   ;;  %v1055_v4 = vld [vmem:[%s1652_s3 + $0xf8] ss:$12 sps:$4 sm:$0xff]  }
   0x2   :  { %v1052_v1 = vld [vmem:[%s1652_s3 + $0x8] ss:$12 sps:$4 sm:$0xff]   ;;  %987 = vmatprep.subr.bf16.mxu1 %v1051_v0  ;;  %v1054_v3 = vld [vmem:[%s1652_s3 + $0x20] ss:$12 sps:$4 sm:$0xff]   ;;  %v1056_v5 = vld [vmem:[%s1652_s3 + $0x38] ss:$12 sps:$4 sm:$0xff]  }
   0x3   :  { %988 = vmatpush3.bf16.msra.mxu1 %v1052_v1  ;;  %v1057_v6 = vld [vmem:[%s1652_s3 + $0x110] ss:$12 sps:$4 sm:$0xff]   ;;  %v1059_v8 = vld [vmem:[%s1652_s3 + $0x128] ss:$12 sps:$4 sm:$0xff]   ;;  %v1061_v11 = vld [vmem:[%s1652_s3 + $0x140] ss:$12 sps:$4 sm:$0xff]  }
   0x4   :  { %989 = vmatprep.subr.bf16.mxu1 %v1053_v2  ;;  %v1058_v7 = vld [vmem:[%s1652_s3 + $0x50] ss:$12 sps:$4 sm:$0xff]   ;;  %v1060_v10 = vld [vmem:[%s1652_s3 + $0x68] ss:$12 sps:$4 sm:$0xff]   ;;  %v56_v12 = vshrl.u32 %v55_v9, 7  ;;  %v21_v20 = vld [vmem:[%s1655_s0] sm:$0xff] }
   0x5   :  { %v53_v13 = vld [vmem:[%s1653_s1] sm:$0x3]  ;;  %v22_v16 = vld [vmem:[%s1655_s0 + $0x8] sm:$0xff]  ;;  %v24_v19 = vld [vmem:[%s1655_s0 + $0x18] sm:$0xff] }
   0x6   :  { %v97_v14 = vld [vmem:[%s1654_s2] sm:$0x3]  ;;  %v57_v17 = vsub.s32 0, %v56_v12  ;;  %v61_v18 = vsub.s32 1, %v56_v12  ;;  %v23_v21 = vld [vmem:[%s1655_s0 + $0x10] sm:$0xff]  ;;  %v26_v27 = vld [vmem:[%s1655_s0 + $0x28] sm:$0xff] }
   0x7   :  { %990 = vmatpush3.bf16.msra.mxu1 %v1054_v3  ;;  %v1062_v15 = vld [vmem:[%s1652_s3 + $0x80] ss:$12 sps:$4 sm:$0xff]   ;;  %v1063_v22 = vld [vmem:[%s1652_s3 + $0x158] ss:$12 sps:$4 sm:$0xff]   ;;  %v27_v34 = vld [vmem:[%s1655_s0 + $0x30] sm:$0xff] }
   0x8   :  { %991 = vmatprep.subr.bf16.mxu1 %v1055_v4  ;;  %v1207_v23 = vrot.slane %v53_v13, %v57_v17  ;;  %v1209_v24 = vrot.slane %v53_v13, %v61_v18  ;;  %v1211_v25 = vrot.slane %v97_v14, %v57_v17  ;;  %v1213_v26 = vrot.slane %v97_v14, %v61_v18  ;;  %v28_v28 = vld [vmem:[%s1655_s0 + $0x38] sm:$0xff]  ;;  %v25_v33 = vld [vmem:[%s1655_s0 + $0x20] sm:$0xff]  ;;  %v30_v47 = vld [vmem:[%s1655_s0 + $0x48] sm:$0xff] }
   0x9   :  { %v1064_v35 = vld [vmem:[%s1652_s3 + $0x98] ss:$12 sps:$4 sm:$0xff]   ;;  %v1065_v38 = vld [vmem:[%s1652_s3 + $0x170] ss:$12 sps:$4 sm:$0xff]   ;;  %v1069_v60 = vld [vmem:[%s1652_s3] ss:$12 sps:$4 sm:$0xff]  }
   0xa   :  { %v66_v29 = vmul.f32 %v1209_v24, %v22_v16  ;;  %v68_v30 = vmul.f32 %v1209_v24, %v24_v19  ;;  %v65_v31 = vmul.f32 %v1207_v23, %v21_v20  ;;  %v67_v32 = vmul.f32 %v1207_v23, %v23_v21  ;;  %v32_v48 = vld [vmem:[%s1655_s0 + $0x58] sm:$0xff]  ;;  %v1067_v59 = vld [vmem:[%s1652_s3 + $0x4] ss:$12 sps:$4 sm:$0xff]   ;;  %v1073_v13 = vld [vmem:[%s1652_s3 + $0x34] ss:$12 sps:$4 sm:$0xff]  }
   0xb   :  { %992 = vmatpush3.bf16.msra.mxu1 %v1056_v5  ;;  %v70_v36 = vmul.f32 %v1209_v24, %v26_v27  ;;  %v72_v37 = vmul.f32 %v1209_v24, %v28_v28  ;;  %v69_v45 = vmul.f32 %v1207_v23, %v25_v33  ;;  %v71_v46 = vmul.f32 %v1207_v23, %v27_v34  ;;  %v1066_v53 = vld [vmem:[%s1652_s3 + $0xb0] ss:$12 sps:$4 sm:$0xff]   ;;  %v29_v0 = vld [vmem:[%s1655_s0 + $0x40] sm:$0xff]  ;;  %v1076_v28 = vld [vmem:[%s1652_s3 + $0x4c] ss:$12 sps:$4 sm:$0xff]  }
   0xc   :  { %993 = vmatprep.subr.bf16.mxu1 %v1057_v6  ;;  %v110_v39 = vadd.f32 %v1213_v26, %v66_v29  ;;  %v112_v40 = vadd.f32 %v1213_v26, %v68_v30  ;;  %v109_v41 = vadd.f32 %v1211_v25, %v65_v31  ;;  %v111_v42 = vadd.f32 %v1211_v25, %v67_v32  ;;  %v1070_v1 = vld [vmem:[%s1652_s3 + $0x1c] ss:$12 sps:$4 sm:$0xff]   ;;  %v31_v5 = vld [vmem:[%s1655_s0 + $0x50] sm:$0xff]  ;;  %v33_v18 = vld [vmem:[%s1655_s0 + $0x60] sm:$0xff] }
   0xd   :  { %v114_v43 = vadd.f32 %v1213_v26, %v70_v36  ;;  %v116_v44 = vadd.f32 %v1213_v26, %v72_v37  ;;  %v74_v57 = vmul.f32 %v1209_v24, %v30_v47  ;;  %v76_v58 = vmul.f32 %v1209_v24, %v32_v48  ;;  %v34_v6 = vld [vmem:[%s1655_s0 + $0x68] sm:$0xff]  ;;  %509 = vmatprep.subr.bf16.mxu0 %v1067_v59  ;;  %v1075_v19 = vld [vmem:[%s1652_s3 + $0x30] ss:$12 sps:$4 sm:$0xff]  }
   0xe   :  { %v142_v49 = vmax.f32 %v110_v39, 0.0  ;;  %v144_v50 = vmax.f32 %v112_v40, 0.0  ;;  %v141_v51 = vmax.f32 %v109_v41, 0.0  ;;  %v143_v52 = vmax.f32 %v111_v42, 0.0  ;;  %510 = vmatpush1.bf16.msra.mxu0 %v1069_v60  ;;  %v35_v27 = vld [vmem:[%s1655_s0 + $0x70] sm:$0xff]  ;;  %v38_v32 = vld [vmem:[%s1655_s0 + $0x88] sm:$0xff] }
   0xf   :  { %994 = vmatpush3.bf16.msra.mxu1 %v1058_v7  ;;  %v146_v54 = vmax.f32 %v114_v43, 0.0  ;;  %v148_v55 = vmax.f32 %v116_v44, 0.0  ;;  %v113_v62 = vadd.f32 %v1211_v25, %v69_v45  ;;  %v115_v63 = vadd.f32 %v1211_v25, %v71_v46  ;;  %v36_v7 = vld [vmem:[%s1655_s0 + $0x78] sm:$0xff]  ;;  %511 = vmatprep.subr.bf16.mxu0 %v1070_v1  ;;  %v1078_v34 = vld [vmem:[%s1652_s3 + $0x48] ss:$12 sps:$4 sm:$0xff]   ;;  %v37_v44 = vld [vmem:[%s1655_s0 + $0x80] sm:$0xff] }
  0x10   :  { %995 = vmatprep.subr.bf16.mxu1 %v1059_v8  ;;  %v174_v56 = vpack.c.bf16 %v144_v50, %v142_v49  ;;  %v1264_v61 = vpack.c.bf16 %v143_v52, %v141_v51  ;;  %v118_v3 = vadd.f32 %v1213_v26, %v74_v57  ;;  %v120_v4 = vadd.f32 %v1213_v26, %v76_v58  ;;  %v1072_v8 = vld [vmem:[%s1652_s3 + $0x18] ss:$12 sps:$4 sm:$0xff]   ;;  %v1081_v45 = vld [vmem:[%s1652_s3 + $0x60] ss:$12 sps:$4 sm:$0xff]   ;;  %v1082_v49 = vld [vmem:[%s1652_s3 + $0x7c] ss:$12 sps:$4 sm:$0xff]  }
  0x11   :  { %v1274_v2 = vpack.c.bf16 %v148_v55, %v146_v54  ;;  %v145_v9 = vmax.f32 %v113_v62, 0.0  ;;  %v75_v12 = vmul.f32 %v1207_v23, %v31_v5  ;;  %v78_v16 = vmul.f32 %v1209_v24, %v34_v6  ;;  %v40_v33 = vld [vmem:[%s1655_s0 + $0x98] sm:$0xff]  ;;  %v1079_v39 = vld [vmem:[%s1652_s3 + $0x64] ss:$12 sps:$4 sm:$0xff]   ;;  %v42_v54 = vld [vmem:[%s1655_s0 + $0xa8] sm:$0xff] }
  0x12   :  { %654 = vmatprep.mubr.bf16.mxu1 %v174_v56  ;;  %541 = vmatprep.mubr.bf16.mxu0 %v174_v56  ;;  %v150_v14 = vmax.f32 %v118_v3, 0.0  ;;  %v80_v17 = vmul.f32 %v1209_v24, %v36_v7  ;;  %v77_v37 = vmul.f32 %v1207_v23, %v33_v18  ;;  %v82_v42 = vmul.f32 %v1209_v24, %v38_v32  ;;  %v44_v55 = vld [vmem:[%s1655_s0 + $0xb8] sm:$0xff]  ;;  %v1085_v62 = vld [vmem:[%s1652_s3 + $0x94] ss:$12 sps:$4 sm:$0xff]  }
  0x13   :  { %996 = vmatpush3.bf16.msra.mxu1 %v1060_v10  ;;  %v147_v10 = vmax.f32 %v115_v63, 0.0  ;;  %512 = vmatpush1.bf16.msra.mxu0 %v1072_v8  ;;  %v122_v30 = vadd.f32 %v1213_v26, %v78_v16  ;;  %v84_v43 = vmul.f32 %v1209_v24, %v40_v33  ;;  %v1084_v56 = vld [vmem:[%s1652_s3 + $0x78] ss:$12 sps:$4 sm:$0xff]   ;;  %v81_v59 = vmul.f32 %v1207_v23, %v37_v44  ;;  %v1090_v16 = vld [vmem:[%s1652_s3 + $0xa8] ss:$12 sps:$4 sm:$0xff]  }
  0x14   :  { %997 = vmatprep.subr.bf16.mxu1 %v1061_v11  ;;  %v73_v11 = vmul.f32 %v1207_v23, %v29_v0  ;;  %513 = vmatprep.subr.bf16.mxu0 %v1073_v13  ;;  %v124_v31 = vadd.f32 %v1213_v26, %v80_v17  ;;  %v121_v47 = vadd.f32 %v1211_v25, %v77_v37  ;;  %v1088_v8 = vld [vmem:[%s1652_s3 + $0xac] ss:$12 sps:$4 sm:$0xff]   ;;  %v43_v13 = vld [vmem:[%s1655_s0 + $0xb0] sm:$0xff] }
  0x15   :  { %v1305_v20 = vpack.c.bf16 %v147_v10, %v145_v9  ;;  %v154_v40 = vmax.f32 %v122_v30, 0.0  ;;  %v126_v51 = vadd.f32 %v1213_v26, %v82_v42  ;;  %v128_v52 = vadd.f32 %v1213_v26, %v84_v43  ;;  %v1093_v32 = vld [vmem:[%s1652_s3 + $0xc0] ss:$12 sps:$4 sm:$0xff]   ;;  %v52_v43 = vld [vmem:[%s1655_s0 + $0xf8] sm:$0xff] }
  0x16   :  { %v117_v21 = vadd.f32 %v1211_v25, %v73_v11  ;;  %v156_v41 = vmax.f32 %v124_v31, 0.0  ;;  %v153_v57 = vmax.f32 %v121_v47, 0.0  ;;  %v86_v1 = vmul.f32 %v1209_v24, %v42_v54  ;;  %v50_v42 = vld [vmem:[%s1655_s0 + $0xe8] sm:$0xff]  ;;  %v1096_v44 = vld [vmem:[%s1652_s3 + $0xd8] ss:$12 sps:$4 sm:$0xff]  }
  0x17   :  { %998 = vmatpush3.bf16.msra.mxu1 %v1062_v15  ;;  %v152_v15 = vmax.f32 %v120_v4, 0.0  ;;  %514 = vmatpush1.bf16.msra.mxu0 %v1075_v19  ;;  %v158_v63 = vmax.f32 %v126_v51, 0.0  ;;  %v160_v0 = vmax.f32 %v128_v52, 0.0  ;;  %v88_v3 = vmul.f32 %v1209_v24, %v44_v55  ;;  %v1087_v4 = vld [vmem:[%s1652_s3 + $0x90] ss:$12 sps:$4 sm:$0xff]  }
  0x18   :  { %999 = vmatprep.subr.bf16.mxu1 %v1063_v22  ;;  %v119_v22 = vadd.f32 %v1211_v25, %v75_v12  ;;  %515 = vmatprep.subr.bf16.mxu0 %v1076_v28  ;;  %v1350_v50 = vpack.c.bf16 %v156_v41, %v154_v40  ;;  %v125_v6 = vadd.f32 %v1211_v25, %v81_v59  ;;  %v41_v12 = vld [vmem:[%s1655_s0 + $0xa0] sm:$0xff]  ;;  %v47_v41 = vld [vmem:[%s1655_s0 + $0xd0] sm:$0xff] }
  0x19   :  { %v1315_v29 = vpack.c.bf16 %v152_v15, %v150_v14  ;;  %v1385_v9 = vpack.c.bf16 %v160_v0, %v158_v63  ;;  %v130_v10 = vadd.f32 %v1213_v26, %v86_v1  ;;  %v132_v11 = vadd.f32 %v1213_v26, %v88_v3  ;;  %v46_v14 = vld [vmem:[%s1655_s0 + $0xc8] sm:$0xff]  ;;  %v48_v15 = vld [vmem:[%s1655_s0 + $0xd8] sm:$0xff]  ;;  %v45_v40 = vld [vmem:[%s1655_s0 + $0xc0] sm:$0xff] }
  0x1a   :  { %v151_v36 = vmax.f32 %v119_v22, 0.0  ;;  %v157_v17 = vmax.f32 %v125_v6, 0.0  ;;  %v85_v19 = vmul.f32 %v1207_v23, %v41_v12  ;;  %v1091_v22 = vld [vmem:[%s1652_s3 + $0xc4] ss:$12 sps:$4 sm:$0xff]   ;;  %v90_v30 = vmul.f32 %v1209_v24, %v46_v14  ;;  %v1097_v51 = vld [vmem:[%s1652_s3 + $0xf4] ss:$12 sps:$4 sm:$0xff]  }
  0x1b   :  { %1000 = vmatpush3.bf16.msra.mxu1 %v1064_v35  ;;  %v149_v35 = vmax.f32 %v117_v21, 0.0  ;;  %516 = vmatpush1.bf16.msra.mxu0 %v1078_v34  ;;  %v87_v21 = vmul.f32 %v1207_v23, %v43_v13  ;;  %v164_v28 = vmax.f32 %v132_v11, 0.0  ;;  %v92_v31 = vmul.f32 %v1209_v24, %v48_v15  ;;  %v49_v0 = vld [vmem:[%s1655_s0 + $0xe0] sm:$0xff]  ;;  %v51_v1 = vld [vmem:[%s1655_s0 + $0xf0] sm:$0xff] }
  0x1c   :  { %1001 = vmatprep.subr.bf16.mxu1 %v1065_v38  ;;  %v79_v38 = vmul.f32 %v1207_v23, %v35_v27  ;;  %517 = vmatprep.subr.bf16.mxu0 %v1079_v39  ;;  %v162_v27 = vmax.f32 %v130_v10, 0.0  ;;  %v129_v34 = vadd.f32 %v1211_v25, %v85_v19  ;;  %v94_v54 = vmul.f32 %v1209_v24, %v50_v42  ;;  %v1102_v3 = vld [vmem:[%s1652_s3 + $0x108] ss:$12 sps:$4 sm:$0xff]   ;;  %v1105_v12 = vld [vmem:[%s1652_s3 + $0x120] ss:$12 sps:$4 sm:$0xff]  }
  0x1d   :  { %v1343_v46 = vpack.c.bf16 %v151_v36, %v149_v35  ;;  %v131_v35 = vadd.f32 %v1211_v25, %v87_v21  ;;  %v1094_v36 = vld [vmem:[%s1652_s3 + $0xdc] ss:$12 sps:$4 sm:$0xff]   ;;  %v136_v39 = vadd.f32 %v1213_v26, %v92_v31  ;;  %v96_v55 = vmul.f32 %v1209_v24, %v52_v43  ;;  %v1109_v21 = vld [vmem:[%s1652_s3 + $0x154] ss:$12 sps:$4 sm:$0xff]  }
  0x1e   :  { %v123_v48 = vadd.f32 %v1211_v25, %v79_v38  ;;  %v1423_v37 = vpack.c.bf16 %v164_v28, %v162_v27  ;;  %v134_v38 = vadd.f32 %v1213_v26, %v90_v30  ;;  %v138_v63 = vadd.f32 %v1213_v26, %v94_v54  ;;  %v1112_v27 = vld [vmem:[%s1652_s3 + $0x16c] ss:$12 sps:$4 sm:$0xff]   ;;  %v1114_v28 = vld [vmem:[%s1652_s3 + $0x168] ss:$12 sps:$4 sm:$0xff]  }
  0x1f   :  { %1002 = vmatpush3.bf16.msra.mxu1 %v1066_v53  ;;  %v39_v53 = vld [vmem:[%s1655_s0 + $0x90] sm:$0xff]  ;;  %518 = vmatpush1.bf16.msra.mxu0 %v1081_v45  ;;  %v161_v45 = vmax.f32 %v129_v34, 0.0  ;;  %v163_v47 = vmax.f32 %v131_v35, 0.0  ;;  %v140_v24 = vadd.f32 %v1213_v26, %v96_v55  ;;  %v95_v26 = vmul.f32 %v1207_v23, %v51_v1 }
  0x20   :  { %v155_v58 = vmax.f32 %v123_v48, 0.0  ;;  %v83_v60 = vmul.f32 %v1207_v23, %v39_v53  ;;  %519 = vmatprep.subr.bf16.mxu0 %v1082_v49  ;;  %v89_v48 = vmul.f32 %v1207_v23, %v45_v40  ;;  %v91_v49 = vmul.f32 %v1207_v23, %v47_v41 }
  0x21   :  { %v166_v52 = vmax.f32 %v134_v38, 0.0  ;;  %v168_v53 = vmax.f32 %v136_v39, 0.0  ;;  %v170_v10 = vmax.f32 %v138_v63, 0.0  ;;  %v172_v11 = vmax.f32 %v140_v24, 0.0 }
  0x22   :  { %655 = vmatmul.mubr.bf16.vlgmr.msra.gmra.mrb[0].mxu1 %v1264_v61  ;;  %v1378_v5 = vpack.c.bf16 %v155_v58, %v153_v57  ;;  %v127_v7 = vadd.f32 %v1211_v25, %v83_v60  ;;  %v183_v57 = vpack.c.bf16 %v163_v47, %v161_v45  ;;  %v133_v58 = vadd.f32 %v1211_v25, %v89_v48  ;;  %v1100_v60 = vld [vmem:[%s1652_s3 + $0x10c] ss:$12 sps:$4 sm:$0xff]  }
  0x23   :  { %662 = vmatprep.mubr.bf16.mxu1 %v1274_v2  ;;  %520 = vmatpush1.bf16.msra.mxu0 %v1084_v56  ;;  %v1099_v56 = vld [vmem:[%s1652_s3 + $0xf0] ss:$12 sps:$4 sm:$0xff]   ;;  %v135_v59 = vadd.f32 %v1211_v25, %v91_v49  ;;  %v139_v15 = vadd.f32 %v1211_v25, %v95_v26 }
  0x24   :  { %521 = vmatprep.subr.bf16.mxu0 %v1085_v62  ;;  %v159_v18 = vmax.f32 %v127_v7, 0.0  ;;  %v186_v62 = vpack.c.bf16 %v168_v53, %v166_v52  ;;  %v93_v7 = vmul.f32 %v1207_v23, %v49_v0  ;;  %v1106_v23 = vld [vmem:[%s1652_s3 + $0x13c] ss:$12 sps:$4 sm:$0xff]  }
  0x25   :  { %v167_v6 = vmax.f32 %v135_v59, 0.0  ;;  %v171_v19 = vmax.f32 %v139_v15, 0.0 }
  0x26   :  { %v1416_v33 = vpack.c.bf16 %v159_v18, %v157_v17  ;;  %v137_v14 = vadd.f32 %v1211_v25, %v93_v7  ;;  %v1108_v17 = vld [vmem:[%s1652_s3 + $0x138] ss:$12 sps:$4 sm:$0xff]   ;;  %v1111_v25 = vld [vmem:[%s1652_s3 + $0x150] ss:$12 sps:$4 sm:$0xff]  }
  0x27   :  { %522 = vmatpush1.bf16.msra.mxu0 %v1087_v4  ;;  %v165_v4 = vmax.f32 %v133_v58, 0.0 }
  0x28   :  { %523 = vmatprep.subr.bf16.mxu0 %v1088_v8  ;;  %v1103_v8 = vld [vmem:[%s1652_s3 + $0x124] ss:$12 sps:$4 sm:$0xff]   ;;  %v169_v18 = vmax.f32 %v137_v14, 0.0 }
  0x29   :  { %v185_v13 = vpack.c.bf16 %v167_v6, %v165_v4 }
  0x2a   :  { %663 = vmatmul.mubr.bf16.gmra.mrb[4].mxu1 %v1305_v20 }
  0x2b   :  { %670 = vmatprep.mubr.bf16.mxu1 %v1315_v29  ;;  %524 = vmatpush1.bf16.msra.mxu0 %v1090_v16  ;;  %v188_v16 = vpack.c.bf16 %v172_v11, %v170_v10 }
  0x2c   :  { %525 = vmatprep.subr.bf16.mxu0 %v1091_v22  ;;  %v187_v22 = vpack.c.bf16 %v171_v19, %v169_v18 }
  0x2f   :  { %526 = vmatpush1.bf16.msra.mxu0 %v1093_v32 }
  0x30   :  { %527 = vmatprep.subr.bf16.mxu0 %v1094_v36 }
  0x32   :  { %671 = vmatmul.mubr.bf16.gmra.mrb[8].mxu1 %v1343_v46 }
  0x33   :  { %678 = vmatprep.mubr.bf16.mxu1 %v1350_v50  ;;  %528 = vmatpush1.bf16.msra.mxu0 %v1096_v44 }
  0x34   :  { %529 = vmatprep.subr.bf16.mxu0 %v1097_v51 }
  0x37   :  { %530 = vmatpush1.bf16.msra.mxu0 %v1099_v56 }
  0x38   :  { %531 = vmatprep.subr.bf16.mxu0 %v1100_v60 }
  0x3a   :  { %679 = vmatmul.mubr.bf16.gmra.mrb[12].mxu1 %v1378_v5 }
  0x3b   :  { %686 = vmatprep.mubr.bf16.mxu1 %v1385_v9  ;;  %532 = vmatpush1.bf16.msra.mxu0 %v1102_v3 }
  0x3c   :  { %533 = vmatprep.subr.bf16.mxu0 %v1103_v8 }
  0x3f   :  { %534 = vmatpush1.bf16.msra.mxu0 %v1105_v12 }
  0x40   :  { %535 = vmatprep.subr.bf16.mxu0 %v1106_v23 }
  0x42   :  { %687 = vmatmul.mubr.bf16.gmra.mrb[16].mxu1 %v1416_v33 }
  0x43   :  { %694 = vmatprep.mubr.bf16.mxu1 %v1423_v37  ;;  %536 = vmatpush1.bf16.msra.mxu0 %v1108_v17 }
  0x44   :  { %537 = vmatprep.subr.bf16.mxu0 %v1109_v21 }
  0x47   :  { %538 = vmatpush1.bf16.msra.mxu0 %v1111_v25 }
  0x48   :  { %539 = vmatprep.subr.bf16.mxu0 %v1112_v27 }
  0x4a   :  { %695 = vmatmul.mubr.bf16.gmra.mrb[20].mxu1 %v183_v57 }
  0x4b   :  { %702 = vmatprep.mubr.bf16.mxu1 %v186_v62  ;;  %540 = vmatpush1.bf16.msra.mxu0 %v1114_v28 }
  0x4e   :  { %542 = vmatmul.mubr.bf16.vlgmr.msra.gmra.mrb[0].mxu0 %v1264_v61 }
  0x4f   :  { %551 = vmatprep.mubr.bf16.mxu0 %v1274_v2 }
  0x52   :  { %703 = vmatmul.mubr.bf16.gmra.mrb[24].mxu1 %v185_v13 }
  0x53   :  { %710 = vmatprep.mubr.bf16.mxu1 %v188_v16 }
  0x56   :  { %552 = vmatmul.mubr.bf16.gmra.mrb[4].mxu0 %v1305_v20 }
  0x57   :  { %561 = vmatprep.mubr.bf16.mxu0 %v1315_v29 }
  0x5a   :  { %711 = vmatmul.mubr.bf16.gmra.mrb[28].mxu1 %v187_v22 }
  0x5e   :  { %562 = vmatmul.mubr.bf16.gmra.mrb[8].mxu0 %v1343_v46 }
  0x5f   :  { %571 = vmatprep.mubr.bf16.mxu0 %v1350_v50 }
  0x66   :  { %572 = vmatmul.mubr.bf16.gmra.mrb[12].mxu0 %v1378_v5 }
  0x67   :  { %581 = vmatprep.mubr.bf16.mxu0 %v1385_v9 }
  0x6e   :  { %582 = vmatmul.mubr.bf16.gmra.mrb[16].mxu0 %v1416_v33 }
  0x6f   :  { %591 = vmatprep.mubr.bf16.mxu0 %v1423_v37 }
  0x76   :  { %592 = vmatmul.mubr.bf16.gmra.mrb[20].mxu0 %v183_v57 }
  0x77   :  { %601 = vmatprep.mubr.bf16.mxu0 %v186_v62 }
  0x7e   :  { %602 = vmatmul.mubr.bf16.gmra.mrb[24].mxu0 %v185_v13 }
  0x7f   :  { %611 = vmatprep.mubr.bf16.mxu0 %v188_v16 }
  0x86   :  { %612 = vmatmul.mubr.bf16.gmra.mrb[28].mxu0 %v187_v22 }
  0xf5   :  { %v1003_v61 = vpop.f32.mrb[0].mxu1 }
  0xf6   :  { %v1004_v2 = vpop.f32.mrb[1].mxu1 }
  0xf7   :  { %v1005_v20 = vadd.f32 %v1004_v2, %v1003_v61  ;;  %v1006_v29 = vpop.f32.mrb[2].mxu1 }
  0xf8   :  { %v1007_v46 = vpop.f32.mrb[3].mxu1 }
  0xf9   :  { %831 = vst [vmem:[%s1656_s5] sm:$0xff] %v1005_v20  ;;  %v1008_v50 = vadd.f32 %v1007_v46, %v1006_v29  ;;  %847 = vxpose.xlu0.b32.start [1/16] %v1005_v20, 128 }
  0xfb   :  { %832 = vst [vmem:[%s1656_s5 + $0x8] sm:$0xff] %v1008_v50 }
  0xfd   :  { %v1009_v5 = vpop.f32.mrb[4].mxu1  ;;  %848 = vxpose.xlu0.b32.cont [2/16] %v1008_v50, 128 }
  0xfe   :  { %v1010_v9 = vpop.f32.mrb[5].mxu1 }
  0xff   :  { %v1011_v30 = vadd.f32 %v1010_v9, %v1009_v5  ;;  %v1012_v31 = vpop.f32.mrb[6].mxu1 }
 0x100   :  { %v1013_v32 = vpop.f32.mrb[7].mxu1 }
 0x101   :  { %833 = vst [vmem:[%s1656_s5 + $0x10] sm:$0xff] %v1011_v30  ;;  %v1014_v33 = vadd.f32 %v1013_v32, %v1012_v31  ;;  %849 = vxpose.xlu0.b32.cont [3/16] %v1011_v30, 128 }
 0x103   :  { %834 = vst [vmem:[%s1656_s5 + $0x18] sm:$0xff] %v1014_v33 }
 0x105   :  { %v1015_v34 = vpop.f32.mrb[8].mxu1  ;;  %850 = vxpose.xlu0.b32.cont [4/16] %v1014_v33, 128 }
 0x106   :  { %v1016_v35 = vpop.f32.mrb[9].mxu1 }
 0x107   :  { %v1017_v36 = vadd.f32 %v1016_v35, %v1015_v34  ;;  %v1018_v37 = vpop.f32.mrb[10].mxu1 }
 0x108   :  { %v1019_v38 = vpop.f32.mrb[11].mxu1 }
 0x109   :  { %835 = vst [vmem:[%s1656_s5 + $0x20] sm:$0xff] %v1017_v36  ;;  %v1020_v39 = vadd.f32 %v1019_v38, %v1018_v37  ;;  %851 = vxpose.xlu0.b32.cont [5/16] %v1017_v36, 128 }
 0x10b   :  { %836 = vst [vmem:[%s1656_s5 + $0x28] sm:$0xff] %v1020_v39 }
 0x10d   :  { %v1021_v40 = vpop.f32.mrb[12].mxu1  ;;  %852 = vxpose.xlu0.b32.cont [6/16] %v1020_v39, 128 }
 0x10e   :  { %v1022_v41 = vpop.f32.mrb[13].mxu1 }
 0x10f   :  { %v1023_v42 = vadd.f32 %v1022_v41, %v1021_v40  ;;  %v1024_v43 = vpop.f32.mrb[14].mxu1 }
 0x110   :  { %v1025_v44 = vpop.f32.mrb[15].mxu1 }
 0x111   :  { %837 = vst [vmem:[%s1656_s5 + $0x30] sm:$0xff] %v1023_v42  ;;  %v1026_v45 = vadd.f32 %v1025_v44, %v1024_v43  ;;  %853 = vxpose.xlu0.b32.cont [7/16] %v1023_v42, 128 }
 0x113   :  { %838 = vst [vmem:[%s1656_s5 + $0x38] sm:$0xff] %v1026_v45 }
 0x115   :  { %v1027_v47 = vpop.f32.mrb[16].mxu1  ;;  %854 = vxpose.xlu0.b32.cont [8/16] %v1026_v45, 128 }
 0x116   :  { %v1028_v48 = vpop.f32.mrb[17].mxu1 }
 0x117   :  { %v1029_v49 = vadd.f32 %v1028_v48, %v1027_v47  ;;  %v1030_v51 = vpop.f32.mrb[18].mxu1 }
 0x118   :  { %v1031_v52 = vpop.f32.mrb[19].mxu1 }
 0x119   :  { %839 = vst [vmem:[%s1656_s5 + $0x40] sm:$0xff] %v1029_v49  ;;  %v1032_v53 = vadd.f32 %v1031_v52, %v1030_v51  ;;  %855 = vxpose.xlu0.b32.cont [9/16] %v1029_v49, 128 }
 0x11b   :  { %840 = vst [vmem:[%s1656_s5 + $0x48] sm:$0xff] %v1032_v53 }
 0x11d   :  { %v1033_v54 = vpop.f32.mrb[20].mxu1  ;;  %856 = vxpose.xlu0.b32.cont [10/16] %v1032_v53, 128 }
 0x11e   :  { %v1034_v55 = vpop.f32.mrb[21].mxu1 }
 0x11f   :  { %v1035_v56 = vadd.f32 %v1034_v55, %v1033_v54  ;;  %v1036_v57 = vpop.f32.mrb[22].mxu1 }
 0x120   :  { %v1037_v58 = vpop.f32.mrb[23].mxu1 }
 0x121   :  { %841 = vst [vmem:[%s1656_s5 + $0x50] sm:$0xff] %v1035_v56  ;;  %v1038_v59 = vadd.f32 %v1037_v58, %v1036_v57  ;;  %857 = vxpose.xlu0.b32.cont [11/16] %v1035_v56, 128  ;;  %v543_v10 = vpop.f32.mrb[0].mxu0 }
 0x122   :  { %v545_v11 = vpop.f32.mrb[1].mxu0 }
 0x123   :  { %842 = vst [vmem:[%s1656_s5 + $0x58] sm:$0xff] %v1038_v59  ;;  %v971_v12 = vpack.c.bf16 %v545_v11, %v543_v10  ;;  %v547_v13 = vpop.f32.mrb[2].mxu0 }
 0x124   :  { %v549_v14 = vpop.f32.mrb[3].mxu0 }
 0x125   :  { %v1039_v60 = vpop.f32.mrb[24].mxu1  ;;  %858 = vxpose.xlu0.b32.cont [12/16] %v1038_v59, 128  ;;  %815 = vst [vmem:[%s1657_s4] sm:$0xff] %v971_v12  ;;  %v972_v15 = vpack.c.bf16 %v549_v14, %v547_v13 }
 0x126   :  { %v1040_v62 = vpop.f32.mrb[25].mxu1 }
 0x127   :  { %v1041_v63 = vadd.f32 %v1040_v62, %v1039_v60  ;;  %v1042_v24 = vpop.f32.mrb[26].mxu1  ;;  %816 = vst [vmem:[%s1657_s4 + $0x8] sm:$0xff] %v972_v15 }
 0x128   :  { %v1043_v0 = vpop.f32.mrb[27].mxu1 }
 0x129   :  { %843 = vst [vmem:[%s1656_s5 + $0x60] sm:$0xff] %v1041_v63  ;;  %v1044_v1 = vadd.f32 %v1043_v0, %v1042_v24  ;;  %859 = vxpose.xlu0.b32.cont [13/16] %v1041_v63, 128  ;;  %v553_v23 = vpop.f32.mrb[4].mxu0 }
 0x12a   :  { %v555_v16 = vpop.f32.mrb[5].mxu0 }
 0x12b   :  { %844 = vst [vmem:[%s1656_s5 + $0x68] sm:$0xff] %v1044_v1  ;;  %v973_v17 = vpack.c.bf16 %v555_v16, %v553_v23  ;;  %v557_v18 = vpop.f32.mrb[6].mxu0 }
 0x12c   :  { %v559_v19 = vpop.f32.mrb[7].mxu0 }
 0x12d   :  { %v1045_v3 = vpop.f32.mrb[28].mxu1  ;;  %860 = vxpose.xlu0.b32.cont [14/16] %v1044_v1, 128  ;;  %817 = vst [vmem:[%s1657_s4 + $0x10] sm:$0xff] %v973_v17  ;;  %v974_v21 = vpack.c.bf16 %v559_v19, %v557_v18 }
 0x12e   :  { %v1046_v4 = vpop.f32.mrb[29].mxu1 }
 0x12f   :  { %v1047_v6 = vadd.f32 %v1046_v4, %v1045_v3  ;;  %v1048_v7 = vpop.f32.mrb[30].mxu1  ;;  %818 = vst [vmem:[%s1657_s4 + $0x18] sm:$0xff] %v974_v21 }
 0x130   :  { %v1049_v26 = vpop.f32.mrb[31].mxu1 }
 0x131   :  { %845 = vst [vmem:[%s1656_s5 + $0x70] sm:$0xff] %v1047_v6  ;;  %v1050_v8 = vadd.f32 %v1049_v26, %v1048_v7  ;;  %861 = vxpose.xlu0.b32.cont [15/16] %v1047_v6, 128  ;;  %v563_v25 = vpop.f32.mrb[8].mxu0 }
 0x132   :  { %v565_v22 = vpop.f32.mrb[9].mxu0 }
 0x133   :  { %846 = vst [vmem:[%s1656_s5 + $0x78] sm:$0xff] %v1050_v8  ;;  %v975_v27 = vpack.c.bf16 %v565_v22, %v563_v25  ;;  %v567_v28 = vpop.f32.mrb[10].mxu0 }
 0x134   :  { %v569_v61 = vpop.f32.mrb[11].mxu0 }
 0x135   :  { %862 = vxpose.xlu0.b32.end [16/16] %v1050_v8, 128  ;;  %819 = vst [vmem:[%s1657_s4 + $0x20] sm:$0xff] %v975_v27  ;;  %v976_v2 = vpack.c.bf16 %v569_v61, %v567_v28 }
 0x137   :  { %820 = vst [vmem:[%s1657_s4 + $0x28] sm:$0xff] %v976_v2 }
 0x139   :  { %v573_v20 = vpop.f32.mrb[12].mxu0 }
 0x13a   :  { %v575_v29 = vpop.f32.mrb[13].mxu0 }
 0x13b   :  { %v977_v46 = vpack.c.bf16 %v575_v29, %v573_v20  ;;  %v577_v50 = vpop.f32.mrb[14].mxu0 }
 0x13c   :  { %v579_v5 = vpop.f32.mrb[15].mxu0 }
 0x13d   :  { %821 = vst [vmem:[%s1657_s4 + $0x30] sm:$0xff] %v977_v46  ;;  %v978_v9 = vpack.c.bf16 %v579_v5, %v577_v50 }
 0x13f   :  { %822 = vst [vmem:[%s1657_s4 + $0x38] sm:$0xff] %v978_v9 }
 0x141   :  { %v583_v30 = vpop.f32.mrb[16].mxu0 }
 0x142   :  { %v585_v31 = vpop.f32.mrb[17].mxu0 }
 0x143   :  { %v979_v32 = vpack.c.bf16 %v585_v31, %v583_v30  ;;  %v587_v33 = vpop.f32.mrb[18].mxu0 }
 0x144   :  { %v589_v34 = vpop.f32.mrb[19].mxu0 }
 0x145   :  { %823 = vst [vmem:[%s1657_s4 + $0x40] sm:$0xff] %v979_v32  ;;  %v980_v35 = vpack.c.bf16 %v589_v34, %v587_v33 }
 0x147   :  { %824 = vst [vmem:[%s1657_s4 + $0x48] sm:$0xff] %v980_v35 }
 0x149   :  { %v593_v36 = vpop.f32.mrb[20].mxu0 }
 0x14a   :  { %v595_v37 = vpop.f32.mrb[21].mxu0 }
 0x14b   :  { %v981_v38 = vpack.c.bf16 %v595_v37, %v593_v36  ;;  %v597_v39 = vpop.f32.mrb[22].mxu0 }
 0x14c   :  { %v599_v40 = vpop.f32.mrb[23].mxu0 }
 0x14d   :  { %825 = vst [vmem:[%s1657_s4 + $0x50] sm:$0xff] %v981_v38  ;;  %v982_v41 = vpack.c.bf16 %v599_v40, %v597_v39 }
 0x14f   :  { %826 = vst [vmem:[%s1657_s4 + $0x58] sm:$0xff] %v982_v41 }
 0x151   :  { %v603_v42 = vpop.f32.mrb[24].mxu0 }
 0x152   :  { %v605_v43 = vpop.f32.mrb[25].mxu0 }
 0x153   :  { %v983_v44 = vpack.c.bf16 %v605_v43, %v603_v42  ;;  %v607_v45 = vpop.f32.mrb[26].mxu0 }
 0x154   :  { %v609_v47 = vpop.f32.mrb[27].mxu0 }
 0x155   :  { %827 = vst [vmem:[%s1657_s4 + $0x60] sm:$0xff] %v983_v44  ;;  %v984_v48 = vpack.c.bf16 %v609_v47, %v607_v45 }
 0x157   :  { %828 = vst [vmem:[%s1657_s4 + $0x68] sm:$0xff] %v984_v48 }
 0x159   :  { %v613_v49 = vpop.f32.mrb[28].mxu0 }
 0x15a   :  { %v615_v51 = vpop.f32.mrb[29].mxu0 }
 0x15b   :  { %v985_v52 = vpack.c.bf16 %v615_v51, %v613_v49  ;;  %v617_v53 = vpop.f32.mrb[30].mxu0 }
 0x15c   :  { %v619_v54 = vpop.f32.mrb[31].mxu0 }
 0x15d   :  { %829 = vst [vmem:[%s1657_s4 + $0x70] sm:$0xff] %v985_v52  ;;  %v986_v55 = vpack.c.bf16 %v619_v54, %v617_v53 }
 0x15f   :  { %830 = vst [vmem:[%s1657_s4 + $0x78] sm:$0xff] %v986_v55 }
 0x179   :  { %v863_v56 = vpop.trf.xlu0 }
 0x17a   :  { %879 = vst [vmem:[%s1658_s6] sm:$0xff] %v863_v56 }
 0x17d   :  { %v864_v57 = vpop.trf.xlu0 }
 0x17e   :  { %880 = vst [vmem:[%s1658_s6 + $0x8] sm:$0xff] %v864_v57 }
 0x181   :  { %v865_v58 = vpop.trf.xlu0 }
 0x182   :  { %881 = vst [vmem:[%s1658_s6 + $0x10] sm:$0xff] %v865_v58 }
 0x185   :  { %v866_v59 = vpop.trf.xlu0 }
 0x186   :  { %882 = vst [vmem:[%s1658_s6 + $0x18] sm:$0xff] %v866_v59 }
 0x189   :  { %v867_v60 = vpop.trf.xlu0 }
 0x18a   :  { %883 = vst [vmem:[%s1658_s6 + $0x20] sm:$0xff] %v867_v60 }
 0x18d   :  { %v868_v62 = vpop.trf.xlu0 }
 0x18e   :  { %884 = vst [vmem:[%s1658_s6 + $0x28] sm:$0xff] %v868_v62 }
 0x191   :  { %v869_v63 = vpop.trf.xlu0 }
 0x192   :  { %885 = vst [vmem:[%s1658_s6 + $0x30] sm:$0xff] %v869_v63 }
 0x195   :  { %v870_v24 = vpop.trf.xlu0 }
 0x196   :  { %886 = vst [vmem:[%s1658_s6 + $0x38] sm:$0xff] %v870_v24 }
 0x199   :  { %v871_v0 = vpop.trf.xlu0 }
 0x19a   :  { %887 = vst [vmem:[%s1658_s6 + $0x40] sm:$0xff] %v871_v0 }
 0x19d   :  { %v872_v1 = vpop.trf.xlu0 }
 0x19e   :  { %888 = vst [vmem:[%s1658_s6 + $0x48] sm:$0xff] %v872_v1 }
 0x1a1   :  { %v873_v3 = vpop.trf.xlu0 }
 0x1a2   :  { %889 = vst [vmem:[%s1658_s6 + $0x50] sm:$0xff] %v873_v3 }
 0x1a5   :  { %v874_v4 = vpop.trf.xlu0 }
 0x1a6   :  { %890 = vst [vmem:[%s1658_s6 + $0x58] sm:$0xff] %v874_v4 }
 0x1a9   :  { %v875_v6 = vpop.trf.xlu0 }
 0x1aa   :  { %891 = vst [vmem:[%s1658_s6 + $0x60] sm:$0xff] %v875_v6 }
 0x1ad   :  { %v876_v7 = vpop.trf.xlu0 }
 0x1ae   :  { %892 = vst [vmem:[%s1658_s6 + $0x68] sm:$0xff] %v876_v7 }
 0x1b1   :  { %v877_v26 = vpop.trf.xlu0 }
 0x1b2   :  { %893 = vst [vmem:[%s1658_s6 + $0x70] sm:$0xff] %v877_v26 }
 0x1b5   :  { %v878_v8 = vpop.trf.xlu0 }
 0x1b6   :  { %894 = vst [vmem:[%s1658_s6 + $0x78] sm:$0xff] %v878_v8 }

// kernel: gat_forward.9
= control target key start
LH: loop header
LB: loop body
LE: loop exit
PB: predicated region body
PF: predicated region fallthrough
CT: control target
= control target key end

     0   :  { %v64_v0 = vlaneseq  ;;  %vm28_vm0 = vcmask 25600   ;;  %v513_v1 = vmov 0.0   ;;  %s841_s0 = inlined_call_operand.vmem [shape: f32[128,256], index: 0, kind: input, shape index: {}]   ;;  %s842_s1 = inlined_call_operand.vmem [shape: f32[1,256], index: 1, kind: input, shape index: {}]   ;;  %s843_s2 = inlined_call_operand.vmem [shape: f32[1,256], index: 2, kind: input, shape index: {}]   ;;  %s844_s3 = inlined_call_operand.vmem [shape: f32[2,128], index: 3, kind: input, shape index: {}]   ;;  %s845_s4 = inlined_call_operand.vmem [shape: f32[256,4], index: 4, kind: input, shape index: {}]   ;;  %s846_s5 = inlined_call_operand.vmem [shape: f32[1,4], index: 5, kind: input, shape index: {}]   ;;  %s847_s6 = inlined_call_operand.hbm [shape: f32[2,4], index: 6, kind: output, shape index: {}]  }
   0x1   :  { %29 = vst.msk [vmem:[#allocation2] sm:$0x3] %vm28_vm0, %v513_v1  ;;  %247 = vmatprep.mubr.f32.mxu0 %v513_v1  ;;  %v62_v3 = vld [vmem:[%s842_s1] sm:$0x3]  ;;  %v31_v5 = vld [vmem:[%s841_s0 + $0x8] sm:$0xff]  ;;  %v33_v6 = vld [vmem:[%s841_s0 + $0x18] sm:$0xff] }
   0x2   :  { %v65_v2 = vshrl.u32 %v64_v0, 7  ;;  %v106_v4 = vld [vmem:[%s843_s2] sm:$0x3]  ;;  %v32_v10 = vld [vmem:[%s841_s0 + $0x10] sm:$0xff]  ;;  %v35_v11 = vld [vmem:[%s841_s0 + $0x28] sm:$0xff] }
   0x3   :  { %v30_v9 = vld [vmem:[%s841_s0] sm:$0xff]  ;;  %v37_v16 = vld [vmem:[%s841_s0 + $0x38] sm:$0xff]  ;;  %v36_v18 = vld [vmem:[%s841_s0 + $0x30] sm:$0xff] }
   0x4   :  { %v70_v7 = vsub.s32 1, %v65_v2  ;;  %v66_v8 = vsub.s32 0, %v65_v2  ;;  %v34_v17 = vld [vmem:[%s841_s0 + $0x20] sm:$0xff]  ;;  %v39_v35 = vld [vmem:[%s841_s0 + $0x48] sm:$0xff]  ;;  %v41_v36 = vld [vmem:[%s841_s0 + $0x58] sm:$0xff] }
   0x5   :  { %v38_v41 = vld [vmem:[%s841_s0 + $0x40] sm:$0xff]  ;;  %v40_v42 = vld [vmem:[%s841_s0 + $0x50] sm:$0xff]  ;;  %v43_v47 = vld [vmem:[%s841_s0 + $0x68] sm:$0xff] }
   0x6   :  { %v572_v12 = vrot.slane %v62_v3, %v70_v7  ;;  %v574_v13 = vrot.slane %v106_v4, %v70_v7  ;;  %v576_v14 = vrot.slane %v62_v3, %v66_v8  ;;  %v578_v15 = vrot.slane %v106_v4, %v66_v8  ;;  %v45_v48 = vld [vmem:[%s841_s0 + $0x78] sm:$0xff]  ;;  %v42_v53 = vld [vmem:[%s841_s0 + $0x60] sm:$0xff]  ;;  %v44_v54 = vld [vmem:[%s841_s0 + $0x70] sm:$0xff] }
   0x7   :  { %v47_v3 = vld [vmem:[%s841_s0 + $0x88] sm:$0xff]  ;;  %v49_v8 = vld [vmem:[%s841_s0 + $0x98] sm:$0xff] }
   0x8   :  { %v75_v19 = vmul.f32 %v572_v12, %v31_v5  ;;  %v77_v20 = vmul.f32 %v572_v12, %v33_v6  ;;  %v74_v21 = vmul.f32 %v576_v14, %v30_v9  ;;  %v76_v22 = vmul.f32 %v576_v14, %v32_v10 }
   0x9   :  { %v79_v23 = vmul.f32 %v572_v12, %v35_v11  ;;  %v81_v24 = vmul.f32 %v572_v12, %v37_v16  ;;  %v78_v25 = vmul.f32 %v576_v14, %v34_v17  ;;  %v80_v26 = vmul.f32 %v576_v14, %v36_v18  ;;  %v46_v17 = vld [vmem:[%s841_s0 + $0x80] sm:$0xff]  ;;  %v48_v18 = vld [vmem:[%s841_s0 + $0x90] sm:$0xff] }
   0xa   :  { %v119_v27 = vadd.f32 %v574_v13, %v75_v19  ;;  %v121_v28 = vadd.f32 %v574_v13, %v77_v20  ;;  %v118_v29 = vadd.f32 %v578_v15, %v74_v21  ;;  %v120_v30 = vadd.f32 %v578_v15, %v76_v22 }
   0xb   :  { %v123_v31 = vadd.f32 %v574_v13, %v79_v23  ;;  %v125_v32 = vadd.f32 %v574_v13, %v81_v24  ;;  %v122_v33 = vadd.f32 %v578_v15, %v78_v25  ;;  %v124_v34 = vadd.f32 %v578_v15, %v80_v26  ;;  %v51_v23 = vld [vmem:[%s841_s0 + $0xa8] sm:$0xff]  ;;  %v53_v24 = vld [vmem:[%s841_s0 + $0xb8] sm:$0xff] }
   0xc   :  { %v151_v37 = vmax.f32 %v119_v27, 0.0  ;;  %v153_v38 = vmax.f32 %v121_v28, 0.0  ;;  %v150_v39 = vmax.f32 %v118_v29, 0.0  ;;  %v152_v40 = vmax.f32 %v120_v30, 0.0  ;;  %v50_v29 = vld [vmem:[%s841_s0 + $0xa0] sm:$0xff] }
   0xd   :  { %v155_v43 = vmax.f32 %v123_v31, 0.0  ;;  %v157_v44 = vmax.f32 %v125_v32, 0.0  ;;  %v154_v45 = vmax.f32 %v122_v33, 0.0  ;;  %v156_v46 = vmax.f32 %v124_v34, 0.0  ;;  %v52_v34 = vld [vmem:[%s841_s0 + $0xb0] sm:$0xff] }
   0xe   :  { %v423_v49 = vpack.c.bf16 %v153_v38, %v151_v37  ;;  %v425_v50 = vpack.c.bf16 %v152_v40, %v150_v39  ;;  %v83_v51 = vmul.f32 %v572_v12, %v39_v35  ;;  %v85_v52 = vmul.f32 %v572_v12, %v41_v36 }
   0xf   :  { %v427_v55 = vpack.c.bf16 %v157_v44, %v155_v43  ;;  %v429_v56 = vpack.c.bf16 %v156_v46, %v154_v45  ;;  %v82_v57 = vmul.f32 %v576_v14, %v38_v41  ;;  %v84_v58 = vmul.f32 %v576_v14, %v40_v42 }
  0x10   :  { %424 = vmatprep.subr.bf16.mxu0 %v423_v49  ;;  %v127_v59 = vadd.f32 %v574_v13, %v83_v51  ;;  %v129_v60 = vadd.f32 %v574_v13, %v85_v52  ;;  %v87_v61 = vmul.f32 %v572_v12, %v43_v47  ;;  %v89_v62 = vmul.f32 %v572_v12, %v45_v48 }
  0x11   :  { %426 = vmatpush1.bf16.msra.mxu0 %v425_v50  ;;  %v126_v63 = vadd.f32 %v578_v15, %v82_v57  ;;  %v128_v0 = vadd.f32 %v578_v15, %v84_v58  ;;  %v86_v1 = vmul.f32 %v576_v14, %v42_v53  ;;  %v88_v2 = vmul.f32 %v576_v14, %v44_v54 }
  0x12   :  { %428 = vmatprep.subr.bf16.mxu0 %v427_v55  ;;  %v159_v4 = vmax.f32 %v127_v59, 0.0  ;;  %v161_v5 = vmax.f32 %v129_v60, 0.0  ;;  %v131_v6 = vadd.f32 %v574_v13, %v87_v61  ;;  %v133_v7 = vadd.f32 %v574_v13, %v89_v62 }
  0x13   :  { %v158_v9 = vmax.f32 %v126_v63, 0.0  ;;  %v160_v10 = vmax.f32 %v128_v0, 0.0  ;;  %v130_v11 = vadd.f32 %v578_v15, %v86_v1  ;;  %v132_v16 = vadd.f32 %v578_v15, %v88_v2 }
  0x14   :  { %v431_v19 = vpack.c.bf16 %v161_v5, %v159_v4  ;;  %v163_v20 = vmax.f32 %v131_v6, 0.0  ;;  %v165_v21 = vmax.f32 %v133_v7, 0.0  ;;  %v91_v22 = vmul.f32 %v572_v12, %v47_v3 }
  0x15   :  { %430 = vmatpush1.bf16.msra.mxu0 %v429_v56  ;;  %v433_v25 = vpack.c.bf16 %v160_v10, %v158_v9  ;;  %v162_v26 = vmax.f32 %v130_v11, 0.0  ;;  %v164_v27 = vmax.f32 %v132_v16, 0.0  ;;  %v93_v28 = vmul.f32 %v572_v12, %v49_v8 }
  0x16   :  { %432 = vmatprep.subr.bf16.mxu0 %v431_v19  ;;  %v435_v30 = vpack.c.bf16 %v165_v21, %v163_v20  ;;  %v135_v31 = vadd.f32 %v574_v13, %v91_v22  ;;  %v90_v32 = vmul.f32 %v576_v14, %v46_v17  ;;  %v92_v33 = vmul.f32 %v576_v14, %v48_v18 }
  0x17   :  { %11 = vsyncpa [#allocation3], 0  ;;  %v437_v35 = vpack.c.bf16 %v164_v27, %v162_v26  ;;  %v137_v36 = vadd.f32 %v574_v13, %v93_v28  ;;  %v95_v37 = vmul.f32 %v572_v12, %v51_v23  ;;  %v97_v38 = vmul.f32 %v572_v12, %v53_v24  ;;  %v55_v39 = vld [vmem:[%s841_s0 + $0xc8] sm:$0xff]  ;;  %v57_v48 = vld [vmem:[%s841_s0 + $0xd8] sm:$0xff]  ;;  %s514_s23 = smov [#allocation2]  }
  0x18   :  { %v167_v40 = vmax.f32 %v135_v31, 0.0  ;;  %v134_v41 = vadd.f32 %v578_v15, %v90_v32  ;;  %v136_v42 = vadd.f32 %v578_v15, %v92_v33  ;;  %v94_v43 = vmul.f32 %v576_v14, %v50_v29  ;;  %v54_v53 = vld [vmem:[%s841_s0 + $0xc0] sm:$0xff]  ;;  %v56_v54 = vld [vmem:[%s841_s0 + $0xd0] sm:$0xff]  ;;  %v59_v59 = vld [vmem:[%s841_s0 + $0xe8] sm:$0xff]  ;;  %s379_s24 = sshll.u32 %s514_s23, 4  ;;  %s380_s24 = int_to_ptr.vmem [resolvable:$true] %s379_s24 }
  0x19   :  { %434 = vmatpush1.bf16.msra.mxu0 %v433_v25  ;;  %v169_v44 = vmax.f32 %v137_v36, 0.0  ;;  %v139_v45 = vadd.f32 %v574_v13, %v95_v37  ;;  %v141_v46 = vadd.f32 %v574_v13, %v97_v38  ;;  %v96_v47 = vmul.f32 %v576_v14, %v52_v34  ;;  %v61_v60 = vld [vmem:[%s841_s0 + $0xf8] sm:$0xff]  ;;  %v58_v1 = vld [vmem:[%s841_s0 + $0xe0] sm:$0xff]  ;;  %v60_v6 = vld [vmem:[%s841_s0 + $0xf0] sm:$0xff]  ;;  %p494_p1 = scmp.lt.s32.totalorder %s380_s24, %s380_s24 }
  0x1a   :  { %436 = vmatprep.subr.bf16.mxu0 %v435_v30  ;;  %v166_v49 = vmax.f32 %v134_v41, 0.0  ;;  %v168_v50 = vmax.f32 %v136_v42, 0.0  ;;  %v138_v51 = vadd.f32 %v578_v15, %v94_v43  ;;  %v99_v52 = vmul.f32 %v572_v12, %v55_v39  ;;  %v271_v11 = vld [vmem:[%s845_s4 + $0x80] sm:$0xff]  ;;  %v272_v16 = vld [vmem:[%s845_s4 + $0x88] sm:$0xff]  ;;  %v273_v26 = vld [vmem:[%s845_s4 + $0x90] sm:$0xff] }
  0x1b   :  { %v439_v55 = vpack.c.bf16 %v169_v44, %v167_v40  ;;  %v171_v56 = vmax.f32 %v139_v45, 0.0  ;;  %v173_v57 = vmax.f32 %v141_v46, 0.0  ;;  %v140_v58 = vadd.f32 %v578_v15, %v96_v47  ;;  %v255_v21 = vld [vmem:[%s845_s4] sm:$0xff]  ;;  %v256_v25 = vld [vmem:[%s845_s4 + $0x8] sm:$0xff]  ;;  %v274_v27 = vld [vmem:[%s845_s4 + $0x98] sm:$0xff] }
  0x1c   :  { %v441_v61 = vpack.c.bf16 %v168_v50, %v166_v49  ;;  %v170_v62 = vmax.f32 %v138_v51, 0.0  ;;  %v101_v63 = vmul.f32 %v572_v12, %v57_v48  ;;  %v143_v0 = vadd.f32 %v574_v13, %v99_v52  ;;  %v257_v34 = vld [vmem:[%s845_s4 + $0x10] sm:$0xff]  ;;  %v275_v38 = vld [vmem:[%s845_s4 + $0xa0] sm:$0xff]  ;;  %v276_v39 = vld [vmem:[%s845_s4 + $0xa8] sm:$0xff] }
  0x1d   :  { %438 = vmatpush1.bf16.msra.mxu0 %v437_v35  ;;  %v443_v2 = vpack.c.bf16 %v173_v57, %v171_v56  ;;  %v172_v3 = vmax.f32 %v140_v58, 0.0  ;;  %v98_v4 = vmul.f32 %v576_v14, %v54_v53  ;;  %v100_v5 = vmul.f32 %v576_v14, %v56_v54  ;;  %v258_v35 = vld [vmem:[%s845_s4 + $0x18] sm:$0xff]  ;;  %v259_v45 = vld [vmem:[%s845_s4 + $0x20] sm:$0xff]  ;;  %v260_v46 = vld [vmem:[%s845_s4 + $0x28] sm:$0xff] }
  0x1e   :  { %440 = vmatprep.subr.bf16.mxu0 %v439_v55  ;;  %v145_v7 = vadd.f32 %v574_v13, %v101_v63  ;;  %v175_v8 = vmax.f32 %v143_v0, 0.0  ;;  %v103_v9 = vmul.f32 %v572_v12, %v59_v59  ;;  %v105_v10 = vmul.f32 %v572_v12, %v61_v60  ;;  %v277_v47 = vld [vmem:[%s845_s4 + $0xb0] sm:$0xff]  ;;  %v278_v48 = vld [vmem:[%s845_s4 + $0xb8] sm:$0xff]  ;;  %v279_v54 = vld [vmem:[%s845_s4 + $0xc0] sm:$0xff] }
  0x1f   :  { %v445_v17 = vpack.c.bf16 %v172_v3, %v170_v62  ;;  %v142_v18 = vadd.f32 %v578_v15, %v98_v4  ;;  %v144_v19 = vadd.f32 %v578_v15, %v100_v5  ;;  %v102_v20 = vmul.f32 %v576_v14, %v58_v1  ;;  %v261_v52 = vld [vmem:[%s845_s4 + $0x30] sm:$0xff]  ;;  %v262_v53 = vld [vmem:[%s845_s4 + $0x38] sm:$0xff]  ;;  %v280_v55 = vld [vmem:[%s845_s4 + $0xc8] sm:$0xff] }
  0x20   :  { %v177_v12 = vmax.f32 %v145_v7, 0.0  ;;  %v147_v22 = vadd.f32 %v574_v13, %v103_v9  ;;  %v149_v23 = vadd.f32 %v574_v13, %v105_v10  ;;  %v104_v24 = vmul.f32 %v576_v14, %v60_v6  ;;  %v182_v56 = vld [vmem:[%s844_s3] sm:$0x3]  ;;  %v264_v60 = vld [vmem:[%s845_s4 + $0x48] sm:$0xff]  ;;  %v282_v62 = vld [vmem:[%s845_s4 + $0xd8] sm:$0xff] }
  0x21   :  { %442 = vmatpush1.bf16.msra.mxu0 %v441_v61  ;;  %v174_v28 = vmax.f32 %v142_v18, 0.0  ;;  %v176_v29 = vmax.f32 %v144_v19, 0.0  ;;  %v146_v30 = vadd.f32 %v578_v15, %v102_v20  ;;  %v455_v13 = vpack.c.bf16 %v272_v16, %v271_v11  ;;  %v263_v59 = vld [vmem:[%s845_s4 + $0x40] sm:$0xff]  ;;  %v281_v61 = vld [vmem:[%s845_s4 + $0xd0] sm:$0xff]  ;;  %v284_v4 = vld [vmem:[%s845_s4 + $0xe8] sm:$0xff] }
  0x22   :  { %444 = vmatprep.subr.bf16.mxu0 %v443_v2  ;;  %v447_v14 = vpack.c.bf16 %v177_v12, %v175_v8  ;;  %v179_v31 = vmax.f32 %v147_v22, 0.0  ;;  %v181_v32 = vmax.f32 %v149_v23, 0.0  ;;  %v148_v33 = vadd.f32 %v578_v15, %v104_v24  ;;  %v265_v1 = vld [vmem:[%s845_s4 + $0x50] sm:$0xff]  ;;  %v266_v2 = vld [vmem:[%s845_s4 + $0x58] sm:$0xff]  ;;  %v283_v3 = vld [vmem:[%s845_s4 + $0xe0] sm:$0xff] }
  0x23   :  { %456 = vmatprep.subr.bf16.mxu1 %v455_v13  ;;  %v457_v36 = vpack.c.bf16 %v256_v25, %v255_v21  ;;  %v459_v37 = vpack.c.bf16 %v274_v27, %v273_v26  ;;  %v449_v15 = vpack.c.bf16 %v176_v29, %v174_v28  ;;  %v178_v40 = vmax.f32 %v146_v30, 0.0  ;;  %v267_v7 = vld [vmem:[%s845_s4 + $0x60] sm:$0xff]  ;;  %v268_v8 = vld [vmem:[%s845_s4 + $0x68] sm:$0xff]  ;;  %v285_v9 = vld [vmem:[%s845_s4 + $0xf0] sm:$0xff] }
  0x24   :  { %v180_v41 = vmax.f32 %v148_v33, 0.0  ;;  %v461_v42 = vpack.c.bf16 %v258_v35, %v257_v34  ;;  %v451_v43 = vpack.c.bf16 %v181_v32, %v179_v31  ;;  %v463_v44 = vpack.c.bf16 %v276_v39, %v275_v38  ;;  %v286_v10 = vld [vmem:[%s845_s4 + $0xf8] sm:$0xff]  ;;  %v254_v22 = vld [vmem:[#allocation2] sm:$0x3] }
  0x25   :  { %446 = vmatpush1.bf16.msra.mxu0 %v445_v17  ;;  %458 = vmatpush3.bf16.msra.mxu1 %v457_v36  ;;  %v465_v50 = vpack.c.bf16 %v260_v46, %v259_v45  ;;  %v467_v51 = vpack.c.bf16 %v278_v48, %v277_v47  ;;  %v469_v57 = vpack.c.bf16 %v262_v53, %v261_v52  ;;  %v269_v17 = vld [vmem:[%s845_s4 + $0x70] sm:$0xff]  ;;  %v270_v18 = vld [vmem:[%s845_s4 + $0x78] sm:$0xff]  ;;  %v387_v26 = vld [vmem:[%s846_s5] ss:$0 sm:$0xff]  ;;  %s489_s4 = scalar_lea.vmem %s380_s24, 32 }
  0x26   :  { %448 = vmatprep.subr.bf16.mxu0 %v447_v14  ;;  %460 = vmatprep.subr.bf16.mxu1 %v459_v37  ;;  %v453_v49 = vpack.c.bf16 %v180_v41, %v178_v40  ;;  %v471_v58 = vpack.c.bf16 %v280_v55, %v279_v54  ;;  %v473_v63 = vpack.c.bf16 %v264_v60, %v263_v59  ;;  %p490_p0 = scmp.ne.s32.totalorder %s380_s24, %s489_s4  ;;  %p495_p2 = scmp.lt.s32.totalorder %s489_s4, %s489_s4 }
  0x27   :  { %v475_v0 = vpack.c.bf16 %v282_v62, %v281_v61  ;;  %v477_v5 = vpack.c.bf16 %v266_v2, %v265_v1  ;;  %v479_v6 = vpack.c.bf16 %v284_v4, %v283_v3  ;;  %v481_v11 = vpack.c.bf16 %v268_v8, %v267_v7 }
  0x28   :  { %v483_v16 = vpack.c.bf16 %v286_v10, %v285_v9  ;;  %v485_v19 = vpack.c.bf16 %v270_v18, %v269_v17  ;;  %p496_p3 = por %p495_p2, %p494_p1 }
  0x29   :  { %450 = vmatpush1.bf16.msra.mxu0 %v449_v15  ;;  %462 = vmatpush3.bf16.msra.mxu1 %v461_v42 }
  0x2a   :  { %452 = vmatprep.subr.bf16.mxu0 %v451_v43  ;;  %464 = vmatprep.subr.bf16.mxu1 %v463_v44  ;;  %p497_p4 = pnand %p496_p3, %p490_p0 }
  0x2d   :  { %454 = vmatpush1.bf16.msra.mxu0 %v453_v49  ;;  %466 = vmatpush3.bf16.msra.mxu1 %v465_v50 }
  0x2e   :  { %468 = vmatprep.subr.bf16.mxu1 %v467_v51 }
  0x30   :  { %248 = vmatmul.mubr.f32.vlgmr.msra.gmra.mrb[0].mxu0 %v182_v56 }
  0x31   :  { %470 = vmatpush3.bf16.msra.mxu1 %v469_v57 }
  0x32   :  { %472 = vmatprep.subr.bf16.mxu1 %v471_v58 }
  0x35   :  { %474 = vmatpush3.bf16.msra.mxu1 %v473_v63 }
  0x36   :  { %476 = vmatprep.subr.bf16.mxu1 %v475_v0 }
  0x39   :  { %478 = vmatpush3.bf16.msra.mxu1 %v477_v5 }
  0x3a   :  { %480 = vmatprep.subr.bf16.mxu1 %v479_v6 }
  0x3d   :  { %482 = vmatpush3.bf16.msra.mxu1 %v481_v11 }
  0x3e   :  { %484 = vmatprep.subr.bf16.mxu1 %v483_v16 }
  0x41   :  { %486 = vmatpush3.bf16.msra.mxu1 %v485_v19 }
 0x103   :  { %v249_v20 = vpop.f32.mrb[0].mxu0 }
 0x104   :  { %v251_v21 = vpop.f32.mrb[1].mxu0 }
 0x105   :  { %351 = vmatprep.mubr.f32.mxu1 %v251_v21 }
 0x106   :  { %352 = vmatmul.mubr.f32.vlgmr.msra.gmra.mrb[0].mxu1 %v249_v20 }
 0x1d9   :  { %v420_v12 = vpop.f32.mrb[0].mxu1 }
 0x1da   :  { %v421_v23 = vpop.f32.mrb[1].mxu1 }
 0x1db   :  { %v422_v24 = vadd.f32 %v421_v23, %v420_v12 }
 0x1dd   :  { %v357_v25 = vadd.f32 %v422_v24, %v254_v22 }
 0x1df   :  { %359 = vst.msk [vmem:[#allocation2] sm:$0x3] %vm28_vm0, %v357_v25 }
 0x1e6   :  { %v363_v27 = vld [vmem:[#allocation2] sm:$0x3] }
 0x1e7   :  { %v371_v28 = vadd.f32 %v387_v26, %v363_v27 }
 0x1e9   :  { %372 = vst.msk [vmem:[#allocation2] sm:$0x3] %vm28_vm0, %v371_v28 }
 0x1ea   :  { %500 = shalt.err (!%p497_p4)
}
 0x1eb   :  { %s501_s27 = scalar_lea.hbm %s847_s6, 32 }
 0x1ec   :  { %p502_p5 = scmp.ne.s32.totalorder %s847_s6, %s501_s27  ;;  %p505_p6 = scmp.lt.u32.totalorder %s501_s27, %s847_s6 }
 0x1ee   :  { %p507_p7 = pnand %p505_p6, %p502_p5 }
 0x1f0   :  { %510 = shalt.err (!%p507_p7)
}
 0x1f1   :  { %382 = dma.vmem_to_hbm [thread:$0]  %s380_s24, 32, %s847_s6, [#allocation3]  }
 0x1f2   :  { %511 = dma.done.wait [#allocation3], 32  }
 0x1f3   :  { %512 = vsyncadd [#allocation3], 4294967264 }
 0x1f4   :  { %386 = vsyncpa [#allocation3], 1 }

// kernel: gat_forward.6
= control target key start
LH: loop header
LB: loop body
LE: loop exit
PB: predicated region body
PF: predicated region fallthrough
CT: control target
= control target key end

     0   :  { %vm27_vm0 = vcmask 15360   ;;  %v2507_v0 = vmov -1e+30   ;;  %v2508_v1 = vmov 0.0   ;;  %s3732_s0 = inlined_call_operand.<no memory space> [shape: s32[1,1], index: 0, kind: input, shape index: {}]   ;;  %s3733_s1 = inlined_call_operand.vmem [shape: s8[128,128], index: 1, kind: input, shape index: {}]   ;;  %s3734_s2 = inlined_call_operand.vmem [shape: f32[128,128], index: 2, kind: input, shape index: {}]   ;;  %s3735_s3 = inlined_call_operand.vmem [shape: f32[128,128], index: 3, kind: input, shape index: {}]   ;;  %s3736_s4 = inlined_call_operand.vmem [shape: bf16[128,256], index: 4, kind: input, shape index: {}]   ;;  %s3737_s5 = inlined_call_operand.vmem [shape: f32[1,256], index: 5, kind: input, shape index: {}]   ;;  %s3738_s6 = inlined_call_operand.vmem [shape: f32[128,256], index: 6, kind: output, shape index: {}]  }
   0x1   :  { %28 = vst.msk [vmem:[#allocation2] sm:$0xff] %vm27_vm0, %v2507_v0  ;;  %29 = vst.msk [vmem:[#allocation2 + $0x8] sm:$0xff] %vm27_vm0, %v2507_v0  ;;  %p2179_p0 = scmp.le.s32.totalorder %s3732_s0, 0 }
   0x2   :  { %30 = vst.msk [vmem:[#allocation2 + $0x10] sm:$0xff] %vm27_vm0, %v2507_v0  ;;  %31 = vst.msk [vmem:[#allocation2 + $0x18] sm:$0xff] %vm27_vm0, %v2507_v0 }
   0x3   :  { %32 = vst.msk [vmem:[#allocation2 + $0x20] sm:$0xff] %vm27_vm0, %v2507_v0  ;;  %33 = vst.msk [vmem:[#allocation2 + $0x28] sm:$0xff] %vm27_vm0, %v2507_v0 }
   0x4   :  { %34 = vst.msk [vmem:[#allocation2 + $0x30] sm:$0xff] %vm27_vm0, %v2507_v0  ;;  %35 = vst.msk [vmem:[#allocation2 + $0x38] sm:$0xff] %vm27_vm0, %v2507_v0 }
   0x5   :  { %36 = vst.msk [vmem:[#allocation2 + $0x40] sm:$0xff] %vm27_vm0, %v2507_v0  ;;  %37 = vst.msk [vmem:[#allocation2 + $0x48] sm:$0xff] %vm27_vm0, %v2507_v0 }
   0x6   :  { %38 = vst.msk [vmem:[#allocation2 + $0x50] sm:$0xff] %vm27_vm0, %v2507_v0  ;;  %39 = vst.msk [vmem:[#allocation2 + $0x58] sm:$0xff] %vm27_vm0, %v2507_v0 }
   0x7   :  { %40 = vst.msk [vmem:[#allocation2 + $0x60] sm:$0xff] %vm27_vm0, %v2507_v0  ;;  %41 = vst.msk [vmem:[#allocation2 + $0x68] sm:$0xff] %vm27_vm0, %v2507_v0 }
   0x8   :  { %42 = vst.msk [vmem:[#allocation2 + $0x70] sm:$0xff] %vm27_vm0, %v2507_v0  ;;  %43 = vst.msk [vmem:[#allocation2 + $0x78] sm:$0xff] %vm27_vm0, %v2507_v0 }
   0x9   :  { %44 = vst.msk [vmem:[#allocation3] sm:$0xff] %vm27_vm0, %v2508_v1  ;;  %45 = vst.msk [vmem:[#allocation3 + $0x8] sm:$0xff] %vm27_vm0, %v2508_v1 }
   0xa   :  { %46 = vst.msk [vmem:[#allocation3 + $0x10] sm:$0xff] %vm27_vm0, %v2508_v1  ;;  %47 = vst.msk [vmem:[#allocation3 + $0x18] sm:$0xff] %vm27_vm0, %v2508_v1 }
   0xb   :  { %48 = vst.msk [vmem:[#allocation3 + $0x20] sm:$0xff] %vm27_vm0, %v2508_v1  ;;  %49 = vst.msk [vmem:[#allocation3 + $0x28] sm:$0xff] %vm27_vm0, %v2508_v1 }
   0xc   :  { %50 = vst.msk [vmem:[#allocation3 + $0x30] sm:$0xff] %vm27_vm0, %v2508_v1  ;;  %51 = vst.msk [vmem:[#allocation3 + $0x38] sm:$0xff] %vm27_vm0, %v2508_v1 }
   0xd   :  { %52 = vst.msk [vmem:[#allocation3 + $0x40] sm:$0xff] %vm27_vm0, %v2508_v1  ;;  %53 = vst.msk [vmem:[#allocation3 + $0x48] sm:$0xff] %vm27_vm0, %v2508_v1 }
   0xe   :  { %54 = vst.msk [vmem:[#allocation3 + $0x50] sm:$0xff] %vm27_vm0, %v2508_v1  ;;  %55 = vst.msk [vmem:[#allocation3 + $0x58] sm:$0xff] %vm27_vm0, %v2508_v1 }
   0xf   :  { %56 = vst.msk [vmem:[#allocation3 + $0x60] sm:$0xff] %vm27_vm0, %v2508_v1  ;;  %57 = vst.msk [vmem:[#allocation3 + $0x68] sm:$0xff] %vm27_vm0, %v2508_v1 }
  0x10   :  { %58 = vst.msk [vmem:[#allocation3 + $0x70] sm:$0xff] %vm27_vm0, %v2508_v1  ;;  %59 = vst.msk [vmem:[#allocation3 + $0x78] sm:$0xff] %vm27_vm0, %v2508_v1 }
  0x11   :  { %60 = vst [vmem:[#allocation4] sm:$0xff] %v2508_v1  ;;  %61 = vst [vmem:[#allocation4 + $0x8] sm:$0xff] %v2508_v1 }
  0x12   :  { %62 = vst [vmem:[#allocation4 + $0x10] sm:$0xff] %v2508_v1  ;;  %63 = vst [vmem:[#allocation4 + $0x18] sm:$0xff] %v2508_v1 }
  0x13   :  { %64 = vst [vmem:[#allocation4 + $0x20] sm:$0xff] %v2508_v1  ;;  %65 = vst [vmem:[#allocation4 + $0x28] sm:$0xff] %v2508_v1 }
  0x14   :  { %66 = vst [vmem:[#allocation4 + $0x30] sm:$0xff] %v2508_v1  ;;  %67 = vst [vmem:[#allocation4 + $0x38] sm:$0xff] %v2508_v1 }
  0x15   :  { %68 = vst [vmem:[#allocation4 + $0x40] sm:$0xff] %v2508_v1  ;;  %69 = vst [vmem:[#allocation4 + $0x48] sm:$0xff] %v2508_v1 }
  0x16   :  { %70 = vst [vmem:[#allocation4 + $0x50] sm:$0xff] %v2508_v1  ;;  %71 = vst [vmem:[#allocation4 + $0x58] sm:$0xff] %v2508_v1 }
  0x17   :  { %72 = vst [vmem:[#allocation4 + $0x60] sm:$0xff] %v2508_v1  ;;  %73 = vst [vmem:[#allocation4 + $0x68] sm:$0xff] %v2508_v1 }
  0x18   :  { %74 = vst [vmem:[#allocation4 + $0x70] sm:$0xff] %v2508_v1  ;;  %75 = vst [vmem:[#allocation4 + $0x78] sm:$0xff] %v2508_v1 }
  0x19   :  { %76 = vst [vmem:[#allocation4 + $0x80] sm:$0xff] %v2508_v1  ;;  %77 = vst [vmem:[#allocation4 + $0x88] sm:$0xff] %v2508_v1 }
  0x1a   :  { %78 = vst [vmem:[#allocation4 + $0x90] sm:$0xff] %v2508_v1  ;;  %79 = vst [vmem:[#allocation4 + $0x98] sm:$0xff] %v2508_v1  ;;  %99 = sbr.rel (%p2179_p0) target bundleno = 779 (0x30b), region = 29 }
  0x1b   :  { %80 = vst [vmem:[#allocation4 + $0xa0] sm:$0xff] %v2508_v1  ;;  %81 = vst [vmem:[#allocation4 + $0xa8] sm:$0xff] %v2508_v1 }
  0x1c   :  { %82 = vst [vmem:[#allocation4 + $0xb0] sm:$0xff] %v2508_v1  ;;  %83 = vst [vmem:[#allocation4 + $0xb8] sm:$0xff] %v2508_v1 }
  0x1d   :  { %84 = vst [vmem:[#allocation4 + $0xc0] sm:$0xff] %v2508_v1  ;;  %85 = vst [vmem:[#allocation4 + $0xc8] sm:$0xff] %v2508_v1 }
  0x1e   :  { %86 = vst [vmem:[#allocation4 + $0xd0] sm:$0xff] %v2508_v1  ;;  %87 = vst [vmem:[#allocation4 + $0xd8] sm:$0xff] %v2508_v1 }
  0x1f   :  { %88 = vst [vmem:[#allocation4 + $0xe0] sm:$0xff] %v2508_v1  ;;  %89 = vst [vmem:[#allocation4 + $0xe8] sm:$0xff] %v2508_v1 }
  0x20   :  { %90 = vst [vmem:[#allocation4 + $0xf0] sm:$0xff] %v2508_v1  ;;  %91 = vst [vmem:[#allocation4 + $0xf8] sm:$0xff] %v2508_v1 }
  0x21   :  { %v1006_v2 = vld [vmem:[%s3734_s2 + $0x8] sm:$0xff]  ;;  %v170_v3 = vld [vmem:[%s3734_s2 + $0x10] sm:$0xff]  ;;  %v3741_v4 = vmov 1   ;;  %v3739_v5 = vmov 0   ;;  %v1009_v6 = vld [vmem:[%s3734_s2 + $0x20] sm:$0xff]  ;;  %vm675_vm1 = vcmask 7168  }
  0x22   :  { %2318 = vset.pattern.permute.xlu0 %v3741_v4  ;;  %2316 = vset.pattern.permute.xlu1 %v3739_v5  ;;  %v171_v7 = vld [vmem:[%s3734_s2 + $0x18] sm:$0xff]  ;;  %v1011_v8 = vld [vmem:[%s3734_s2 + $0x30] sm:$0xff]  ;;  %v173_v9 = vld [vmem:[%s3734_s2 + $0x28] sm:$0xff]  ;;  %vm1506_vm2 = vcmask 15368  }
  0x23   :  { %1029 = vperm.xlu0 %2318, %v1006_v2   ;;  %197 = vperm.xlu1 %2316, %v170_v3   ;;  %v1013_v10 = vld [vmem:[%s3734_s2 + $0x40] sm:$0xff]  ;;  %v175_v11 = vld [vmem:[%s3734_s2 + $0x38] sm:$0xff]  ;;  %v1015_v12 = vld [vmem:[%s3734_s2 + $0x50] sm:$0xff] }
  0x24   :  { %v177_v13 = vld [vmem:[%s3734_s2 + $0x48] sm:$0xff]  ;;  %v1017_v14 = vld [vmem:[%s3734_s2 + $0x60] sm:$0xff]  ;;  %v179_v15 = vld [vmem:[%s3734_s2 + $0x58] sm:$0xff] }
  0x25   :  { %v1019_v16 = vld [vmem:[%s3734_s2 + $0x70] sm:$0xff]  ;;  %v181_v17 = vld [vmem:[%s3734_s2 + $0x68] sm:$0xff]  ;;  %v183_v18 = vld [vmem:[%s3734_s2 + $0x78] sm:$0xff] }
  0x26   :  { %v168_v19 = vld [vmem:[%s3734_s2] sm:$0xff]  ;;  %v101_v40 = vld [vmem:[%s3733_s1 + $0x8] sm:$0xff]  ;;  %v102_v0 = vld [vmem:[%s3733_s1 + $0x10] sm:$0xff] }
  0x27   :  { %1044 = vperm.xlu0 %2318, %v1009_v6   ;;  %202 = vperm.xlu1 %2316, %v171_v7   ;;  %v100_v30 = vld [vmem:[%s3733_s1] sm:$0xff]  ;;  %v108_v48 = vunpack.c.0.s8 %v101_v40  ;;  %v109_v53 = vunpack.c.1.s8 %v101_v40  ;;  %v110_v61 = vunpack.c.2.s8 %v101_v40  ;;  %v111_v1 = vunpack.c.3.s8 %v101_v40 }
  0x28   :  { %v104_v33 = vunpack.c.0.s8 %v100_v30  ;;  %v106_v34 = vunpack.c.2.s8 %v100_v30  ;;  %v2662_v38 = vld [vmem:[%s3735_s3 + $0x2] ss:$0 sm:$0xff]  ;;  %v105_v39 = vunpack.c.1.s8 %v100_v30  ;;  %v107_v42 = vunpack.c.3.s8 %v100_v30 }
  0x29   :  { %v124_v60 = vcvt.s32.f32 %v108_v48 }
  0x2a   :  { %v120_v37 = vcvt.s32.f32 %v104_v33  ;;  %v122_v41 = vcvt.s32.f32 %v106_v34  ;;  %v121_v47 = vcvt.s32.f32 %v105_v39  ;;  %v123_v52 = vcvt.s32.f32 %v107_v42 }
  0x2b   :  { %1054 = vperm.xlu0 %2318, %v1011_v8   ;;  %212 = vperm.xlu1 %2316, %v173_v9  }
  0x2c   :  { %v2180_v45 = vadd.f32 -1.0, %v120_v37  ;;  %v2182_v51 = vadd.f32 -1.0, %v122_v41  ;;  %v2181_v59 = vadd.f32 -1.0, %v121_v47  ;;  %v114_v47 = vunpack.c.2.s8 %v102_v0 }
  0x2e   :  { %v2672_v56 = vmul.f32 1e+30, %v2180_v45 }
  0x2f   :  { %1064 = vperm.xlu0 %2318, %v1013_v10   ;;  %222 = vperm.xlu1 %2316, %v175_v11  }
  0x33   :  { %1074 = vperm.xlu0 %2318, %v1015_v12   ;;  %232 = vperm.xlu1 %2316, %v177_v13  }
  0x37   :  { %1084 = vperm.xlu0 %2318, %v1017_v14   ;;  %242 = vperm.xlu1 %2316, %v179_v15  }
  0x3b   :  { %1094 = vperm.xlu0 %2318, %v1019_v16   ;;  %252 = vperm.xlu1 %2316, %v181_v17  }
  0x3f   :  { %2319 = vset.pattern.permute.xlu0 %v3739_v5  ;;  %262 = vperm.xlu1 %2316, %v183_v18  }
  0x40   :  { %187 = vperm.xlu0 %2319, %v168_v19  }
  0x43   :  { %2317 = vset.pattern.permute.xlu1 %v3741_v4 }
  0x44   :  { %1024 = vperm.xlu1 %2317, %v168_v19   ;;  %192 = vperm.xlu0 %2319, %v1006_v2   ;;  %v127_v19 = vcvt.s32.f32 %v111_v1 }
  0x48   :  { %1034 = vperm.xlu1 %2317, %v170_v3   ;;  %207 = vperm.xlu0 %2319, %v1009_v6   ;;  %v2183_v6 = vadd.f32 -1.0, %v123_v52 }
  0x4a   :  { %v2692_v30 = vmul.f32 1e+30, %v2183_v6 }
  0x4c   :  { %1039 = vperm.xlu1 %2317, %v171_v7   ;;  %217 = vperm.xlu0 %2319, %v1011_v8   ;;  %v125_v7 = vcvt.s32.f32 %v109_v53 }
  0x4e   :  { %v2185_v34 = vadd.f32 -1.0, %v125_v7 }
  0x50   :  { %1049 = vperm.xlu1 %2317, %v173_v9   ;;  %227 = vperm.xlu0 %2319, %v1013_v10   ;;  %v2684_v10 = vmul.f32 1e+30, %v2182_v51  ;;  %v115_v51 = vunpack.c.3.s8 %v102_v0  ;;  %v2716_v53 = vmul.f32 1e+30, %v2185_v34 }
  0x52   :  { %v131_v7 = vcvt.s32.f32 %v115_v51 }
  0x54   :  { %1059 = vperm.xlu1 %2317, %v175_v11   ;;  %237 = vperm.xlu0 %2319, %v1015_v12  }
  0x58   :  { %1069 = vperm.xlu1 %2317, %v177_v13   ;;  %247 = vperm.xlu0 %2319, %v1017_v14   ;;  %v2686_v13 = vmul.f32 1e+30, %v2181_v59  ;;  %v2184_v14 = vadd.f32 -1.0, %v124_v60 }
  0x5c   :  { %1079 = vperm.xlu1 %2317, %v179_v15   ;;  %257 = vperm.xlu0 %2319, %v1019_v16   ;;  %v126_v15 = vcvt.s32.f32 %v110_v61  ;;  %v112_v16 = vunpack.c.0.s8 %v102_v0 }
  0x5e   :  { %v2186_v45 = vadd.f32 -1.0, %v126_v15 }
  0x60   :  { %1089 = vperm.xlu1 %2317, %v181_v17  }
  0x64   :  { %1099 = vperm.xlu1 %2317, %v183_v18  }
  0x68   :  { %2320 = vset.pattern.permute.xlu1 %v3739_v5  ;;  %v3026_v5 = vld [vmem:[#allocation2 + $0x68] sm:$0xff] }
  0xa2   :  { %v2636_v20 = vpop.permute.xlu0 %1029  ;;  %v198_v21 = vpop.permute.xlu1 %197 }
  0xa3   :  { %v271_v43 = vadd.f32 %v2662_v38, %v198_v21  ;;  %v113_v21 = vunpack.c.1.s8 %v102_v0  ;;  %v2726_v0 = vmul.f32 1e+30, %v2186_v45  ;;  %v2191_v45 = vadd.f32 -1.0, %v131_v7 }
  0xa5   :  { %v287_v54 = vmul.f32 0.2, %v271_v43  ;;  %v2773_v7 = vmul.f32 1e+30, %v2191_v45 }
  0xa6   :  { %v2638_v22 = vpop.permute.xlu0 %1044  ;;  %v203_v23 = vpop.permute.xlu1 %202 }
  0xa7   :  { %v272_v50 = vadd.f32 %v2662_v38, %v203_v23  ;;  %v303_v11 = vmax.f32 %v271_v43, %v287_v54  ;;  %v2703_v43 = vmul.f32 1e+30, %v2184_v14 }
  0xa9   :  { %v288_v2 = vmul.f32 0.2, %v272_v50  ;;  %v2701_v41 = vadd.f32 %v303_v11, %v2684_v10 }
  0xaa   :  { %v2640_v24 = vpop.permute.xlu0 %1054  ;;  %v213_v25 = vpop.permute.xlu1 %212 }
  0xab   :  { %v274_v3 = vadd.f32 %v2662_v38, %v213_v25  ;;  %v304_v33 = vmax.f32 %v272_v50, %v288_v2  ;;  %v2711_v50 = vld [vmem:[%s3733_s1 + $0x18] sm:$0xff]  ;;  %v130_v2 = vcvt.s32.f32 %v114_v47 }
  0xac   :  { %v116_v6 = vunpack.c.0.s8 %v2711_v50 }
  0xad   :  { %v290_v23 = vmul.f32 0.2, %v274_v3  ;;  %v2714_v52 = vadd.f32 %v304_v33, %v2692_v30  ;;  %v2190_v33 = vadd.f32 -1.0, %v130_v2 }
  0xae   :  { %v2642_v26 = vpop.permute.xlu0 %1064  ;;  %v223_v27 = vpop.permute.xlu1 %222  ;;  %v132_v34 = vcvt.s32.f32 %v116_v6 }
  0xaf   :  { %v2695_v37 = vadd.f32 %v2662_v38, %v223_v27  ;;  %v306_v54 = vmax.f32 %v274_v3, %v290_v23 }
  0xb2   :  { %v2644_v28 = vpop.permute.xlu0 %1074  ;;  %v2646_v29 = vpop.permute.xlu1 %232 }
  0xb3   :  { %v278_v59 = vadd.f32 %v2662_v38, %v2646_v29 }
  0xb6   :  { %v2651_v31 = vpop.permute.xlu0 %1084  ;;  %v2653_v32 = vpop.permute.xlu1 %242 }
  0xb7   :  { %v280_v11 = vadd.f32 %v2662_v38, %v2653_v32  ;;  %v118_v32 = vunpack.c.2.s8 %v2711_v50 }
  0xb9   :  { %v296_v47 = vmul.f32 0.2, %v280_v11  ;;  %v134_v2 = vcvt.s32.f32 %v118_v32 }
  0xba   :  { %v2655_v35 = vpop.permute.xlu0 %1094  ;;  %v2657_v36 = vpop.permute.xlu1 %252 }
  0xbb   :  { %v2194_v32 = vadd.f32 -1.0, %v134_v2 }
  0xbe   :  { %v2668_v44 = vpop.permute.xlu1 %262 }
  0xbf   :  { %v188_v46 = vpop.permute.xlu0 %187 }
  0xc0   :  { %v269_v49 = vadd.f32 %v2662_v38, %v188_v46  ;;  %v128_v46 = vcvt.s32.f32 %v112_v16  ;;  %v294_v16 = vmul.f32 0.2, %v278_v59 }
  0xc2   :  { %v285_v55 = vmul.f32 0.2, %v269_v49  ;;  %v2188_v1 = vadd.f32 -1.0, %v128_v46 }
  0xc3   :  { %v2674_v57 = vpop.permute.xlu1 %1024  ;;  %v193_v58 = vpop.permute.xlu0 %192 }
  0xc4   :  { %v270_v62 = vadd.f32 %v2662_v38, %v193_v58  ;;  %v301_v63 = vmax.f32 %v269_v49, %v285_v55  ;;  %v129_v49 = vcvt.s32.f32 %v113_v21  ;;  %v2187_v55 = vadd.f32 -1.0, %v127_v19 }
  0xc5   :  { %v292_v58 = vmul.f32 0.2, %v2695_v37  ;;  %v2744_v23 = vmul.f32 1e+30, %v2188_v1  ;;  %v2192_v1 = vadd.f32 -1.0, %v132_v34 }
  0xc6   :  { %v286_v8 = vmul.f32 0.2, %v270_v62  ;;  %v2682_v9 = vadd.f32 %v301_v63, %v2672_v56  ;;  %v2738_v14 = vmul.f32 1e+30, %v2187_v55  ;;  %v2189_v15 = vadd.f32 -1.0, %v129_v49 }
  0xc7   :  { %v208_v12 = vpop.permute.xlu0 %207  ;;  %v2690_v25 = vpop.permute.xlu1 %1034  ;;  %v308_v19 = vmax.f32 %v2695_v37, %v292_v58  ;;  %v282_v37 = vadd.f32 %v2662_v38, %v2657_v36  ;;  %v119_v49 = vunpack.c.3.s8 %v2711_v50  ;;  %v310_v58 = vmax.f32 %v278_v59, %v294_v16 }
  0xc8   :  { %v273_v17 = vadd.f32 %v2662_v38, %v208_v12  ;;  %349 = vmax.xlane.f32.xlu0 %v2682_v9  ;;  %v302_v18 = vmax.f32 %v270_v62, %v286_v8  ;;  %v117_v8 = vunpack.c.1.s8 %v2711_v50  ;;  %v2736_v12 = vadd.f32 %v306_v54, %v2716_v53 }
  0xc9   :  { %v2759_v55 = vadd.f32 %v308_v19, %v2738_v14  ;;  %v2766_v36 = vmul.f32 1e+30, %v2190_v33  ;;  %v284_v16 = vadd.f32 %v2662_v38, %v2668_v44  ;;  %v2783_v34 = vmul.f32 1e+30, %v2192_v1 }
  0xca   :  { %v289_v39 = vmul.f32 0.2, %v273_v17  ;;  %v2698_v40 = vadd.f32 %v302_v18, %v2686_v13  ;;  %v133_v46 = vcvt.s32.f32 %v117_v8  ;;  %v312_v8 = vmax.f32 %v280_v11, %v296_v47 }
  0xcb   :  { %v218_v42 = vpop.permute.xlu0 %217  ;;  %v2724_v62 = vpop.permute.xlu1 %1039  ;;  %v2802_v1 = vmul.f32 1e+30, %v2194_v32 }
  0xcc   :  { %v275_v48 = vadd.f32 %v2662_v38, %v218_v42  ;;  %351 = vmax.xlane.f32.xlu1 %v2698_v40  ;;  %353 = vmax.xlane.f32.xlu0 %v2701_v41  ;;  %v305_v27 = vmax.f32 %v273_v17, %v289_v39 }
  0xce   :  { %v291_v60 = vmul.f32 0.2, %v275_v48  ;;  %v2722_v61 = vadd.f32 %v305_v27, %v2703_v43  ;;  %v2752_v27 = vmul.f32 1e+30, %v2189_v15  ;;  %v135_v15 = vcvt.s32.f32 %v119_v49 }
  0xcf   :  { %v228_v63 = vpop.permute.xlu0 %227 }
  0xd0   :  { %v277_v3 = vadd.f32 %v2662_v38, %v228_v63  ;;  %357 = vmax.xlane.f32.xlu1 %v2722_v61  ;;  %355 = vmax.xlane.f32.xlu0 %v2714_v52  ;;  %v307_v29 = vmax.f32 %v275_v48, %v291_v60  ;;  %v1050_v48 = vpop.permute.xlu1 %1049  ;;  %v2764_v60 = vld [vmem:[%s3735_s3 + $0x3] ss:$0 sm:$0xff]  ;;  %v2195_v49 = vadd.f32 -1.0, %v135_v15 }
  0xd1   :  { %v1106_v50 = vadd.f32 %v2764_v60, %v2674_v57  ;;  %v2781_v57 = vadd.f32 %v310_v58, %v2752_v27  ;;  %v1107_v45 = vadd.f32 %v2764_v60, %v2636_v20  ;;  %v1109_v58 = vadd.f32 %v2764_v60, %v2724_v62 }
  0xd2   :  { %v293_v17 = vmul.f32 0.2, %v277_v3  ;;  %v2741_v18 = vadd.f32 %v307_v29, %v2726_v0  ;;  %v298_v29 = vmul.f32 0.2, %v282_v37  ;;  %v2809_v62 = vmul.f32 1e+30, %v2195_v49 }
  0xd3   :  { %v238_v21 = vpop.permute.xlu0 %237 }
  0xd4   :  { %v279_v39 = vadd.f32 %v2662_v38, %v238_v21  ;;  %361 = vmax.xlane.f32.xlu1 %v2741_v18  ;;  %359 = vmax.xlane.f32.xlu0 %v2736_v12  ;;  %v309_v42 = vmax.f32 %v277_v3, %v293_v17  ;;  %v2193_v3 = vadd.f32 -1.0, %v133_v46  ;;  %v1060_v21 = vpop.permute.xlu1 %1059  ;;  %v2793_v46 = vadd.f32 %v312_v8, %v2773_v7 }
  0xd5   :  { %v314_v47 = vmax.f32 %v282_v37, %v298_v29  ;;  %v1108_v37 = vadd.f32 %v2764_v60, %v2690_v25  ;;  %v1125_v29 = vmul.f32 0.2, %v1109_v58  ;;  %v1111_v8 = vadd.f32 %v2764_v60, %v1050_v48 }
  0xd6   :  { %v295_v51 = vmul.f32 0.2, %v279_v39  ;;  %v2756_v54 = vadd.f32 %v309_v42, %v2744_v23  ;;  %v2788_v11 = vmul.f32 1e+30, %v2193_v3  ;;  %v1110_v25 = vadd.f32 %v2764_v60, %v2638_v22 }
  0xd7   :  { %v248_v63 = vpop.permute.xlu0 %247 }
  0xd8   :  { %v281_v6 = vadd.f32 %v2662_v38, %v248_v63  ;;  %365 = vmax.xlane.f32.xlu1 %v2756_v54  ;;  %363 = vmax.xlane.f32.xlu0 %v2759_v55  ;;  %v311_v59 = vmax.f32 %v279_v39, %v295_v51  ;;  %v1122_v39 = vmul.f32 0.2, %v1106_v50  ;;  %v300_v51 = vmul.f32 0.2, %v284_v16 }
  0xd9   :  { %v2807_v3 = vadd.f32 %v314_v47, %v2788_v11  ;;  %v1126_v47 = vmul.f32 0.2, %v1110_v25 }
  0xda   :  { %v297_v17 = vmul.f32 0.2, %v281_v6  ;;  %v2778_v19 = vadd.f32 %v311_v59, %v2766_v36  ;;  %v1138_v2 = vmax.f32 %v1106_v50, %v1122_v39  ;;  %v1070_v59 = vpop.permute.xlu1 %1069  ;;  %v1127_v39 = vmul.f32 0.2, %v1111_v8 }
  0xdb   :  { %v258_v33 = vpop.permute.xlu0 %257 }
  0xdc   :  { %v283_v42 = vadd.f32 %v2662_v38, %v258_v33  ;;  %369 = vmax.xlane.f32.xlu1 %v2778_v19  ;;  %367 = vmax.xlane.f32.xlu0 %v2781_v57  ;;  %v313_v44 = vmax.f32 %v281_v6, %v297_v17  ;;  %v1123_v6 = vmul.f32 0.2, %v1107_v45  ;;  %v316_v17 = vmax.f32 %v284_v16, %v300_v51 }
  0xdd   :  { %v2818_v50 = vadd.f32 %v1138_v2, %v2672_v56  ;;  %v1124_v33 = vmul.f32 0.2, %v1108_v37  ;;  %v1112_v56 = vadd.f32 %v2764_v60, %v2640_v24  ;;  %v1142_v2 = vmax.f32 %v1110_v25, %v1126_v47 }
  0xde   :  { %v299_v38 = vmul.f32 0.2, %v283_v42  ;;  %v2798_v63 = vadd.f32 %v313_v44, %v2783_v34  ;;  %v1139_v32 = vmax.f32 %v1107_v45, %v1123_v6  ;;  %v2824_v48 = vadd.f32 %v316_v17, %v2809_v62  ;;  %v1080_v16 = vpop.permute.xlu1 %1079 }
  0xdf   :  { %v1141_v44 = vmax.f32 %v1109_v58, %v1125_v29  ;;  %v1140_v45 = vmax.f32 %v1108_v37, %v1124_v33  ;;  %v1143_v58 = vmax.f32 %v1111_v8, %v1127_v39  ;;  %v1117_v37 = vadd.f32 %v2764_v60, %v1080_v16 }
  0xe0   :  { %373 = vmax.xlane.f32.xlu1 %v2798_v63  ;;  %371 = vmax.xlane.f32.xlu0 %v2793_v46  ;;  %v315_v20 = vmax.f32 %v283_v42, %v299_v38  ;;  %v1113_v42 = vadd.f32 %v2764_v60, %v1060_v21  ;;  %3778 = vst [vmem:[#allocation7_spill] sm:$0xff] %v2824_v48  ;;  %v1128_v38 = vmul.f32 0.2, %v1112_v56 }
  0xe1   :  { %v2831_v22 = vadd.f32 %v1139_v32, %v2686_v13  ;;  %v1115_v21 = vadd.f32 %v2764_v60, %v1070_v59  ;;  %v2835_v51 = vadd.f32 %v1141_v44, %v2692_v30  ;;  %v2842_v13 = vadd.f32 %v1140_v45, %v2684_v10 }
  0xe2   :  { %v2813_v15 = vadd.f32 %v315_v20, %v2802_v1  ;;  %v1129_v49 = vmul.f32 0.2, %v1113_v42  ;;  %v1114_v20 = vadd.f32 %v2764_v60, %v2642_v26  ;;  %v1090_v24 = vpop.permute.xlu1 %1089  ;;  %v2846_v30 = vadd.f32 %v1143_v58, %v2716_v53 }
  0xe3   :  { %v1131_v6 = vmul.f32 0.2, %v1115_v21  ;;  %v1116_v26 = vadd.f32 %v2764_v60, %v2644_v28  ;;  %v2853_v8 = vadd.f32 %v1142_v2, %v2703_v43  ;;  %v1144_v10 = vmax.f32 %v1112_v56, %v1128_v38 }
  0xe4   :  { %377 = vmax.xlane.f32.xlu1 %v2813_v15  ;;  %375 = vmax.xlane.f32.xlu0 %v2807_v3  ;;  %3779 = vst [vmem:[#allocation8_spill] sm:$0xff] %v2846_v30  ;;  %v1145_v59 = vmax.f32 %v1113_v42, %v1129_v49  ;;  %v1130_v29 = vmul.f32 0.2, %v1114_v20  ;;  %v1133_v17 = vmul.f32 0.2, %v1117_v37  ;;  %v1119_v25 = vadd.f32 %v2764_v60, %v1090_v24 }
  0xe5   :  { %3780 = vst [vmem:[#allocation9_spill] sm:$0xff] %v2853_v8  ;;  %v1147_v53 = vmax.f32 %v1115_v21, %v1131_v6  ;;  %v1132_v39 = vmul.f32 0.2, %v1116_v26  ;;  %v1118_v28 = vadd.f32 %v2764_v60, %v2651_v31  ;;  %v2864_v43 = vadd.f32 %v1144_v10, %v2726_v0  ;;  %v2913_v6 = vld [vmem:[#allocation2 + $0x8] sm:$0xff] }
  0xe6   :  { %v2857_v33 = vadd.f32 %v1145_v59, %v2738_v14  ;;  %v1100_v32 = vpop.permute.xlu1 %1099  ;;  %v1146_v42 = vmax.f32 %v1114_v20, %v1130_v29  ;;  %v1135_v44 = vmul.f32 0.2, %v1119_v25  ;;  %v1149_v47 = vmax.f32 %v1117_v37, %v1133_v17  ;;  %v2915_v37 = vld [vmem:[#allocation2 + $0x10] sm:$0xff]  ;;  %v2329_v59 = vld [vmem:[%s3736_s4 + $0x20] ss:$8 sps:$4 sm:$0xff]  }
  0xe7   :  { %3782 = vst [vmem:[#allocation11_spill] sm:$0xff] %v2864_v43  ;;  %v1121_v16 = vadd.f32 %v2764_v60, %v1100_v32  ;;  %v2868_v14 = vadd.f32 %v1147_v53, %v2752_v27  ;;  %v1134_v56 = vmul.f32 0.2, %v1118_v28  ;;  %v1148_v31 = vmax.f32 %v1116_v26, %v1132_v39  ;;  %v2931_v53 = vld [vmem:[#allocation2 + $0x18] sm:$0xff] }
  0xe8   :  { %1186 = vmax.xlane.f32.xlu1 %v2818_v50  ;;  %379 = vmax.xlane.f32.xlu0 %v2824_v48  ;;  %3781 = vst [vmem:[#allocation10_spill] sm:$0xff] %v2857_v33  ;;  %v2873_v45 = vadd.f32 %v1146_v42, %v2744_v23  ;;  %v1120_v0 = vadd.f32 %v2764_v60, %v2655_v35  ;;  %v2330_v32 = vld [vmem:[%s3736_s4 + $0x30] ss:$8 sps:$4 sm:$0xff]  }
  0xe9   :  { %3783 = vst [vmem:[#allocation12_spill] sm:$0xff] %v2868_v14  ;;  %v1137_v49 = vmul.f32 0.2, %v1121_v16  ;;  %v2878_v21 = vadd.f32 %v1149_v47, %v2773_v7  ;;  %v1151_v58 = vmax.f32 %v1119_v25, %v1135_v44  ;;  %v2883_v27 = vadd.f32 %v1148_v31, %v2766_v36  ;;  %v2929_v25 = vld [vmem:[#allocation2 + $0x20] sm:$0xff]  ;;  %v2950_v47 = vld [vmem:[#allocation2 + $0x28] sm:$0xff] }
  0xea   :  { %3784 = vst [vmem:[#allocation13_spill] sm:$0xff] %v2873_v45  ;;  %v1136_v38 = vmul.f32 0.2, %v1120_v0  ;;  %v1150_v24 = vmax.f32 %v1118_v28, %v1134_v56  ;;  %v2331_v56 = vld [vmem:[%s3736_s4 + $0x40] ss:$8 sps:$4 sm:$0xff]  }
  0xeb   :  { %3785 = vst [vmem:[#allocation14_spill] sm:$0xff] %v2878_v21  ;;  %3786 = vst [vmem:[#allocation15_spill] sm:$0xff] %v2883_v27  ;;  %v2886_v23 = vadd.f32 %v1151_v58, %v2788_v11  ;;  %v1153_v20 = vmax.f32 %v1121_v16, %v1137_v49  ;;  %v2327_v11 = vld [vmem:[%s3736_s4] ss:$8 sps:$4 sm:$0xff]   ;;  %v2948_v16 = vld [vmem:[#allocation2 + $0x30] sm:$0xff] }
  0xec   :  { %1192 = vmax.xlane.f32.xlu1 %v2835_v51  ;;  %1188 = vmax.xlane.f32.xlu0 %v2831_v22  ;;  %v2894_v60 = vadd.f32 %v1150_v24, %v2783_v34  ;;  %v1152_v7 = vmax.f32 %v1120_v0, %v1136_v38  ;;  %v2908_v34 = vld [vmem:[#allocation2] sm:$0xff]  ;;  %v2332_v24 = vld [vmem:[%s3736_s4 + $0x50] ss:$8 sps:$4 sm:$0xff]  }
  0xed   :  { %3787 = vst [vmem:[#allocation16_spill] sm:$0xff] %v2886_v23  ;;  %v2891_v35 = vadd.f32 %v1153_v20, %v2809_v62  ;;  %v2328_v62 = vld [vmem:[%s3736_s4 + $0x10] ss:$8 sps:$4 sm:$0xff]   ;;  %2246 = vmatprep.subr.bf16.mxu0 %v2327_v11  ;;  %v2967_v38 = vld [vmem:[#allocation2 + $0x40] sm:$0xff] }
  0xee   :  { %3789 = vst [vmem:[#allocation18_spill] sm:$0xff] %v2894_v60  ;;  %v2899_v36 = vadd.f32 %v1152_v7, %v2802_v1  ;;  %2247 = vmatpush3.bf16.msra.mxu0 %v2327_v11  ;;  %v2969_v20 = vld [vmem:[#allocation2 + $0x38] sm:$0xff] }
  0xef   :  { %3788 = vst [vmem:[#allocation17_spill] sm:$0xff] %v2891_v35  ;;  %2248 = vmatprep.subr.bf16.mxu0 %v2328_v62 }
  0xf0   :  { %1196 = vmax.xlane.f32.xlu1 %v2846_v30  ;;  %1190 = vmax.xlane.f32.xlu0 %v2842_v13  ;;  %3790 = vst [vmem:[#allocation19_spill] sm:$0xff] %v2899_v36 }
  0xf2   :  { %2249 = vmatpush3.bf16.msra.mxu0 %v2328_v62 }
  0xf3   :  { %2250 = vmatprep.subr.bf16.mxu0 %v2329_v59 }
  0xf4   :  { %1200 = vmax.xlane.f32.xlu1 %v2857_v33  ;;  %1194 = vmax.xlane.f32.xlu0 %v2853_v8 }
  0xf6   :  { %2251 = vmatpush3.bf16.msra.mxu0 %v2329_v59  ;;  %v2986_v59 = vld [vmem:[#allocation2 + $0x50] sm:$0xff] }
  0xf7   :  { %2252 = vmatprep.subr.bf16.mxu0 %v2330_v32 }
  0xf8   :  { %1204 = vmax.xlane.f32.xlu1 %v2868_v14  ;;  %1198 = vmax.xlane.f32.xlu0 %v2864_v43 }
  0xfa   :  { %2253 = vmatpush3.bf16.msra.mxu0 %v2330_v32 }
  0xfb   :  { %2254 = vmatprep.subr.bf16.mxu0 %v2331_v56 }
  0xfc   :  { %1208 = vmax.xlane.f32.xlu1 %v2878_v21  ;;  %1202 = vmax.xlane.f32.xlu0 %v2873_v45 }
  0xfe   :  { %2255 = vmatpush3.bf16.msra.mxu0 %v2331_v56 }
  0xff   :  { %2256 = vmatprep.subr.bf16.mxu0 %v2332_v24 }
 0x100   :  { %1212 = vmax.xlane.f32.xlu1 %v2886_v23  ;;  %1206 = vmax.xlane.f32.xlu0 %v2883_v27  ;;  %v3793_v27 = vmov 1  }
 0x102   :  { %2257 = vmatpush3.bf16.msra.mxu0 %v2332_v24  ;;  %v2334_v24 = vld [vmem:[%s3736_s4 + $0x70] ss:$8 sps:$4 sm:$0xff]  }
 0x104   :  { %1216 = vmax.xlane.f32.xlu1 %v2891_v35  ;;  %1210 = vmax.xlane.f32.xlu0 %v2894_v60 }
 0x108   :  { %1214 = vmax.xlane.f32.xlu0 %v2899_v36  ;;  %v3040_v36 = vld [vmem:[#allocation2 + $0x78] sm:$0xff] }
 0x155   :  { %v350_v2 = vpop.xlane.xlu0 %349 }
 0x156   :  { %v2911_v1 = vmax.f32 %v2908_v34, %v350_v2 }
 0x158   :  { %989 = vst.msk [vmem:[#allocation2] sm:$0xff] %vm675_vm1, %v2911_v1  ;;  %399 = vperm.xlu1 %2320, %v2911_v1  }
 0x159   :  { %v352_v29 = vpop.xlane.xlu1 %351  ;;  %v354_v26 = vpop.xlane.xlu0 %353 }
 0x15a   :  { %v2924_v10 = vmax.f32 %v2913_v6, %v352_v29  ;;  %v2927_v17 = vmax.f32 %v2915_v37, %v354_v26  ;;  %v2988_v29 = vld [vmem:[#allocation2 + $0x48] sm:$0xff] }
 0x15b   :  { %v2333_v26 = vld [vmem:[%s3736_s4 + $0x60] ss:$8 sps:$4 sm:$0xff]  }
 0x15c   :  { %990 = vst.msk [vmem:[#allocation2 + $0x8] sm:$0xff] %vm675_vm1, %v2924_v10  ;;  %991 = vst.msk [vmem:[#allocation2 + $0x10] sm:$0xff] %vm675_vm1, %v2927_v17  ;;  %404 = vperm.xlu0 %2319, %v2924_v10   ;;  %409 = vperm.xlu1 %2320, %v2927_v17  }
 0x15d   :  { %v358_v39 = vpop.xlane.xlu1 %357  ;;  %v356_v28 = vpop.xlane.xlu0 %355  ;;  %2258 = vmatprep.subr.bf16.mxu0 %v2333_v26 }
 0x15e   :  { %v2943_v42 = vmax.f32 %v2929_v25, %v358_v39  ;;  %v2946_v44 = vmax.f32 %v2931_v53, %v356_v28  ;;  %2259 = vmatpush3.bf16.msra.mxu0 %v2333_v26 }
 0x15f   :  { %2260 = vmatprep.subr.bf16.mxu0 %v2334_v24 }
 0x160   :  { %993 = vst.msk [vmem:[#allocation2 + $0x20] sm:$0xff] %vm675_vm1, %v2943_v42  ;;  %992 = vst.msk [vmem:[#allocation2 + $0x18] sm:$0xff] %vm675_vm1, %v2946_v44  ;;  %419 = vperm.xlu0 %2319, %v2943_v42   ;;  %414 = vperm.xlu1 %2320, %v2946_v44  }
 0x161   :  { %v362_v31 = vpop.xlane.xlu1 %361  ;;  %v360_v0 = vpop.xlane.xlu0 %359 }
 0x162   :  { %v2962_v49 = vmax.f32 %v2948_v16, %v362_v31  ;;  %v2965_v58 = vmax.f32 %v2950_v47, %v360_v0  ;;  %v3005_v31 = vld [vmem:[#allocation2 + $0x60] sm:$0xff]  ;;  %v3007_v0 = vld [vmem:[#allocation2 + $0x58] sm:$0xff]  ;;  %2261 = vmatpush3.bf16.msra.mxu0 %v2334_v24 }
 0x163   :  { %v2335_v24 = vld [vmem:[%s3736_s4 + $0x4] ss:$8 sps:$4 sm:$0xff]   ;;  %v3095_v43 = vld [vmem:[#allocation2 + $0x10] sm:$0xff] }
 0x164   :  { %995 = vst.msk [vmem:[#allocation2 + $0x30] sm:$0xff] %vm675_vm1, %v2962_v49  ;;  %994 = vst.msk [vmem:[#allocation2 + $0x28] sm:$0xff] %vm675_vm1, %v2965_v58  ;;  %429 = vperm.xlu0 %2319, %v2962_v49   ;;  %424 = vperm.xlu1 %2320, %v2965_v58  }
 0x165   :  { %v366_v7 = vpop.xlane.xlu1 %365  ;;  %v364_v11 = vpop.xlane.xlu0 %363  ;;  %2278 = vmatprep.subr.bf16.mxu1 %v2335_v24  ;;  %3798 = vst [vmem:[#allocation26_spill] sm:$0xff] %v3095_v43 }
 0x166   :  { %v2981_v62 = vmax.f32 %v2967_v38, %v366_v7  ;;  %v2984_v2 = vmax.f32 %v2969_v20, %v364_v11  ;;  %2279 = vmatpush3.bf16.msra.mxu1 %v2335_v24  ;;  %v3073_v24 = vld [vmem:[#allocation2 + $0x8] sm:$0xff] }
 0x167   :  { %v3070_v14 = vld [vmem:[#allocation2 + $0x18] sm:$0xff]  ;;  %3795 = vst [vmem:[#allocation23_spill] sm:$0xff] %v3073_v24  ;;  %v3117_v30 = vld [vmem:[#allocation2 + $0x20] sm:$0xff] }
 0x168   :  { %997 = vst.msk [vmem:[#allocation2 + $0x40] sm:$0xff] %vm675_vm1, %v2981_v62  ;;  %996 = vst.msk [vmem:[#allocation2 + $0x38] sm:$0xff] %vm675_vm1, %v2984_v2  ;;  %439 = vperm.xlu0 %2319, %v2981_v62   ;;  %434 = vperm.xlu1 %2320, %v2984_v2  }
 0x169   :  { %v370_v32 = vpop.xlane.xlu1 %369  ;;  %v368_v39 = vpop.xlane.xlu0 %367  ;;  %3794 = vst [vmem:[#allocation22_spill] sm:$0xff] %v3070_v14  ;;  %3802 = vst [vmem:[#allocation30_spill] sm:$0xff] %v3117_v30 }
 0x16a   :  { %v3000_v28 = vmax.f32 %v2986_v59, %v370_v32  ;;  %v3003_v56 = vmax.f32 %v2988_v29, %v368_v39  ;;  %v3024_v39 = vld [vmem:[#allocation2 + $0x70] sm:$0xff] }
 0x16c   :  { %999 = vst.msk [vmem:[#allocation2 + $0x50] sm:$0xff] %vm675_vm1, %v3000_v28  ;;  %998 = vst.msk [vmem:[#allocation2 + $0x48] sm:$0xff] %vm675_vm1, %v3003_v56  ;;  %449 = vperm.xlu0 %2319, %v3000_v28   ;;  %444 = vperm.xlu1 %2320, %v3003_v56  }
 0x16d   :  { %v374_v7 = vpop.xlane.xlu1 %373  ;;  %v372_v11 = vpop.xlane.xlu0 %371 }
 0x16e   :  { %v3019_v32 = vmax.f32 %v3005_v31, %v374_v7  ;;  %v3022_v26 = vmax.f32 %v3007_v0, %v372_v11 }
 0x170   :  { %1001 = vst.msk [vmem:[#allocation2 + $0x60] sm:$0xff] %vm675_vm1, %v3019_v32  ;;  %1000 = vst.msk [vmem:[#allocation2 + $0x58] sm:$0xff] %vm675_vm1, %v3022_v26  ;;  %459 = vperm.xlu1 %2320, %v3019_v32   ;;  %454 = vperm.xlu0 %2319, %v3022_v26  }
 0x171   :  { %v378_v7 = vpop.xlane.xlu1 %377  ;;  %v376_v4 = vpop.xlane.xlu0 %375 }
 0x172   :  { %v3035_v11 = vmax.f32 %v3024_v39, %v378_v7  ;;  %v3038_v35 = vmax.f32 %v3026_v5, %v376_v4  ;;  %v3051_v4 = vld [vmem:[#allocation2] sm:$0xff] }
 0x173   :  { %3791 = vst [vmem:[#allocation20_spill] sm:$0xff] %v3051_v4 }
 0x174   :  { %1003 = vst.msk [vmem:[#allocation2 + $0x70] sm:$0xff] %vm675_vm1, %v3035_v11  ;;  %1002 = vst.msk [vmem:[#allocation2 + $0x68] sm:$0xff] %vm675_vm1, %v3038_v35  ;;  %469 = vperm.xlu1 %2320, %v3035_v11   ;;  %464 = vperm.xlu0 %2319, %v3038_v35  }
 0x175   :  { %v1187_v7 = vpop.xlane.xlu1 %1186  ;;  %v380_v48 = vpop.xlane.xlu0 %379 }
 0x176   :  { %v3054_v23 = vmax.f32 %v3051_v4, %v1187_v7  ;;  %v3057_v60 = vmax.f32 %v3040_v36, %v380_v48  ;;  %v2336_v48 = vld [vmem:[%s3736_s4 + $0x14] ss:$8 sps:$4 sm:$0xff]  }
 0x177   :  { %2280 = vmatprep.subr.bf16.mxu1 %v2336_v48 }
 0x178   :  { %3792 = vst [vmem:[#allocation21_spill] sm:$0xff] %v3054_v23  ;;  %1821 = vst.msk [vmem:[#allocation2] sm:$0xff] %vm1506_vm2, %v3054_v23  ;;  %2321 = vset.pattern.permute.xlu1 %v3793_v27  ;;  %2322 = vset.pattern.permute.xlu0 %v3793_v27 }
 0x179   :  { %1004 = vst.msk [vmem:[#allocation2 + $0x78] sm:$0xff] %vm675_vm1, %v3057_v60  ;;  %v1193_v7 = vpop.xlane.xlu1 %1192  ;;  %1236 = vperm.xlu1 %2321, %v3054_v23   ;;  %v1189_v21 = vpop.xlane.xlu0 %1188  ;;  %2281 = vmatpush3.bf16.msra.mxu1 %v2336_v48  ;;  %v3093_v48 = vld [vmem:[#allocation2 + $0x28] sm:$0xff] }
 0x17a   :  { %v3076_v4 = vmax.f32 %v3070_v14, %v1193_v7  ;;  %v3079_v45 = vmax.f32 %v3073_v24, %v1189_v21  ;;  %v2337_v21 = vld [vmem:[%s3736_s4 + $0x24] ss:$8 sps:$4 sm:$0xff]   ;;  %3797 = vst [vmem:[#allocation25_spill] sm:$0xff] %v3093_v48 }
 0x17b   :  { %2282 = vmatprep.subr.bf16.mxu1 %v2337_v21 }
 0x17c   :  { %3796 = vst [vmem:[#allocation24_spill] sm:$0xff] %v3079_v45  ;;  %1824 = vst.msk [vmem:[#allocation2 + $0x18] sm:$0xff] %vm1506_vm2, %v3076_v4  ;;  %1241 = vperm.xlu0 %2322, %v3079_v45  }
 0x17d   :  { %1822 = vst.msk [vmem:[#allocation2 + $0x8] sm:$0xff] %vm1506_vm2, %v3079_v45  ;;  %v1197_v7 = vpop.xlane.xlu1 %1196  ;;  %v1191_v33 = vpop.xlane.xlu0 %1190  ;;  %2283 = vmatpush3.bf16.msra.mxu1 %v2337_v21  ;;  %v3115_v21 = vld [vmem:[#allocation2 + $0x38] sm:$0xff] }
 0x17e   :  { %v3098_v14 = vmax.f32 %v3093_v48, %v1197_v7  ;;  %v3101_v23 = vmax.f32 %v3095_v43, %v1191_v33  ;;  %v2338_v33 = vld [vmem:[%s3736_s4 + $0x34] ss:$8 sps:$4 sm:$0xff]   ;;  %3801 = vst [vmem:[#allocation29_spill] sm:$0xff] %v3115_v21 }
 0x17f   :  { %2284 = vmatprep.subr.bf16.mxu1 %v2338_v33 }
 0x180   :  { %3799 = vst [vmem:[#allocation27_spill] sm:$0xff] %v3098_v14  ;;  %3800 = vst [vmem:[#allocation28_spill] sm:$0xff] %v3101_v23  ;;  %1246 = vperm.xlu1 %2321, %v3101_v23  }
 0x181   :  { %1826 = vst.msk [vmem:[#allocation2 + $0x28] sm:$0xff] %vm1506_vm2, %v3098_v14  ;;  %1823 = vst.msk [vmem:[#allocation2 + $0x10] sm:$0xff] %vm1506_vm2, %v3101_v23  ;;  %v1201_v7 = vpop.xlane.xlu1 %1200  ;;  %v1195_v45 = vpop.xlane.xlu0 %1194  ;;  %2285 = vmatpush3.bf16.msra.mxu1 %v2338_v33  ;;  %v3140_v23 = vld [vmem:[#allocation2 + $0x30] sm:$0xff] }
 0x182   :  { %v3120_v48 = vmax.f32 %v3115_v21, %v1201_v7  ;;  %v3123_v24 = vmax.f32 %v3117_v30, %v1195_v45  ;;  %v2339_v45 = vld [vmem:[%s3736_s4 + $0x44] ss:$8 sps:$4 sm:$0xff]   ;;  %3806 = vst [vmem:[#allocation34_spill] sm:$0xff] %v3140_v23 }
 0x183   :  { %v3138_v7 = vld [vmem:[#allocation2 + $0x48] sm:$0xff]  ;;  %2286 = vmatprep.subr.bf16.mxu1 %v2339_v45 }
 0x184   :  { %3803 = vst [vmem:[#allocation31_spill] sm:$0xff] %v3120_v48  ;;  %3804 = vst [vmem:[#allocation32_spill] sm:$0xff] %v3123_v24  ;;  %1251 = vperm.xlu1 %2321, %v3076_v4   ;;  %1256 = vperm.xlu0 %2322, %v3123_v24  }
 0x185   :  { %1828 = vst.msk [vmem:[#allocation2 + $0x38] sm:$0xff] %vm1506_vm2, %v3120_v48  ;;  %1825 = vst.msk [vmem:[#allocation2 + $0x20] sm:$0xff] %vm1506_vm2, %v3123_v24  ;;  %v1205_v33 = vpop.xlane.xlu1 %1204  ;;  %v1199_v21 = vpop.xlane.xlu0 %1198  ;;  %2287 = vmatpush3.bf16.msra.mxu1 %v2339_v45  ;;  %v526_v45 = vsub.f32 %v2913_v6, %v2924_v10  ;;  %v3163_v24 = vld [vmem:[#allocation2 + $0x58] sm:$0xff]  ;;  %v529_v6 = vsub.f32 %v2929_v25, %v2943_v42  ;;  %v525_v42 = vsub.f32 %v2908_v34, %v2911_v1 }
 0x186   :  { %3805 = vst [vmem:[#allocation33_spill] sm:$0xff] %v3138_v7  ;;  %v3143_v8 = vmax.f32 %v3138_v7, %v1205_v33  ;;  %v3146_v43 = vmax.f32 %v3140_v23, %v1199_v21  ;;  %v2340_v21 = vld [vmem:[%s3736_s4 + $0x54] ss:$8 sps:$4 sm:$0xff]   ;;  %3808 = vst [vmem:[#allocation36_spill] sm:$0xff] %v3163_v24  ;;  %v3165_v7 = vld [vmem:[#allocation2 + $0x40] sm:$0xff] }
 0x187   :  { %3809 = vst [vmem:[#allocation37_spill] sm:$0xff] %v3165_v7  ;;  %2288 = vmatprep.subr.bf16.mxu1 %v2340_v21  ;;  %v543_v10 = vmul.f32 1.442695, %v526_v45  ;;  %v2342_v25 = vld [vmem:[%s3736_s4 + $0x74] ss:$8 sps:$4 sm:$0xff]  }
 0x188   :  { %3807 = vst [vmem:[#allocation35_spill] sm:$0xff] %v3146_v43  ;;  %1830 = vst.msk [vmem:[#allocation2 + $0x48] sm:$0xff] %vm1506_vm2, %v3143_v8  ;;  %1261 = vperm.xlu1 %2321, %v3098_v14   ;;  %1266 = vperm.xlu0 %2322, %v3146_v43   ;;  %v549_v45 = vmul.f32 1.442695, %v529_v6 }
 0x189   :  { %1827 = vst.msk [vmem:[#allocation2 + $0x30] sm:$0xff] %vm1506_vm2, %v3146_v43  ;;  %v1209_v33 = vpop.xlane.xlu1 %1208  ;;  %v1203_v30 = vpop.xlane.xlu0 %1202  ;;  %2289 = vmatpush3.bf16.msra.mxu1 %v2340_v21  ;;  %v3188_v43 = vld [vmem:[#allocation2 + $0x50] sm:$0xff]  ;;  %2343 = vpow2.f32 %v543_v10 }
 0x18a   :  { %v3168_v23 = vmax.f32 %v3163_v24, %v1209_v33  ;;  %v3171_v14 = vmax.f32 %v3165_v7, %v1203_v30  ;;  %v2341_v30 = vld [vmem:[%s3736_s4 + $0x64] ss:$8 sps:$4 sm:$0xff]   ;;  %3812 = vst [vmem:[#allocation40_spill] sm:$0xff] %v3188_v43  ;;  %2345 = vpow2.f32 %v549_v45 }
 0x18b   :  { %v3186_v33 = vld [vmem:[#allocation2 + $0x68] sm:$0xff]  ;;  %2290 = vmatprep.subr.bf16.mxu1 %v2341_v30 }
 0x18c   :  { %3810 = vst [vmem:[#allocation38_spill] sm:$0xff] %v3171_v14  ;;  %1832 = vst.msk [vmem:[#allocation2 + $0x58] sm:$0xff] %vm1506_vm2, %v3168_v23  ;;  %1271 = vperm.xlu1 %2321, %v3120_v48   ;;  %1276 = vperm.xlu0 %2322, %v3171_v14  }
 0x18d   :  { %1829 = vst.msk [vmem:[#allocation2 + $0x40] sm:$0xff] %vm1506_vm2, %v3171_v14  ;;  %v1213_v21 = vpop.xlane.xlu1 %1212  ;;  %3811 = vst [vmem:[#allocation39_spill] sm:$0xff] %v3186_v33  ;;  %v1207_v24 = vpop.xlane.xlu0 %1206  ;;  %2291 = vmatpush3.bf16.msra.mxu1 %v2341_v30  ;;  %v3213_v30 = vld [vmem:[#allocation2 + $0x78] sm:$0xff] }
 0x18e   :  { %v3193_v7 = vmax.f32 %v3186_v33, %v1213_v21  ;;  %v3196_v48 = vmax.f32 %v3188_v43, %v1207_v24  ;;  %v3215_v21 = vld [vmem:[#allocation2 + $0x60] sm:$0xff]  ;;  %v531_v43 = vsub.f32 %v2948_v16, %v2962_v49  ;;  %2292 = vmatprep.subr.bf16.mxu1 %v2342_v25  ;;  %v527_v16 = vsub.f32 %v2915_v37, %v2927_v17  ;;  %v3237_v49 = vld [vmem:[#allocation2 + $0x70] sm:$0xff] }
 0x18f   :  { %v3814_v37 = vmov 0  }
 0x190   :  { %3813 = vst [vmem:[#allocation41_spill] sm:$0xff] %v3196_v48  ;;  %1834 = vst.msk [vmem:[#allocation2 + $0x68] sm:$0xff] %vm1506_vm2, %v3193_v7  ;;  %1281 = vperm.xlu1 %2321, %v3143_v8   ;;  %1286 = vperm.xlu0 %2322, %v3196_v48   ;;  %v553_v10 = vmul.f32 1.442695, %v531_v43  ;;  %v545_v17 = vmul.f32 1.442695, %v527_v16  ;;  %v528_v43 = vsub.f32 %v2931_v53, %v2946_v44 }
 0x191   :  { %1831 = vst.msk [vmem:[#allocation2 + $0x50] sm:$0xff] %vm1506_vm2, %v3196_v48  ;;  %v1217_v24 = vpop.xlane.xlu1 %1216  ;;  %v1211_v14 = vpop.xlane.xlu0 %1210  ;;  %2293 = vmatpush3.bf16.msra.mxu1 %v2342_v25  ;;  %v533_v25 = vsub.f32 %v2967_v38, %v2981_v62  ;;  %v535_v62 = vsub.f32 %v2986_v59, %v3000_v28  ;;  %v537_v44 = vsub.f32 %v3005_v31, %v3019_v32 }
 0x192   :  { %v3220_v48 = vmax.f32 %v3213_v30, %v1217_v24  ;;  %v3223_v33 = vmax.f32 %v3215_v21, %v1211_v14  ;;  %v541_v14 = vmul.f32 1.442695, %v525_v42  ;;  %v547_v42 = vmul.f32 1.442695, %v528_v43 }
 0x193   :  { %v557_v38 = vmul.f32 1.442695, %v533_v25  ;;  %v3255_v45 = vpop.eup %2343  ;;  %v561_v53 = vmul.f32 1.442695, %v535_v62  ;;  %v532_v28 = vsub.f32 %v2969_v20, %v2984_v2  ;;  %v534_v20 = vsub.f32 %v2988_v29, %v3003_v56 }
 0x194   :  { %v1377_v34 = vsub.f32 %v3213_v30, %v3220_v48  ;;  %1836 = vst.msk [vmem:[#allocation2 + $0x78] sm:$0xff] %vm1506_vm2, %v3220_v48  ;;  %1833 = vst.msk [vmem:[#allocation2 + $0x60] sm:$0xff] %vm1506_vm2, %v3223_v33  ;;  %1291 = vperm.xlu1 %2321, %v3168_v23   ;;  %1296 = vperm.xlu0 %2322, %v3223_v33   ;;  %2347 = vpow2.f32 %v541_v14  ;;  %v530_v14 = vsub.f32 %v2950_v47, %v2965_v58  ;;  %v3263_v16 = vpop.eup %2345 }
 0x195   :  { %v1215_v6 = vpop.xlane.xlu0 %1214  ;;  %2349 = vpow2.f32 %v553_v10  ;;  %v565_v47 = vmul.f32 1.442695, %v537_v44  ;;  %v539_v58 = vsub.f32 %v3024_v39, %v3035_v11  ;;  %v555_v31 = vmul.f32 1.442695, %v532_v28 }
 0x196   :  { %v3242_v24 = vmax.f32 %v3237_v49, %v1215_v6  ;;  %2351 = vpow2.f32 %v545_v17  ;;  %v551_v59 = vmul.f32 1.442695, %v530_v14  ;;  %v559_v11 = vmul.f32 1.442695, %v534_v20 }
 0x197   :  { %2353 = vpow2.f32 %v557_v38  ;;  %v569_v2 = vmul.f32 1.442695, %v539_v58  ;;  %v536_v25 = vsub.f32 %v3007_v0, %v3022_v26  ;;  %v538_v56 = vsub.f32 %v3026_v5, %v3038_v35 }
 0x198   :  { %v1376_v1 = vsub.f32 %v3237_v49, %v3242_v24  ;;  %1835 = vst.msk [vmem:[#allocation2 + $0x70] sm:$0xff] %vm1506_vm2, %v3242_v24  ;;  %1301 = vperm.xlu1 %2321, %v3193_v7   ;;  %2323 = vset.pattern.permute.xlu0 %v3814_v37  ;;  %2355 = vpow2.f32 %v547_v42  ;;  %v540_v26 = vsub.f32 %v3040_v36, %v3057_v60 }
 0x199   :  { %474 = vperm.xlu0 %2323, %v3057_v60   ;;  %2357 = vpow2.f32 %v561_v53  ;;  %v563_v29 = vmul.f32 1.442695, %v536_v25  ;;  %v567_v0 = vmul.f32 1.442695, %v538_v56 }
 0x19a   :  { %2359 = vpow2.f32 %v551_v59  ;;  %v571_v5 = vmul.f32 1.442695, %v540_v26 }
 0x19b   :  { %2361 = vpow2.f32 %v565_v47 }
 0x19c   :  { %1306 = vperm.xlu1 %2321, %v3242_v24   ;;  %2363 = vpow2.f32 %v555_v31 }
 0x19d   :  { %715 = vperm.xlu0 %2323, %v3255_v45   ;;  %2365 = vpow2.f32 %v569_v2 }
 0x19e   :  { %v3271_v6 = vpop.eup %2347  ;;  %2367 = vpow2.f32 %v559_v11 }
 0x19f   :  { %v3273_v10 = vpop.eup %2349  ;;  %2369 = vpow2.f32 %v563_v29 }
 0x1a0   :  { %1311 = vperm.xlu1 %2321, %v3220_v48   ;;  %v3280_v32 = vpop.eup %2351  ;;  %2371 = vpow2.f32 %v567_v0  ;;  %v1406_v48 = vmul.f32 1.442695, %v1376_v1 }
 0x1a1   :  { %730 = vperm.xlu0 %2323, %v3263_v16   ;;  %v3282_v39 = vpop.eup %2353  ;;  %2373 = vpow2.f32 %v571_v5 }
 0x1a4   :  { %2324 = vset.pattern.permute.xlu1 %v3814_v37  ;;  %v3288_v37 = vpop.eup %2355 }
 0x1a5   :  { %740 = vperm.xlu0 %2323, %v3273_v10   ;;  %710 = vperm.xlu1 %2324, %v3271_v6   ;;  %v3290_v17 = vpop.eup %2357 }
 0x1a6   :  { %v3296_v43 = vpop.eup %2359 }
 0x1a7   :  { %v3298_v38 = vpop.eup %2361 }
 0x1a8   :  { %v3304_v62 = vpop.eup %2363 }
 0x1a9   :  { %750 = vperm.xlu0 %2323, %v3282_v39   ;;  %720 = vperm.xlu1 %2324, %v3280_v32   ;;  %v3306_v42 = vpop.eup %2365 }
 0x1aa   :  { %v3310_v35 = vpop.eup %2367 }
 0x1ab   :  { %v3314_v14 = vpop.eup %2369 }
 0x1ac   :  { %v3317_v60 = vpop.eup %2371 }
 0x1ad   :  { %760 = vperm.xlu0 %2323, %v3290_v17   ;;  %725 = vperm.xlu1 %2324, %v3288_v37   ;;  %v3320_v36 = vpop.eup %2373 }
 0x1b1   :  { %770 = vperm.xlu0 %2323, %v3298_v38   ;;  %735 = vperm.xlu1 %2324, %v3296_v43  }
 0x1b5   :  { %780 = vperm.xlu0 %2323, %v3306_v42   ;;  %745 = vperm.xlu1 %2324, %v3304_v62  }
 0x1b9   :  { %755 = vperm.xlu1 %2324, %v3310_v35   ;;  %2326 = vset.pattern.permute.xlu0 %v3793_v27 }
 0x1bd   :  { %765 = vperm.xlu1 %2324, %v3314_v14  }
 0x1c1   :  { %775 = vperm.xlu1 %2324, %v3317_v60  }
 0x1c5   :  { %785 = vperm.xlu1 %2324, %v3320_v36  }
 0x1c9   :  { %2325 = vset.pattern.permute.xlu1 %v3793_v27 }
 0x1d7   :  { %v400_v53 = vpop.permute.xlu1 %399 }
 0x1d8   :  { %v477_v44 = vsub.f32 %v2682_v9, %v400_v53 }
 0x1da   :  { %v493_v59 = vmul.f32 1.442695, %v477_v44 }
 0x1db   :  { %v410_v28 = vpop.permute.xlu1 %409  ;;  %v405_v47 = vpop.permute.xlu0 %404 }
 0x1dc   :  { %2375 = vpow2.f32 %v493_v59  ;;  %v479_v58 = vsub.f32 %v2701_v41, %v410_v28  ;;  %v478_v31 = vsub.f32 %v2698_v40, %v405_v47 }
 0x1de   :  { %v497_v20 = vmul.f32 1.442695, %v479_v58  ;;  %v495_v2 = vmul.f32 1.442695, %v478_v31 }
 0x1df   :  { %v415_v11 = vpop.permute.xlu1 %414  ;;  %v420_v25 = vpop.permute.xlu0 %419 }
 0x1e0   :  { %2377 = vpow2.f32 %v497_v20  ;;  %v480_v29 = vsub.f32 %v2714_v52, %v415_v11  ;;  %v481_v27 = vsub.f32 %v2722_v61, %v420_v25 }
 0x1e1   :  { %2379 = vpow2.f32 %v495_v2 }
 0x1e2   :  { %v499_v56 = vmul.f32 1.442695, %v480_v29  ;;  %v501_v9 = vmul.f32 1.442695, %v481_v27 }
 0x1e3   :  { %v425_v0 = vpop.permute.xlu1 %424  ;;  %v430_v26 = vpop.permute.xlu0 %429 }
 0x1e4   :  { %2381 = vpow2.f32 %v499_v56  ;;  %v482_v5 = vsub.f32 %v2736_v12, %v425_v0  ;;  %v483_v41 = vsub.f32 %v2741_v18, %v430_v26 }
 0x1e5   :  { %2383 = vpow2.f32 %v501_v9 }
 0x1e6   :  { %v2376_v40 = vpop.eup %2375  ;;  %v503_v53 = vmul.f32 1.442695, %v482_v5  ;;  %v505_v44 = vmul.f32 1.442695, %v483_v41 }
 0x1e7   :  { %v435_v59 = vpop.permute.xlu1 %434  ;;  %627 = vadd.xlane.f32.xlu0 %v2376_v40  ;;  %v440_v28 = vpop.permute.xlu0 %439 }
 0x1e8   :  { %2385 = vpow2.f32 %v503_v53  ;;  %v484_v52 = vsub.f32 %v2759_v55, %v435_v59  ;;  %v485_v61 = vsub.f32 %v2756_v54, %v440_v28 }
 0x1e9   :  { %2387 = vpow2.f32 %v505_v44 }
 0x1ea   :  { %v2378_v47 = vpop.eup %2377  ;;  %v507_v58 = vmul.f32 1.442695, %v484_v52  ;;  %v509_v31 = vmul.f32 1.442695, %v485_v61 }
 0x1eb   :  { %v2380_v20 = vpop.eup %2379  ;;  %v445_v12 = vpop.permute.xlu1 %444  ;;  %631 = vadd.xlane.f32.xlu0 %v2378_v47 }
 0x1ec   :  { %v450_v18 = vpop.permute.xlu0 %449  ;;  %2389 = vpow2.f32 %v507_v58  ;;  %v486_v2 = vsub.f32 %v2781_v57, %v445_v12  ;;  %629 = vadd.xlane.f32.xlu1 %v2380_v20  ;;  %v804_v25 = vpack.c.bf16 %v2380_v20, %v2376_v40 }
 0x1ed   :  { %v487_v11 = vsub.f32 %v2778_v19, %v450_v18  ;;  %2391 = vpow2.f32 %v509_v31 }
 0x1ee   :  { %v2382_v29 = vpop.eup %2381  ;;  %v511_v55 = vmul.f32 1.442695, %v486_v2  ;;  %2262 = vmatprep.mubr.bf16.mxu0 %v804_v25 }
 0x1ef   :  { %v513_v27 = vmul.f32 1.442695, %v487_v11  ;;  %v2384_v54 = vpop.eup %2383  ;;  %v460_v56 = vpop.permute.xlu1 %459  ;;  %633 = vadd.xlane.f32.xlu0 %v2382_v29  ;;  %v805_v0 = vpack.c.bf16 %v2382_v29, %v2378_v47 }
 0x1f0   :  { %v455_v9 = vpop.permute.xlu0 %454  ;;  %2393 = vpow2.f32 %v511_v55  ;;  %v489_v26 = vsub.f32 %v2798_v63, %v460_v56  ;;  %635 = vadd.xlane.f32.xlu1 %v2384_v54 }
 0x1f1   :  { %v488_v57 = vsub.f32 %v2793_v46, %v455_v9  ;;  %2395 = vpow2.f32 %v513_v27  ;;  %2263 = vmatmul.mubr.bf16.vlgmr.msra.gmra.mrb[0].mxu0 %v805_v0 }
 0x1f2   :  { %v2386_v19 = vpop.eup %2385  ;;  %v517_v5 = vmul.f32 1.442695, %v489_v26 }
 0x1f3   :  { %v515_v41 = vmul.f32 1.442695, %v488_v57  ;;  %v2388_v40 = vpop.eup %2387  ;;  %v470_v53 = vpop.permute.xlu1 %469  ;;  %637 = vadd.xlane.f32.xlu0 %v2386_v19  ;;  %v806_v59 = vpack.c.bf16 %v2386_v19, %v2384_v54  ;;  %v3815_v19 = vld [vmem:[#allocation9_spill] sm:$0xff] }
 0x1f4   :  { %v465_v44 = vpop.permute.xlu0 %464  ;;  %2397 = vpow2.f32 %v517_v5  ;;  %v491_v28 = vsub.f32 %v2813_v15, %v470_v53  ;;  %639 = vadd.xlane.f32.xlu1 %v2388_v40 }
 0x1f5   :  { %v490_v52 = vsub.f32 %v2807_v3, %v465_v44  ;;  %2399 = vpow2.f32 %v515_v41  ;;  %2266 = vmatprep.mubr.bf16.mxu0 %v806_v59  ;;  %v3816_v59 = vld [vmem:[#allocation8_spill] sm:$0xff] }
 0x1f6   :  { %v2390_v63 = vpop.eup %2389  ;;  %v521_v46 = vmul.f32 1.442695, %v491_v28 }
 0x1f7   :  { %v519_v61 = vmul.f32 1.442695, %v490_v52  ;;  %v2392_v47 = vpop.eup %2391  ;;  %641 = vadd.xlane.f32.xlu0 %v2390_v63  ;;  %v807_v58 = vpack.c.bf16 %v2390_v63, %v2388_v40  ;;  %v3817_v52 = vld [vmem:[#allocation11_spill] sm:$0xff] }
 0x1f8   :  { %2401 = vpow2.f32 %v521_v46  ;;  %643 = vadd.xlane.f32.xlu1 %v2392_v47  ;;  %v1237_v31 = vpop.permute.xlu1 %1236 }
 0x1f9   :  { %2403 = vpow2.f32 %v519_v61  ;;  %v1314_v20 = vsub.f32 %v2818_v50, %v1237_v31  ;;  %2267 = vmatmul.mubr.bf16.gmra.mrb[4].mxu0 %v807_v58 }
 0x1fa   :  { %v2394_v12 = vpop.eup %2393 }
 0x1fb   :  { %v2396_v15 = vpop.eup %2395  ;;  %v1330_v18 = vmul.f32 1.442695, %v1314_v20  ;;  %645 = vadd.xlane.f32.xlu0 %v2394_v12  ;;  %v1242_v3 = vpop.permute.xlu0 %1241  ;;  %v808_v2 = vpack.c.bf16 %v2394_v12, %v2392_v47  ;;  %v3818_v12 = vld [vmem:[#allocation10_spill] sm:$0xff] }
 0x1fc   :  { %647 = vadd.xlane.f32.xlu1 %v2396_v15  ;;  %v1315_v11 = vsub.f32 %v2831_v22, %v1242_v3 }
 0x1fd   :  { %2270 = vmatprep.mubr.bf16.mxu0 %v808_v2  ;;  %2405 = vpow2.f32 %v1330_v18  ;;  %v3819_v18 = vld [vmem:[#allocation13_spill] sm:$0xff] }
 0x1fe   :  { %v2398_v25 = vpop.eup %2397  ;;  %v1332_v29 = vmul.f32 1.442695, %v1315_v11 }
 0x1ff   :  { %v2400_v55 = vpop.eup %2399  ;;  %v1247_v27 = vpop.permute.xlu1 %1246 }
 0x200   :  { %2407 = vpow2.f32 %v1332_v29  ;;  %v1316_v54 = vsub.f32 %v2842_v13, %v1247_v27  ;;  %651 = vadd.xlane.f32.xlu1 %v2398_v25  ;;  %649 = vadd.xlane.f32.xlu0 %v2400_v55  ;;  %v809_v50 = vpack.c.bf16 %v2400_v55, %v2396_v15  ;;  %v3820_v55 = vld [vmem:[#allocation12_spill] sm:$0xff] }
 0x202   :  { %v3342_v56 = vpop.eup %2401  ;;  %2271 = vmatmul.mubr.bf16.gmra.mrb[8].mxu0 %v809_v50  ;;  %v1334_v0 = vmul.f32 1.442695, %v1316_v54  ;;  %v3821_v54 = vld [vmem:[#allocation15_spill] sm:$0xff] }
 0x203   :  { %v2404_v9 = vpop.eup %2403  ;;  %v1252_v26 = vpop.permute.xlu1 %1251 }
 0x204   :  { %v1257_v57 = vpop.permute.xlu0 %1256  ;;  %v1317_v22 = vsub.f32 %v2835_v51, %v1252_v26  ;;  %655 = vadd.xlane.f32.xlu1 %v3342_v56  ;;  %653 = vadd.xlane.f32.xlu0 %v2404_v9  ;;  %v810_v41 = vpack.c.bf16 %v2404_v9, %v2398_v25  ;;  %2409 = vpow2.f32 %v1334_v0 }
 0x205   :  { %v1318_v5 = vsub.f32 %v3815_v19, %v1257_v57 }
 0x206   :  { %v1336_v40 = vmul.f32 1.442695, %v1317_v22  ;;  %2274 = vmatprep.mubr.bf16.mxu0 %v810_v41 }
 0x207   :  { %v1338_v13 = vmul.f32 1.442695, %v1318_v5  ;;  %v1262_v53 = vpop.permute.xlu1 %1261  ;;  %v3349_v46 = vpop.eup %2405 }
 0x208   :  { %v1267_v44 = vpop.permute.xlu0 %1266  ;;  %2411 = vpow2.f32 %v1336_v40  ;;  %v1319_v28 = vsub.f32 %v3816_v59, %v1262_v53  ;;  %v3822_v40 = vld [vmem:[#allocation14_spill] sm:$0xff] }
 0x209   :  { %v1320_v63 = vsub.f32 %v3817_v52, %v1267_v44  ;;  %2413 = vpow2.f32 %v1338_v13  ;;  %v3823_v53 = vld [vmem:[#allocation18_spill] sm:$0xff] }
 0x20a   :  { %v2408_v51 = vpop.eup %2407  ;;  %v1340_v61 = vmul.f32 1.442695, %v1319_v28 }
 0x20b   :  { %v1342_v47 = vmul.f32 1.442695, %v1320_v63  ;;  %v1272_v58 = vpop.permute.xlu1 %1271  ;;  %1460 = vadd.xlane.f32.xlu1 %v2408_v51  ;;  %v1636_v20 = vpack.c.bf16 %v2408_v51, %v3349_v46 }
 0x20c   :  { %v1277_v31 = vpop.permute.xlu0 %1276  ;;  %2415 = vpow2.f32 %v1340_v61  ;;  %v1321_v15 = vsub.f32 %v3818_v12, %v1272_v58 }
 0x20d   :  { %v1322_v3 = vsub.f32 %v3819_v18, %v1277_v31  ;;  %2417 = vpow2.f32 %v1342_v47  ;;  %2294 = vmatprep.mubr.bf16.mxu1 %v1636_v20  ;;  %v3824_v47 = vld [vmem:[#allocation16_spill] sm:$0xff]  ;;  %v3825_v20 = vld [vmem:[#allocation7_spill] sm:$0xff] }
 0x20e   :  { %v1344_v2 = vmul.f32 1.442695, %v1321_v15  ;;  %v3356_v9 = vpop.eup %2409 }
 0x20f   :  { %v1346_v11 = vmul.f32 1.442695, %v1322_v3  ;;  %v1282_v25 = vpop.permute.xlu1 %1281 }
 0x210   :  { %v1287_v29 = vpop.permute.xlu0 %1286  ;;  %2419 = vpow2.f32 %v1344_v2  ;;  %v1323_v27 = vsub.f32 %v3820_v55, %v1282_v25 }
 0x211   :  { %v1324_v50 = vsub.f32 %v3821_v54, %v1287_v29  ;;  %2421 = vpow2.f32 %v1346_v11  ;;  %v3826_v29 = vld [vmem:[#allocation19_spill] sm:$0xff] }
 0x212   :  { %v3358_v0 = vpop.eup %2411  ;;  %v1348_v26 = vmul.f32 1.442695, %v1323_v27 }
 0x213   :  { %v1350_v57 = vmul.f32 1.442695, %v1324_v50  ;;  %v2414_v22 = vpop.eup %2413  ;;  %v1292_v19 = vpop.permute.xlu1 %1291  ;;  %v1637_v41 = vpack.c.bf16 %v3358_v0, %v3356_v9 }
 0x214   :  { %v1297_v5 = vpop.permute.xlu0 %1296  ;;  %2423 = vpow2.f32 %v1348_v26  ;;  %v1325_v13 = vsub.f32 %v3822_v40, %v1292_v19  ;;  %1466 = vadd.xlane.f32.xlu1 %v2414_v22 }
 0x215   :  { %v1326_v44 = vsub.f32 %v3823_v53, %v1297_v5  ;;  %2425 = vpow2.f32 %v1350_v57  ;;  %2295 = vmatmul.mubr.bf16.vlgmr.msra.gmra.mrb[0].mxu1 %v1637_v41 }
 0x216   :  { %v2416_v59 = vpop.eup %2415  ;;  %v1352_v28 = vmul.f32 1.442695, %v1325_v13 }
 0x217   :  { %v1354_v52 = vmul.f32 1.442695, %v1326_v44  ;;  %v2418_v63 = vpop.eup %2417  ;;  %v1302_v51 = vpop.permute.xlu1 %1301  ;;  %v1638_v61 = vpack.c.bf16 %v2416_v59, %v2414_v22  ;;  %v3827_v22 = vld [vmem:[#allocation17_spill] sm:$0xff] }
 0x218   :  { %2427 = vpow2.f32 %v1352_v28  ;;  %v1327_v58 = vsub.f32 %v3824_v47, %v1302_v51  ;;  %1470 = vadd.xlane.f32.xlu1 %v2418_v63  ;;  %v475_v31 = vpop.permute.xlu0 %474  ;;  %v3828_v51 = vld [vmem:[#allocation20_spill] sm:$0xff] }
 0x219   :  { %2429 = vpow2.f32 %v1354_v52  ;;  %v492_v12 = vsub.f32 %v3825_v20, %v475_v31  ;;  %2298 = vmatprep.mubr.bf16.mxu1 %v1638_v61  ;;  %v3829_v61 = vld [vmem:[#allocation21_spill] sm:$0xff] }
 0x21a   :  { %v2420_v15 = vpop.eup %2419  ;;  %v1356_v18 = vmul.f32 1.442695, %v1327_v58  ;;  %v3830_v47 = vsub.f32 %v3828_v51, %v3829_v61  ;;  %v3849_v51 = vld [vmem:[#allocation38_spill] sm:$0xff] }
 0x21b   :  { %v2422_v3 = vpop.eup %2421  ;;  %v523_v2 = vmul.f32 1.442695, %v492_v12  ;;  %v1307_v11 = vpop.permute.xlu1 %1306  ;;  %v1639_v25 = vpack.c.bf16 %v2420_v15, %v2418_v63  ;;  %v3831_v12 = vld [vmem:[#allocation26_spill] sm:$0xff] }
 0x21c   :  { %2431 = vpow2.f32 %v1356_v18  ;;  %v1328_v55 = vsub.f32 %v3826_v29, %v1307_v11  ;;  %1474 = vadd.xlane.f32.xlu1 %v2422_v3  ;;  %v1378_v58 = vmul.f32 1.442695, %v3830_v47  ;;  %v3832_v18 = vld [vmem:[#allocation28_spill] sm:$0xff] }
 0x21d   :  { %2433 = vpow2.f32 %v523_v2  ;;  %2299 = vmatmul.mubr.bf16.gmra.mrb[4].mxu1 %v1639_v25  ;;  %v3836_v25 = vld [vmem:[#allocation30_spill] sm:$0xff]  ;;  %v3837_v29 = vld [vmem:[#allocation32_spill] sm:$0xff] }
 0x21e   :  { %v2424_v27 = vpop.eup %2423  ;;  %v1358_v54 = vmul.f32 1.442695, %v1328_v55  ;;  %v3838_v55 = vsub.f32 %v3836_v25, %v3837_v29 }
 0x21f   :  { %v2426_v50 = vpop.eup %2425  ;;  %v1312_v26 = vpop.permute.xlu1 %1311  ;;  %v1640_v57 = vpack.c.bf16 %v2424_v27, %v2422_v3  ;;  %v3833_v3 = vsub.f32 %v3831_v12, %v3832_v18  ;;  %v3851_v12 = vld [vmem:[#allocation33_spill] sm:$0xff] }
 0x220   :  { %2435 = vpow2.f32 %v1358_v54  ;;  %v1329_v19 = vsub.f32 %v3827_v22, %v1312_v26  ;;  %1478 = vadd.xlane.f32.xlu1 %v2426_v50  ;;  %v1386_v54 = vmul.f32 1.442695, %v3838_v55  ;;  %v3840_v26 = vld [vmem:[#allocation27_spill] sm:$0xff]  ;;  %v3852_v18 = vsub.f32 %v3851_v12, %v3143_v8  ;;  %v3856_v55 = vld [vmem:[#allocation24_spill] sm:$0xff] }
 0x221   :  { %2302 = vmatprep.mubr.bf16.mxu1 %v1640_v57  ;;  %v1382_v2 = vmul.f32 1.442695, %v3833_v3 }
 0x222   :  { %v2428_v5 = vpop.eup %2427  ;;  %v1360_v41 = vmul.f32 1.442695, %v1329_v19  ;;  %v1396_v3 = vmul.f32 1.442695, %v3852_v18 }
 0x223   :  { %v2430_v40 = vpop.eup %2429  ;;  %v1641_v13 = vpack.c.bf16 %v2428_v5, %v2426_v50  ;;  %v3839_v50 = vld [vmem:[#allocation25_spill] sm:$0xff] }
 0x224   :  { %2437 = vpow2.f32 %v1360_v41  ;;  %1482 = vadd.xlane.f32.xlu1 %v2430_v40  ;;  %v3841_v57 = vsub.f32 %v3839_v50, %v3840_v26  ;;  %v3858_v50 = vld [vmem:[#allocation39_spill] sm:$0xff] }
 0x225   :  { %2303 = vmatmul.mubr.bf16.gmra.mrb[8].mxu1 %v1641_v13  ;;  %2439 = vpow2.f32 %v1378_v58  ;;  %v3846_v13 = vld [vmem:[#allocation31_spill] sm:$0xff]  ;;  %v3859_v26 = vsub.f32 %v3858_v50, %v3193_v7  ;;  %v596_v50 = vld [vmem:[#allocation3 + $0x8] sm:$0xff] }
 0x226   :  { %v2432_v53 = vpop.eup %2431  ;;  %2441 = vpow2.f32 %v1382_v2  ;;  %v3853_v2 = vld [vmem:[#allocation36_spill] sm:$0xff] }
 0x227   :  { %v2434_v44 = vpop.eup %2433  ;;  %v1642_v28 = vpack.c.bf16 %v2432_v53, %v2430_v40 }
 0x228   :  { %657 = vadd.xlane.f32.xlu0 %v2434_v44  ;;  %v811_v52 = vpack.c.bf16 %v2434_v44, %v3342_v56  ;;  %v3834_v56 = vld [vmem:[#allocation22_spill] sm:$0xff] }
 0x229   :  { %2306 = vmatprep.mubr.bf16.mxu1 %v1642_v28  ;;  %v3835_v11 = vsub.f32 %v3834_v56, %v3076_v4  ;;  %v3842_v4 = vld [vmem:[#allocation34_spill] sm:$0xff]  ;;  %v3854_v56 = vsub.f32 %v3853_v2, %v3168_v23  ;;  %v3860_v23 = vld [vmem:[#allocation40_spill] sm:$0xff] }
 0x22a   :  { %v2436_v63 = vpop.eup %2435  ;;  %2275 = vmatmul.mubr.bf16.gmra.mrb[12].mxu0 %v811_v52  ;;  %v3402_v52 = vpop.permute.xlu1 %710 }
 0x22b   :  { %1486 = vadd.xlane.f32.xlu1 %v2436_v63 }
 0x22c   :  { %1458 = vadd.xlane.f32.xlu0 %v3349_v46  ;;  %v1384_v46 = vmul.f32 1.442695, %v3835_v11  ;;  %v1400_v11 = vmul.f32 1.442695, %v3854_v56  ;;  %v595_v56 = vld [vmem:[#allocation3] sm:$0xff] }
 0x22e   :  { %v2438_v31 = vpop.eup %2437  ;;  %2443 = vpow2.f32 %v1384_v46 }
 0x22f   :  { %v1643_v20 = vpack.c.bf16 %v2438_v31, %v2436_v63  ;;  %2445 = vpow2.f32 %v1386_v54 }
 0x230   :  { %1462 = vadd.xlane.f32.xlu0 %v3356_v9  ;;  %v3384_v9 = vpop.eup %2439 }
 0x231   :  { %2307 = vmatmul.mubr.bf16.gmra.mrb[12].mxu1 %v1643_v20  ;;  %v3390_v22 = vpop.eup %2441  ;;  %v3414_v20 = vpop.permute.xlu0 %715 }
 0x234   :  { %1464 = vadd.xlane.f32.xlu0 %v3358_v0  ;;  %v1388_v0 = vmul.f32 1.442695, %v3841_v57  ;;  %v1404_v57 = vmul.f32 1.442695, %v3859_v26 }
 0x235   :  { %v3428_v25 = vpop.permute.xlu0 %730 }
 0x236   :  { %2447 = vpow2.f32 %v1388_v0 }
 0x238   :  { %1468 = vadd.xlane.f32.xlu0 %v2416_v59  ;;  %v3843_v59 = vld [vmem:[#allocation35_spill] sm:$0xff]  ;;  %v3396_v40 = vpop.eup %2443 }
 0x239   :  { %v3844_v19 = vsub.f32 %v3842_v4, %v3843_v59  ;;  %v3404_v63 = vpop.eup %2445  ;;  %v3861_v4 = vld [vmem:[#allocation41_spill] sm:$0xff] }
 0x23a   :  { %v3862_v59 = vsub.f32 %v3860_v23, %v3861_v4  ;;  %v598_v4 = vld [vmem:[#allocation3 + $0x18] sm:$0xff] }
 0x23b   :  { %v1390_v41 = vmul.f32 1.442695, %v3844_v19 }
 0x23c   :  { %1542 = vperm.xlu1 %2325, %v3384_v9   ;;  %1472 = vadd.xlane.f32.xlu0 %v2420_v15  ;;  %v3845_v15 = vld [vmem:[#allocation29_spill] sm:$0xff]  ;;  %v1398_v19 = vmul.f32 1.442695, %v3862_v59 }
 0x23d   :  { %v3847_v44 = vsub.f32 %v3845_v15, %v3846_v13  ;;  %2449 = vpow2.f32 %v1390_v41  ;;  %v3446_v15 = vpop.permute.xlu0 %740  ;;  %v1408_v13 = vmul.f32 1.442695, %v1377_v34 }
 0x23f   :  { %v1392_v28 = vmul.f32 1.442695, %v3847_v44  ;;  %v3863_v44 = vsub.f32 %v3215_v21, %v3223_v33 }
 0x240   :  { %1552 = vperm.xlu1 %2325, %v3390_v22   ;;  %1476 = vadd.xlane.f32.xlu0 %v2424_v27  ;;  %v3848_v27 = vld [vmem:[#allocation37_spill] sm:$0xff]  ;;  %v3410_v58 = vpop.eup %2447 }
 0x241   :  { %2451 = vpow2.f32 %v1392_v28  ;;  %v3850_v61 = vsub.f32 %v3848_v27, %v3849_v51  ;;  %v1402_v28 = vmul.f32 1.442695, %v3863_v44  ;;  %v3460_v51 = vpop.permute.xlu0 %750 }
 0x243   :  { %v1394_v47 = vmul.f32 1.442695, %v3850_v61 }
 0x244   :  { %1557 = vperm.xlu1 %2325, %v3396_v40   ;;  %1480 = vadd.xlane.f32.xlu0 %v2428_v5  ;;  %v3412_v5 = vpop.permute.xlu1 %720 }
 0x245   :  { %2453 = vpow2.f32 %v1394_v47  ;;  %v3475_v34 = vpop.permute.xlu0 %760 }
 0x246   :  { %2455 = vpow2.f32 %v1396_v3 }
 0x247   :  { %2457 = vpow2.f32 %v1400_v11  ;;  %v611_v11 = vmul.f32 %v3271_v6, %v595_v56  ;;  %v614_v6 = vmul.f32 %v3288_v37, %v598_v4  ;;  %v600_v56 = vld [vmem:[#allocation3 + $0x28] sm:$0xff]  ;;  %v602_v37 = vld [vmem:[#allocation3 + $0x38] sm:$0xff] }
 0x248   :  { %1562 = vperm.xlu1 %2325, %v3404_v63   ;;  %1484 = vadd.xlane.f32.xlu0 %v2432_v53  ;;  %v3420_v53 = vpop.eup %2449  ;;  %v3426_v46 = vpop.permute.xlu1 %725  ;;  %v618_v4 = vmul.f32 %v3304_v62, %v602_v37  ;;  %v608_v37 = vld [vmem:[#allocation3 + $0x68] sm:$0xff] }
 0x249   :  { %v3488_v12 = vpop.permute.xlu0 %770 }
 0x24b   :  { %v3430_v29 = vpop.eup %2451 }
 0x24c   :  { %1567 = vperm.xlu1 %2325, %v3410_v58   ;;  %1488 = vadd.xlane.f32.xlu0 %v2438_v31  ;;  %v3855_v31 = vld [vmem:[#allocation23_spill] sm:$0xff]  ;;  %v3444_v41 = vpop.permute.xlu1 %735 }
 0x24d   :  { %v3857_v8 = vsub.f32 %v3855_v31, %v3856_v55  ;;  %v3496_v2 = vpop.permute.xlu0 %780  ;;  %v597_v55 = vld [vmem:[#allocation3 + $0x10] sm:$0xff] }
 0x24e   :  { %v613_v26 = vmul.f32 %v3280_v32, %v597_v55  ;;  %v616_v55 = vmul.f32 %v3296_v43, %v600_v56  ;;  %v604_v43 = vld [vmem:[#allocation3 + $0x48] sm:$0xff] }
 0x24f   :  { %v1380_v54 = vmul.f32 1.442695, %v3857_v8  ;;  %v3439_v0 = vpop.eup %2453 }
 0x250   :  { %1572 = vperm.xlu1 %2325, %v3420_v53   ;;  %v3452_v7 = vpop.eup %2455  ;;  %v3458_v27 = vpop.permute.xlu1 %745 }
 0x251   :  { %2459 = vpow2.f32 %v1380_v54  ;;  %v3462_v61 = vpop.eup %2457 }
 0x252   :  { %2461 = vpow2.f32 %v1404_v57  ;;  %v612_v57 = vmul.f32 %v3255_v45, %v596_v50 }
 0x253   :  { %2463 = vpow2.f32 %v1398_v19 }
 0x254   :  { %1577 = vperm.xlu1 %2325, %v3430_v29   ;;  %2465 = vpow2.f32 %v1408_v13  ;;  %v3473_v21 = vpop.permute.xlu1 %755  ;;  %v599_v13 = vld [vmem:[#allocation3 + $0x20] sm:$0xff] }
 0x255   :  { %2467 = vpow2.f32 %v1402_v28  ;;  %v615_v28 = vmul.f32 %v3263_v16, %v599_v13 }
 0x256   :  { %2469 = vpow2.f32 %v1406_v48 }
 0x258   :  { %1582 = vperm.xlu1 %2325, %v3439_v0   ;;  %v3486_v24 = vpop.permute.xlu1 %765 }
 0x25b   :  { %v3468_v30 = vpop.eup %2459 }
 0x25c   :  { %1587 = vperm.xlu1 %2325, %v3452_v7   ;;  %v3471_v33 = vpop.eup %2461  ;;  %v3494_v3 = vpop.permute.xlu1 %775 }
 0x25d   :  { %v3478_v47 = vpop.eup %2463 }
 0x25e   :  { %v3481_v1 = vpop.eup %2465 }
 0x25f   :  { %v3484_v49 = vpop.eup %2467 }
 0x260   :  { %1597 = vperm.xlu1 %2325, %v3462_v61   ;;  %v3491_v18 = vpop.eup %2469  ;;  %v3499_v8 = vpop.permute.xlu1 %785 }
 0x262   :  { %1547 = vperm.xlu0 %2326, %v3468_v30  }
 0x264   :  { %1607 = vperm.xlu1 %2325, %v3471_v33  }
 0x266   :  { %1592 = vperm.xlu0 %2326, %v3478_v47  }
 0x268   :  { %1617 = vperm.xlu1 %2325, %v3481_v1  }
 0x26a   :  { %1602 = vperm.xlu0 %2326, %v3484_v49  }
 0x26e   :  { %1612 = vperm.xlu0 %2326, %v3491_v18  }
 0x274   :  { %v628_v31 = vpop.xlane.xlu0 %627 }
 0x275   :  { %v659_v54 = vadd.f32 %v628_v31, %v611_v11  ;;  %v601_v31 = vld [vmem:[#allocation3 + $0x30] sm:$0xff] }
 0x277   :  { %676 = vst.msk [vmem:[#allocation3] sm:$0xff] %vm675_vm1, %v659_v54  ;;  %v617_v54 = vmul.f32 %v3273_v10, %v601_v31  ;;  %v606_v31 = vld [vmem:[#allocation3 + $0x58] sm:$0xff] }
 0x278   :  { %v632_v23 = vpop.xlane.xlu0 %631 }
 0x279   :  { %v630_v59 = vpop.xlane.xlu1 %629  ;;  %v661_v19 = vadd.f32 %v632_v23, %v613_v26  ;;  %v603_v23 = vld [vmem:[#allocation3 + $0x40] sm:$0xff] }
 0x27a   :  { %v660_v44 = vadd.f32 %v630_v59, %v612_v57  ;;  %v619_v59 = vmul.f32 %v3282_v39, %v603_v23  ;;  %v624_v23 = vmul.f32 %v3317_v60, %v608_v37 }
 0x27b   :  { %678 = vst.msk [vmem:[#allocation3 + $0x10] sm:$0xff] %vm675_vm1, %v661_v19 }
 0x27c   :  { %677 = vst.msk [vmem:[#allocation3 + $0x8] sm:$0xff] %vm675_vm1, %v660_v44  ;;  %v634_v48 = vpop.xlane.xlu0 %633 }
 0x27d   :  { %v636_v11 = vpop.xlane.xlu1 %635  ;;  %v662_v32 = vadd.f32 %v634_v48, %v614_v6  ;;  %v605_v6 = vld [vmem:[#allocation3 + $0x50] sm:$0xff] }
 0x27e   :  { %v663_v45 = vadd.f32 %v636_v11, %v615_v28  ;;  %v620_v28 = vmul.f32 %v3310_v35, %v604_v43  ;;  %v621_v48 = vmul.f32 %v3290_v17, %v605_v6 }
 0x27f   :  { %679 = vst.msk [vmem:[#allocation3 + $0x18] sm:$0xff] %vm675_vm1, %v662_v32  ;;  %v607_v32 = vld [vmem:[#allocation3 + $0x60] sm:$0xff] }
 0x280   :  { %680 = vst.msk [vmem:[#allocation3 + $0x20] sm:$0xff] %vm675_vm1, %v663_v45  ;;  %v638_v50 = vpop.xlane.xlu0 %637  ;;  %v623_v45 = vmul.f32 %v3298_v38, %v607_v32 }
 0x281   :  { %v640_v26 = vpop.xlane.xlu1 %639  ;;  %v664_v57 = vadd.f32 %v638_v50, %v616_v55  ;;  %v622_v55 = vmul.f32 %v3314_v14, %v606_v31  ;;  %v609_v50 = vld [vmem:[#allocation3 + $0x70] sm:$0xff] }
 0x282   :  { %v665_v16 = vadd.f32 %v640_v26, %v617_v54 }
 0x283   :  { %681 = vst.msk [vmem:[#allocation3 + $0x28] sm:$0xff] %vm675_vm1, %v664_v57  ;;  %v625_v57 = vmul.f32 %v3306_v42, %v609_v50  ;;  %v1427_v14 = vld [vmem:[#allocation3 + $0x8] sm:$0xff] }
 0x284   :  { %682 = vst.msk [vmem:[#allocation3 + $0x30] sm:$0xff] %vm675_vm1, %v665_v16  ;;  %v642_v19 = vpop.xlane.xlu0 %641 }
 0x285   :  { %v644_v13 = vpop.xlane.xlu1 %643  ;;  %v666_v44 = vadd.f32 %v642_v19, %v618_v4  ;;  %v1443_v19 = vmul.f32 %v3468_v30, %v1427_v14 }
 0x286   :  { %v667_v10 = vadd.f32 %v644_v13, %v619_v59 }
 0x287   :  { %683 = vst.msk [vmem:[#allocation3 + $0x38] sm:$0xff] %vm675_vm1, %v666_v44  ;;  %v1430_v44 = vld [vmem:[#allocation3 + $0x20] sm:$0xff] }
 0x288   :  { %684 = vst.msk [vmem:[#allocation3 + $0x40] sm:$0xff] %vm675_vm1, %v667_v10  ;;  %v646_v56 = vpop.xlane.xlu0 %645  ;;  %v1446_v42 = vmul.f32 %v3404_v63, %v1430_v44  ;;  %v692_v44 = vld [vmem:[#allocation4] sm:$0xff] }
 0x289   :  { %v648_v62 = vpop.xlane.xlu1 %647  ;;  %v668_v11 = vadd.f32 %v646_v56, %v620_v28 }
 0x28a   :  { %v669_v39 = vadd.f32 %v648_v62, %v621_v48 }
 0x28b   :  { %685 = vst.msk [vmem:[#allocation3 + $0x48] sm:$0xff] %vm675_vm1, %v668_v11  ;;  %v1432_v60 = vld [vmem:[#allocation3 + $0x30] sm:$0xff] }
 0x28c   :  { %686 = vst.msk [vmem:[#allocation3 + $0x50] sm:$0xff] %vm675_vm1, %v669_v39  ;;  %v1448_v28 = vmul.f32 %v3420_v53, %v1432_v60  ;;  %v695_v60 = vld [vmem:[#allocation4 + $0x18] sm:$0xff] }
 0x28d   :  { %v652_v54 = vpop.xlane.xlu1 %651  ;;  %v650_v35 = vpop.xlane.xlu0 %649 }
 0x28e   :  { %v671_v26 = vadd.f32 %v652_v54, %v623_v45  ;;  %v670_v17 = vadd.f32 %v650_v35, %v622_v55  ;;  %v610_v35 = vld [vmem:[#allocation3 + $0x78] sm:$0xff] }
 0x28f   :  { %v1434_v56 = vld [vmem:[#allocation3 + $0x40] sm:$0xff] }
 0x290   :  { %688 = vst.msk [vmem:[#allocation3 + $0x60] sm:$0xff] %vm675_vm1, %v671_v26  ;;  %687 = vst.msk [vmem:[#allocation3 + $0x58] sm:$0xff] %vm675_vm1, %v670_v17  ;;  %v1450_v30 = vmul.f32 %v3439_v0, %v1434_v56  ;;  %v626_v0 = vmul.f32 %v3320_v36, %v610_v35  ;;  %v1426_v17 = vld [vmem:[#allocation3] sm:$0xff] }
 0x291   :  { %v656_v16 = vpop.xlane.xlu1 %655  ;;  %v654_v4 = vpop.xlane.xlu0 %653  ;;  %v696_v35 = vld [vmem:[#allocation4 + $0x20] sm:$0xff] }
 0x292   :  { %v673_v59 = vadd.f32 %v656_v16, %v625_v57  ;;  %v672_v38 = vadd.f32 %v654_v4, %v624_v23  ;;  %v1442_v16 = vmul.f32 %v3384_v9, %v1426_v17  ;;  %v697_v17 = vld [vmem:[#allocation4 + $0x28] sm:$0xff] }
 0x293   :  { %v1436_v32 = vld [vmem:[#allocation3 + $0x50] sm:$0xff] }
 0x294   :  { %690 = vst.msk [vmem:[#allocation3 + $0x70] sm:$0xff] %vm675_vm1, %v673_v59  ;;  %689 = vst.msk [vmem:[#allocation3 + $0x68] sm:$0xff] %vm675_vm1, %v672_v38  ;;  %v1452_v63 = vmul.f32 %v3478_v47, %v1436_v32  ;;  %v1428_v59 = vld [vmem:[#allocation3 + $0x10] sm:$0xff] }
 0x295   :  { %v1444_v36 = vmul.f32 %v3390_v22, %v1428_v59  ;;  %v788_v22 = vmul.f32 %v3402_v52, %v692_v44 }
 0x297   :  { %v1438_v45 = vld [vmem:[#allocation3 + $0x60] sm:$0xff] }
 0x298   :  { %v1461_v43 = vpop.xlane.xlu1 %1460  ;;  %v1454_v53 = vmul.f32 %v3484_v49, %v1438_v45 }
 0x299   :  { %v1491_v13 = vadd.f32 %v1461_v43, %v1443_v19  ;;  %v1429_v19 = vld [vmem:[#allocation3 + $0x18] sm:$0xff] }
 0x29a   :  { %v1445_v9 = vmul.f32 %v3396_v40, %v1429_v19 }
 0x29b   :  { %1508 = vst.msk [vmem:[#allocation3 + $0x8] sm:$0xff] %vm1506_vm2, %v1491_v13  ;;  %v1440_v37 = vld [vmem:[#allocation3 + $0x70] sm:$0xff]  ;;  %v1439_v44 = vld [vmem:[#allocation3 + $0x68] sm:$0xff] }
 0x29c   :  { %v1456_v47 = vmul.f32 %v3491_v18, %v1440_v37  ;;  %v694_v13 = vld [vmem:[#allocation4 + $0x10] sm:$0xff] }
 0x2a1   :  { %v1467_v6 = vpop.xlane.xlu1 %1466 }
 0x2a2   :  { %v1494_v10 = vadd.f32 %v1467_v6, %v1446_v42  ;;  %v1431_v6 = vld [vmem:[#allocation3 + $0x28] sm:$0xff] }
 0x2a4   :  { %1511 = vst.msk [vmem:[#allocation3 + $0x20] sm:$0xff] %vm1506_vm2, %v1494_v10 }
 0x2a5   :  { %v1471_v48 = vpop.xlane.xlu1 %1470 }
 0x2a6   :  { %v1496_v62 = vadd.f32 %v1471_v48, %v1448_v28  ;;  %v693_v28 = vld [vmem:[#allocation4 + $0x8] sm:$0xff]  ;;  %v790_v48 = vmul.f32 %v3412_v5, %v694_v13 }
 0x2a8   :  { %1513 = vst.msk [vmem:[#allocation3 + $0x30] sm:$0xff] %vm1506_vm2, %v1496_v62  ;;  %v1447_v62 = vmul.f32 %v3410_v58, %v1431_v6 }
 0x2a9   :  { %v1475_v11 = vpop.xlane.xlu1 %1474 }
 0x2aa   :  { %v1498_v31 = vadd.f32 %v1475_v11, %v1450_v30  ;;  %v791_v30 = vmul.f32 %v3426_v46, %v695_v60  ;;  %v703_v60 = vld [vmem:[#allocation4 + $0x58] sm:$0xff] }
 0x2ac   :  { %1515 = vst.msk [vmem:[#allocation3 + $0x40] sm:$0xff] %vm1506_vm2, %v1498_v31  ;;  %v1433_v31 = vld [vmem:[#allocation3 + $0x38] sm:$0xff] }
 0x2ad   :  { %v1479_v39 = vpop.xlane.xlu1 %1478  ;;  %v1449_v46 = vmul.f32 %v3430_v29, %v1433_v31 }
 0x2ae   :  { %v1500_v55 = vadd.f32 %v1479_v39, %v1452_v63  ;;  %v789_v63 = vmul.f32 %v3414_v20, %v693_v28  ;;  %v699_v20 = vld [vmem:[#allocation4 + $0x38] sm:$0xff]  ;;  %v701_v28 = vld [vmem:[#allocation4 + $0x48] sm:$0xff] }
 0x2af   :  { %v795_v29 = vmul.f32 %v3458_v27, %v699_v20  ;;  %v797_v31 = vmul.f32 %v3473_v21, %v701_v28  ;;  %v1526_v21 = vld [vmem:[#allocation4 + $0x90] sm:$0xff]  ;;  %v1532_v28 = vld [vmem:[#allocation4 + $0xc0] sm:$0xff] }
 0x2b0   :  { %1517 = vst.msk [vmem:[#allocation3 + $0x50] sm:$0xff] %vm1506_vm2, %v1500_v55 }
 0x2b1   :  { %v1483_v54 = vpop.xlane.xlu1 %1482 }
 0x2b2   :  { %v1502_v50 = vadd.f32 %v1483_v54, %v1454_v53  ;;  %v698_v54 = vld [vmem:[#allocation4 + $0x30] sm:$0xff] }
 0x2b4   :  { %1519 = vst.msk [vmem:[#allocation3 + $0x60] sm:$0xff] %vm1506_vm2, %v1502_v50 }
 0x2b5   :  { %v658_v26 = vpop.xlane.xlu0 %657 }
 0x2b6   :  { %v674_v57 = vadd.f32 %v658_v26, %v626_v0  ;;  %v1435_v0 = vld [vmem:[#allocation3 + $0x48] sm:$0xff]  ;;  %v794_v26 = vmul.f32 %v3446_v15, %v698_v54 }
 0x2b8   :  { %691 = vst.msk [vmem:[#allocation3 + $0x78] sm:$0xff] %vm675_vm1, %v674_v57  ;;  %v1487_v23 = vpop.xlane.xlu1 %1486  ;;  %v792_v57 = vmul.f32 %v3428_v25, %v696_v35 }
 0x2b9   :  { %v1504_v4 = vadd.f32 %v1487_v23, %v1456_v47  ;;  %v1459_v49 = vpop.xlane.xlu0 %1458 }
 0x2ba   :  { %v1490_v38 = vadd.f32 %v1459_v49, %v1442_v16  ;;  %v1451_v16 = vmul.f32 %v3452_v7, %v1435_v0 }
 0x2bb   :  { %1521 = vst.msk [vmem:[#allocation3 + $0x70] sm:$0xff] %vm1506_vm2, %v1504_v4 }
 0x2bc   :  { %1507 = vst.msk [vmem:[#allocation3] sm:$0xff] %vm1506_vm2, %v1490_v38  ;;  %v3549_v18 = vpop.permute.xlu1 %1542  ;;  %v1437_v38 = vld [vmem:[#allocation3 + $0x58] sm:$0xff] }
 0x2bd   :  { %v1463_v14 = vpop.xlane.xlu0 %1462  ;;  %v1453_v7 = vmul.f32 %v3462_v61, %v1437_v38 }
 0x2be   :  { %v1492_v43 = vadd.f32 %v1463_v14, %v1444_v36  ;;  %v793_v36 = vmul.f32 %v3444_v41, %v697_v17 }
 0x2c0   :  { %1509 = vst.msk [vmem:[#allocation3 + $0x10] sm:$0xff] %vm1506_vm2, %v1492_v43  ;;  %v3559_v39 = vpop.permute.xlu1 %1552 }
 0x2c1   :  { %v1465_v42 = vpop.xlane.xlu0 %1464  ;;  %v1622_v35 = vmul.f32 %v3559_v39, %v1526_v21  ;;  %v1528_v39 = vld [vmem:[#allocation4 + $0xa0] sm:$0xff] }
 0x2c2   :  { %v1493_v10 = vadd.f32 %v1465_v42, %v1445_v9  ;;  %v702_v9 = vld [vmem:[#allocation4 + $0x50] sm:$0xff]  ;;  %v700_v42 = vld [vmem:[#allocation4 + $0x40] sm:$0xff] }
 0x2c4   :  { %1510 = vst.msk [vmem:[#allocation3 + $0x18] sm:$0xff] %vm1506_vm2, %v1493_v10  ;;  %v2264_v56 = vpop.f32.mrb[0].mxu0  ;;  %v3565_v47 = vpop.permute.xlu1 %1557  ;;  %v798_v10 = vmul.f32 %v3475_v34, %v702_v9 }
 0x2c5   :  { %v959_v11 = vadd.f32 %v2264_v56, %v790_v48  ;;  %v894_v32 = vpop.f32.mrb[1].mxu0  ;;  %v1469_v40 = vpop.xlane.xlu0 %1468  ;;  %v1455_v48 = vmul.f32 %v3471_v33, %v1439_v44 }
 0x2c6   :  { %v957_v45 = vadd.f32 %v894_v32, %v788_v22  ;;  %v1495_v55 = vadd.f32 %v1469_v40, %v1447_v62  ;;  %v2265_v5 = vpop.f32.mrb[2].mxu0  ;;  %v796_v22 = vmul.f32 %v3460_v51, %v700_v42  ;;  %v1441_v62 = vld [vmem:[#allocation3 + $0x78] sm:$0xff] }
 0x2c7   :  { %975 = vst [vmem:[#allocation4 + $0x10] sm:$0xff] %v959_v11  ;;  %v960_v52 = vadd.f32 %v2265_v5, %v791_v30  ;;  %v897_v53 = vpop.f32.mrb[3].mxu0  ;;  %v799_v30 = vmul.f32 %v3486_v24, %v703_v60  ;;  %v1457_v51 = vmul.f32 %v3481_v1, %v1441_v62 }
 0x2c8   :  { %973 = vst [vmem:[#allocation4] sm:$0xff] %v957_v45  ;;  %1512 = vst.msk [vmem:[#allocation3 + $0x28] sm:$0xff] %vm1506_vm2, %v1495_v55  ;;  %v958_v58 = vadd.f32 %v897_v53, %v789_v63  ;;  %v1563_v6 = vpop.permute.xlu1 %1562 }
 0x2c9   :  { %976 = vst [vmem:[#allocation4 + $0x18] sm:$0xff] %v960_v52  ;;  %v1473_v50 = vpop.xlane.xlu0 %1472 }
 0x2ca   :  { %974 = vst [vmem:[#allocation4 + $0x8] sm:$0xff] %v958_v58  ;;  %v1497_v37 = vadd.f32 %v1473_v50, %v1449_v46  ;;  %v1524_v58 = vld [vmem:[#allocation4 + $0x80] sm:$0xff]  ;;  %v1527_v46 = vld [vmem:[#allocation4 + $0x98] sm:$0xff]  ;;  %v1525_v50 = vld [vmem:[#allocation4 + $0x88] sm:$0xff] }
 0x2cb   :  { %v1620_v20 = vmul.f32 %v3549_v18, %v1524_v58  ;;  %v1529_v18 = vld [vmem:[#allocation4 + $0xa8] sm:$0xff] }
 0x2cc   :  { %1514 = vst.msk [vmem:[#allocation3 + $0x38] sm:$0xff] %vm1506_vm2, %v1497_v37  ;;  %v2268_v23 = vpop.f32.mrb[4].mxu0  ;;  %v1568_v34 = vpop.permute.xlu1 %1567  ;;  %v1623_v37 = vmul.f32 %v3565_v47, %v1527_v46 }
 0x2cd   :  { %v963_v4 = vadd.f32 %v2268_v23, %v794_v26  ;;  %v910_v49 = vpop.f32.mrb[5].mxu0  ;;  %v1477_v59 = vpop.xlane.xlu0 %1476 }
 0x2ce   :  { %v961_v14 = vadd.f32 %v910_v49, %v792_v57  ;;  %v1499_v15 = vadd.f32 %v1477_v59, %v1451_v16  ;;  %v2269_v19 = vpop.f32.mrb[6].mxu0  ;;  %v1530_v59 = vld [vmem:[#allocation4 + $0xb0] sm:$0xff] }
 0x2cf   :  { %979 = vst [vmem:[#allocation4 + $0x30] sm:$0xff] %v963_v4  ;;  %v964_v25 = vadd.f32 %v2269_v19, %v795_v29  ;;  %v913_v43 = vpop.f32.mrb[7].mxu0 }
 0x2d0   :  { %977 = vst [vmem:[#allocation4 + $0x20] sm:$0xff] %v961_v14  ;;  %1516 = vst.msk [vmem:[#allocation3 + $0x48] sm:$0xff] %vm1506_vm2, %v1499_v15  ;;  %v962_v13 = vadd.f32 %v913_v43, %v793_v36  ;;  %v1573_v53 = vpop.permute.xlu1 %1572  ;;  %v1531_v36 = vld [vmem:[#allocation4 + $0xb8] sm:$0xff]  ;;  %v1624_v15 = vmul.f32 %v1563_v6, %v1528_v39  ;;  %v1533_v6 = vld [vmem:[#allocation4 + $0xc8] sm:$0xff] }
 0x2d1   :  { %980 = vst [vmem:[#allocation4 + $0x38] sm:$0xff] %v964_v25  ;;  %v1481_v27 = vpop.xlane.xlu0 %1480  ;;  %v1626_v14 = vmul.f32 %v1573_v53, %v1530_v59 }
 0x2d2   :  { %978 = vst [vmem:[#allocation4 + $0x28] sm:$0xff] %v962_v13  ;;  %v1501_v41 = vadd.f32 %v1481_v27, %v1453_v7  ;;  %v1625_v7 = vmul.f32 %v1568_v34, %v1529_v18 }
 0x2d4   :  { %1518 = vst.msk [vmem:[#allocation3 + $0x58] sm:$0xff] %vm1506_vm2, %v1501_v41  ;;  %v1578_v54 = vpop.permute.xlu1 %1577  ;;  %v1534_v41 = vld [vmem:[#allocation4 + $0xd0] sm:$0xff] }
 0x2d5   :  { %v2272_v56 = vpop.f32.mrb[8].mxu0  ;;  %v1485_v61 = vpop.xlane.xlu0 %1484  ;;  %v1627_v25 = vmul.f32 %v1578_v54, %v1531_v36 }
 0x2d6   :  { %v967_v11 = vadd.f32 %v2272_v56, %v798_v10  ;;  %v926_v32 = vpop.f32.mrb[9].mxu0  ;;  %v1503_v40 = vadd.f32 %v1485_v61, %v1455_v48  ;;  %v1535_v48 = vld [vmem:[#allocation4 + $0xd8] sm:$0xff] }
 0x2d7   :  { %v965_v63 = vadd.f32 %v926_v32, %v796_v22  ;;  %v2273_v45 = vpop.f32.mrb[10].mxu0 }
 0x2d8   :  { %983 = vst [vmem:[#allocation4 + $0x50] sm:$0xff] %v967_v11  ;;  %1520 = vst.msk [vmem:[#allocation3 + $0x68] sm:$0xff] %vm1506_vm2, %v1503_v40  ;;  %v968_v55 = vadd.f32 %v2273_v45, %v799_v30  ;;  %v929_v33 = vpop.f32.mrb[11].mxu0  ;;  %v1583_v57 = vpop.permute.xlu1 %1582  ;;  %v706_v30 = vld [vmem:[#allocation4 + $0x70] sm:$0xff] }
 0x2d9   :  { %981 = vst [vmem:[#allocation4 + $0x40] sm:$0xff] %v965_v63  ;;  %v966_v5 = vadd.f32 %v929_v33, %v797_v31  ;;  %v1489_v52 = vpop.xlane.xlu0 %1488  ;;  %v1628_v61 = vmul.f32 %v1583_v57, %v1532_v28  ;;  %v704_v31 = vld [vmem:[#allocation4 + $0x60] sm:$0xff]  ;;  %v707_v33 = vld [vmem:[#allocation4 + $0x78] sm:$0xff] }
 0x2da   :  { %984 = vst [vmem:[#allocation4 + $0x58] sm:$0xff] %v968_v55  ;;  %v1505_v24 = vadd.f32 %v1489_v52, %v1457_v51  ;;  %v802_v52 = vmul.f32 %v3496_v2, %v706_v30  ;;  %v800_v54 = vmul.f32 %v3488_v12, %v704_v31  ;;  %v803_v46 = vmul.f32 %v3499_v8, %v707_v33  ;;  %v1536_v57 = vld [vmem:[#allocation4 + $0xe0] sm:$0xff]  ;;  %v1539_v12 = vld [vmem:[#allocation4 + $0xf8] sm:$0xff] }
 0x2db   :  { %982 = vst [vmem:[#allocation4 + $0x48] sm:$0xff] %v966_v5 }
 0x2dc   :  { %1522 = vst.msk [vmem:[#allocation3 + $0x78] sm:$0xff] %vm1506_vm2, %v1505_v24  ;;  %v1588_v47 = vpop.permute.xlu1 %1587  ;;  %v705_v24 = vld [vmem:[#allocation4 + $0x68] sm:$0xff] }
 0x2dd   :  { %v1629_v63 = vmul.f32 %v1588_v47, %v1533_v6 }
 0x2e0   :  { %v1598_v22 = vpop.permute.xlu1 %1597 }
 0x2e1   :  { %v1548_v0 = vpop.permute.xlu0 %1547  ;;  %v1631_v11 = vmul.f32 %v1598_v22, %v1535_v48 }
 0x2e2   :  { %v1621_v23 = vmul.f32 %v1548_v0, %v1525_v50  ;;  %v801_v0 = vmul.f32 %v3494_v3, %v705_v24 }
 0x2e4   :  { %v1608_v53 = vpop.permute.xlu1 %1607 }
 0x2e5   :  { %v1593_v60 = vpop.permute.xlu0 %1592 }
 0x2e6   :  { %v1630_v56 = vmul.f32 %v1593_v60, %v1534_v41 }
 0x2e8   :  { %v2296_v1 = vpop.f32.mrb[0].mxu1 }
 0x2e9   :  { %v1791_v26 = vadd.f32 %v2296_v1, %v1622_v35  ;;  %v1726_v17 = vpop.f32.mrb[1].mxu1  ;;  %v1603_v45 = vpop.permute.xlu0 %1602 }
 0x2ea   :  { %v1789_v16 = vadd.f32 %v1726_v17, %v1620_v20  ;;  %v2297_v29 = vpop.f32.mrb[2].mxu1 }
 0x2eb   :  { %1807 = vst [vmem:[#allocation4 + $0x90] sm:$0xff] %v1791_v26  ;;  %v1792_v4 = vadd.f32 %v2297_v29, %v1623_v37  ;;  %v1729_v49 = vpop.f32.mrb[3].mxu1  ;;  %v1538_v37 = vld [vmem:[#allocation4 + $0xf0] sm:$0xff]  ;;  %v1537_v29 = vld [vmem:[#allocation4 + $0xe8] sm:$0xff] }
 0x2ec   :  { %1805 = vst [vmem:[#allocation4 + $0x80] sm:$0xff] %v1789_v16  ;;  %v1790_v38 = vadd.f32 %v1729_v49, %v1621_v23  ;;  %v1618_v16 = vpop.permute.xlu1 %1617  ;;  %v1633_v39 = vmul.f32 %v1608_v53, %v1537_v29 }
 0x2ed   :  { %1808 = vst [vmem:[#allocation4 + $0x98] sm:$0xff] %v1792_v4  ;;  %v1613_v26 = vpop.permute.xlu0 %1612  ;;  %v1632_v4 = vmul.f32 %v1603_v45, %v1536_v57  ;;  %v1635_v59 = vmul.f32 %v1618_v16, %v1539_v12 }
 0x2ee   :  { %1806 = vst [vmem:[#allocation4 + $0x88] sm:$0xff] %v1790_v38  ;;  %v1634_v8 = vmul.f32 %v1613_v26, %v1538_v37 }
 0x2f0   :  { %v2300_v19 = vpop.f32.mrb[4].mxu1 }
 0x2f1   :  { %v1795_v43 = vadd.f32 %v2300_v19, %v1626_v14  ;;  %v1742_v13 = vpop.f32.mrb[5].mxu1 }
 0x2f2   :  { %v1793_v9 = vadd.f32 %v1742_v13, %v1624_v15  ;;  %v2301_v27 = vpop.f32.mrb[6].mxu1 }
 0x2f3   :  { %1811 = vst [vmem:[#allocation4 + $0xb0] sm:$0xff] %v1795_v43  ;;  %v1796_v44 = vadd.f32 %v2301_v27, %v1627_v25  ;;  %v1745_v42 = vpop.f32.mrb[7].mxu1 }
 0x2f4   :  { %1809 = vst [vmem:[#allocation4 + $0xa0] sm:$0xff] %v1793_v9  ;;  %v1794_v10 = vadd.f32 %v1745_v42, %v1625_v7 }
 0x2f5   :  { %1812 = vst [vmem:[#allocation4 + $0xb8] sm:$0xff] %v1796_v44 }
 0x2f6   :  { %1810 = vst [vmem:[#allocation4 + $0xa8] sm:$0xff] %v1794_v10 }
 0x2f8   :  { %v2304_v62 = vpop.f32.mrb[8].mxu1 }
 0x2f9   :  { %v1799_v32 = vadd.f32 %v2304_v62, %v1630_v56  ;;  %v1758_v40 = vpop.f32.mrb[9].mxu1 }
 0x2fa   :  { %v1797_v34 = vadd.f32 %v1758_v40, %v1628_v61  ;;  %v2305_v55 = vpop.f32.mrb[10].mxu1 }
 0x2fb   :  { %1815 = vst [vmem:[#allocation4 + $0xd0] sm:$0xff] %v1799_v32  ;;  %v1800_v51 = vadd.f32 %v2305_v55, %v1631_v11  ;;  %v1761_v5 = vpop.f32.mrb[11].mxu1 }
 0x2fc   :  { %1813 = vst [vmem:[#allocation4 + $0xc0] sm:$0xff] %v1797_v34  ;;  %v1798_v21 = vadd.f32 %v1761_v5, %v1629_v63 }
 0x2fd   :  { %1816 = vst [vmem:[#allocation4 + $0xd8] sm:$0xff] %v1800_v51  ;;  %v2276_v58 = vpop.f32.mrb[12].mxu0 }
 0x2fe   :  { %1814 = vst [vmem:[#allocation4 + $0xc8] sm:$0xff] %v1798_v21  ;;  %v971_v35 = vadd.f32 %v2276_v58, %v802_v52  ;;  %v942_v50 = vpop.f32.mrb[13].mxu0 }
 0x2ff   :  { %v969_v20 = vadd.f32 %v942_v50, %v800_v54  ;;  %v2277_v1 = vpop.f32.mrb[14].mxu0 }
 0x300   :  { %987 = vst [vmem:[#allocation4 + $0x70] sm:$0xff] %v971_v35  ;;  %v972_v2 = vadd.f32 %v2277_v1, %v803_v46  ;;  %v945_v17 = vpop.f32.mrb[15].mxu0 }
 0x301   :  { %985 = vst [vmem:[#allocation4 + $0x60] sm:$0xff] %v969_v20  ;;  %v970_v23 = vadd.f32 %v945_v17, %v801_v0 }
 0x302   :  { %988 = vst [vmem:[#allocation4 + $0x78] sm:$0xff] %v972_v2 }
 0x303   :  { %986 = vst [vmem:[#allocation4 + $0x68] sm:$0xff] %v970_v23 }
 0x304   :  { %v2308_v49 = vpop.f32.mrb[12].mxu1 }
 0x305   :  { %v1803_v3 = vadd.f32 %v2308_v49, %v1634_v8  ;;  %v1774_v38 = vpop.f32.mrb[13].mxu1 }
 0x306   :  { %v1801_v36 = vadd.f32 %v1774_v38, %v1632_v4  ;;  %v2309_v18 = vpop.f32.mrb[14].mxu1 }
 0x307   :  { %1819 = vst [vmem:[#allocation4 + $0xf0] sm:$0xff] %v1803_v3  ;;  %v1804_v14 = vadd.f32 %v2309_v18, %v1635_v59  ;;  %v1777_v15 = vpop.f32.mrb[15].mxu1 }
 0x308   :  { %1817 = vst [vmem:[#allocation4 + $0xe0] sm:$0xff] %v1801_v36  ;;  %v1802_v47 = vadd.f32 %v1777_v15, %v1633_v39 }
 0x309   :  { %1820 = vst [vmem:[#allocation4 + $0xf8] sm:$0xff] %v1804_v14 }
 0x30a   :  { %1818 = vst [vmem:[#allocation4 + $0xe8] sm:$0xff] %v1802_v47 }
 0x30b PF:  { %v1842_v19 = vld [vmem:[#allocation3 + $0x10] sm:$0xff]  ;;  %v1840_v25 = vld [vmem:[#allocation3] sm:$0xff]  ;;  %v1843_v43 = vld [vmem:[#allocation3 + $0x18] sm:$0xff]  ;;  %v2511_v13 = vmov 0   ;;  %v2512_v12 = vmov 1   ;;  %v2099_v16 = vlaneseq }
 0x30c   :  { %2472 = vset.pattern.permute.xlu1 %v2511_v13  ;;  %2471 = vset.pattern.permute.xlu0 %v2511_v13  ;;  %v1858_v7 = vmax.f32 %v1842_v19, 1e-30  ;;  %v1856_v9 = vmax.f32 %v1840_v25, 1e-30  ;;  %v1859_v27 = vmax.f32 %v1843_v43, 1e-30 }
 0x30d   :  { %v1841_v44 = vld [vmem:[#allocation3 + $0x8] sm:$0xff]  ;;  %v1844_v60 = vld [vmem:[#allocation3 + $0x20] sm:$0xff]  ;;  %v1847_v48 = vld [vmem:[#allocation3 + $0x38] sm:$0xff]  ;;  %v3589_v29 = vshrl.u32 %v2099_v16, 7 }
 0x30e   :  { %v1845_v42 = vld [vmem:[#allocation3 + $0x28] sm:$0xff]  ;;  %2475 = vrcp.f32 %v1858_v7  ;;  %v1857_v41 = vmax.f32 %v1841_v44, 1e-30  ;;  %v1860_v28 = vmax.f32 %v1844_v60, 1e-30  ;;  %v1846_v22 = vld [vmem:[#allocation3 + $0x30] sm:$0xff] }
 0x30f   :  { %2477 = vrcp.f32 %v1856_v9  ;;  %v1861_v10 = vmax.f32 %v1845_v42, 1e-30  ;;  %v1863_v6 = vmax.f32 %v1847_v48, 1e-30  ;;  %v1862_v56 = vmax.f32 %v1846_v22, 1e-30 }
 0x310   :  { %2479 = vrcp.f32 %v1859_v27  ;;  %v1849_v61 = vld [vmem:[#allocation3 + $0x48] sm:$0xff]  ;;  %v1848_v62 = vld [vmem:[#allocation3 + $0x40] sm:$0xff]  ;;  %v1851_v31 = vld [vmem:[#allocation3 + $0x58] sm:$0xff]  ;;  %v2101_v8 = vsub.s32 0, %v3589_v29  ;;  %v2105_v16 = vsub.s32 1, %v3589_v29 }
 0x311   :  { %2481 = vrcp.f32 %v1857_v41  ;;  %v1865_v11 = vmax.f32 %v1849_v61, 1e-30  ;;  %v1864_v40 = vmax.f32 %v1848_v62, 1e-30  ;;  %v1850_v45 = vld [vmem:[#allocation3 + $0x50] sm:$0xff]  ;;  %v1853_v51 = vld [vmem:[#allocation3 + $0x68] sm:$0xff] }
 0x312   :  { %2483 = vrcp.f32 %v1861_v10  ;;  %v1867_v55 = vmax.f32 %v1851_v31, 1e-30  ;;  %v1866_v33 = vmax.f32 %v1850_v45, 1e-30  ;;  %v1852_v52 = vld [vmem:[#allocation3 + $0x60] sm:$0xff]  ;;  %v1855_v54 = vld [vmem:[#allocation3 + $0x78] sm:$0xff] }
 0x313   :  { %2485 = vrcp.f32 %v1860_v28  ;;  %v1869_v53 = vmax.f32 %v1853_v51, 1e-30  ;;  %v1868_v21 = vmax.f32 %v1852_v52, 1e-30  ;;  %v1854_v46 = vld [vmem:[#allocation3 + $0x70] sm:$0xff]  ;;  %v1888_v3 = vld [vmem:[#allocation4] sm:$0xff] }
 0x314   :  { %2487 = vrcp.f32 %v1863_v6  ;;  %v1871_v50 = vmax.f32 %v1855_v54, 1e-30  ;;  %v1870_v0 = vmax.f32 %v1854_v46, 1e-30  ;;  %v3595_v4 = vld [vmem:[%s3737_s5] sm:$0x3] }
 0x315   :  { %2489 = vrcp.f32 %v1862_v56  ;;  %v1890_v49 = vld [vmem:[#allocation4 + $0x10] sm:$0xff]  ;;  %v3598_v59 = vrot.slane %v3595_v4, %v2101_v8  ;;  %v1891_v14 = vld [vmem:[#allocation4 + $0x18] sm:$0xff]  ;;  %v1889_v47 = vld [vmem:[#allocation4 + $0x8] sm:$0xff] }
 0x316   :  { %2491 = vrcp.f32 %v1865_v11  ;;  %v1893_v9 = vld [vmem:[#allocation4 + $0x28] sm:$0xff]  ;;  %v1892_v44 = vld [vmem:[#allocation4 + $0x20] sm:$0xff]  ;;  %v1895_v48 = vld [vmem:[#allocation4 + $0x38] sm:$0xff] }
 0x317   :  { %2493 = vrcp.f32 %v1864_v40  ;;  %v1894_v6 = vld [vmem:[#allocation4 + $0x30] sm:$0xff]  ;;  %v1896_v31 = vld [vmem:[#allocation4 + $0x40] sm:$0xff]  ;;  %v1899_v51 = vld [vmem:[#allocation4 + $0x58] sm:$0xff] }
 0x318   :  { %v2476_v30 = vpop.eup %2475  ;;  %2495 = vrcp.f32 %v1867_v55  ;;  %v1898_v52 = vld [vmem:[#allocation4 + $0x50] sm:$0xff]  ;;  %v1901_v46 = vld [vmem:[#allocation4 + $0x68] sm:$0xff]  ;;  %v2001_v29 = vld [vmem:[#allocation4 + $0x80] sm:$0xff] }
 0x319   :  { %v2478_v32 = vpop.eup %2477  ;;  %1916 = vperm.xlu1 %2472, %v2476_v30   ;;  %2497 = vrcp.f32 %v1866_v33 }
 0x31a   :  { %v2480_v63 = vpop.eup %2479  ;;  %1906 = vperm.xlu0 %2471, %v2478_v32   ;;  %2499 = vrcp.f32 %v1869_v53 }
 0x31b   :  { %v2482_v34 = vpop.eup %2481  ;;  %2501 = vrcp.f32 %v1868_v21 }
 0x31c   :  { %v2484_v5 = vpop.eup %2483  ;;  %2503 = vrcp.f32 %v1871_v50  ;;  %v1900_v50 = vld [vmem:[#allocation4 + $0x60] sm:$0xff] }
 0x31d   :  { %1921 = vperm.xlu1 %2472, %v2480_v63   ;;  %v2486_v24 = vpop.eup %2485  ;;  %2505 = vrcp.f32 %v1870_v0 }
 0x31e   :  { %1911 = vperm.xlu0 %2471, %v2482_v34   ;;  %v2488_v58 = vpop.eup %2487 }
 0x31f   :  { %v2490_v35 = vpop.eup %2489 }
 0x320   :  { %v2492_v20 = vpop.eup %2491 }
 0x321   :  { %1931 = vperm.xlu1 %2472, %v2484_v5   ;;  %v2494_v1 = vpop.eup %2493 }
 0x322   :  { %1926 = vperm.xlu0 %2471, %v2486_v24   ;;  %v2496_v37 = vpop.eup %2495 }
 0x323   :  { %v2498_v26 = vpop.eup %2497 }
 0x324   :  { %v2500_v2 = vpop.eup %2499 }
 0x325   :  { %1941 = vperm.xlu1 %2472, %v2488_v58   ;;  %v2502_v17 = vpop.eup %2501 }
 0x326   :  { %1936 = vperm.xlu0 %2471, %v2490_v35   ;;  %v2504_v57 = vpop.eup %2503 }
 0x327   :  { %v2506_v23 = vpop.eup %2505 }
 0x329   :  { %1951 = vperm.xlu1 %2472, %v2492_v20  }
 0x32a   :  { %1946 = vperm.xlu0 %2471, %v2494_v1  }
 0x32d   :  { %1961 = vperm.xlu1 %2472, %v2496_v37  }
 0x32e   :  { %1956 = vperm.xlu0 %2471, %v2498_v26  }
 0x331   :  { %1971 = vperm.xlu1 %2472, %v2500_v2  }
 0x332   :  { %1966 = vperm.xlu0 %2471, %v2502_v17  }
 0x335   :  { %1981 = vperm.xlu1 %2472, %v2504_v57  }
 0x336   :  { %1976 = vperm.xlu0 %2471, %v2506_v23  }
 0x339   :  { %2474 = vset.pattern.permute.xlu1 %v2512_v12 }
 0x33a   :  { %2473 = vset.pattern.permute.xlu0 %v2512_v12  ;;  %2022 = vperm.xlu1 %2474, %v2482_v34  }
 0x33b   :  { %2018 = vperm.xlu0 %2473, %v2478_v32   ;;  %v1897_v32 = vld [vmem:[#allocation4 + $0x48] sm:$0xff] }
 0x33e   :  { %2026 = vperm.xlu1 %2474, %v2476_v30  }
 0x33f   :  { %2030 = vperm.xlu0 %2473, %v2480_v63  }
 0x342   :  { %2034 = vperm.xlu1 %2474, %v2486_v24  }
 0x343   :  { %2038 = vperm.xlu0 %2473, %v2484_v5  }
 0x346   :  { %2042 = vperm.xlu1 %2474, %v2490_v35  }
 0x347   :  { %2046 = vperm.xlu0 %2473, %v2488_v58  }
 0x34a   :  { %2050 = vperm.xlu1 %2474, %v2494_v1  }
 0x34b   :  { %2054 = vperm.xlu0 %2473, %v2492_v20  }
 0x34e   :  { %2058 = vperm.xlu1 %2474, %v2498_v26  }
 0x34f   :  { %2062 = vperm.xlu0 %2473, %v2496_v37  }
 0x352   :  { %2066 = vperm.xlu1 %2474, %v2502_v17  }
 0x353   :  { %2070 = vperm.xlu0 %2473, %v2500_v2   ;;  %v1903_v2 = vld [vmem:[#allocation4 + $0x78] sm:$0xff] }
 0x356   :  { %2074 = vperm.xlu1 %2474, %v2506_v23  }
 0x357   :  { %2078 = vperm.xlu0 %2473, %v2504_v57   ;;  %v1902_v57 = vld [vmem:[#allocation4 + $0x70] sm:$0xff] }
 0x398   :  { %v1917_v38 = vpop.permute.xlu1 %1916 }
 0x399   :  { %v1986_v39 = vmul.f32 %v1917_v38, %v1890_v49  ;;  %v1907_v36 = vpop.permute.xlu0 %1906 }
 0x39a   :  { %v1984_v18 = vmul.f32 %v1907_v36, %v1888_v3 }
 0x39b   :  { %v2113_v15 = vadd.f32 %v3598_v59, %v1986_v39  ;;  %v2002_v39 = vld [vmem:[#allocation4 + $0x88] sm:$0xff] }
 0x39c   :  { %v2109_v19 = vadd.f32 %v3598_v59, %v1984_v18  ;;  %v1922_v25 = vpop.permute.xlu1 %1921  ;;  %v3660_v18 = vrot.slane %v3595_v4, %v2105_v16 }
 0x39d   :  { %2145 = vst [vmem:[%s3738_s6 + $0x20] sm:$0xff] %v2113_v15  ;;  %v1987_v43 = vmul.f32 %v1922_v25, %v1891_v14  ;;  %v1912_v13 = vpop.permute.xlu0 %1911  ;;  %v2003_v25 = vld [vmem:[#allocation4 + $0x90] sm:$0xff] }
 0x39e   :  { %2141 = vst [vmem:[%s3738_s6] sm:$0xff] %v2109_v19  ;;  %v1985_v7 = vmul.f32 %v1912_v13, %v1889_v47 }
 0x39f   :  { %v2115_v27 = vadd.f32 %v3598_v59, %v1987_v43 }
 0x3a0   :  { %v2111_v42 = vadd.f32 %v3598_v59, %v1985_v7  ;;  %v1932_v41 = vpop.permute.xlu1 %1931 }
 0x3a1   :  { %2147 = vst [vmem:[%s3738_s6 + $0x30] sm:$0xff] %v2115_v27  ;;  %v1989_v60 = vmul.f32 %v1932_v41, %v1893_v9  ;;  %v1927_v10 = vpop.permute.xlu0 %1926  ;;  %v2006_v41 = vld [vmem:[#allocation4 + $0xa8] sm:$0xff] }
 0x3a2   :  { %2143 = vst [vmem:[%s3738_s6 + $0x10] sm:$0xff] %v2111_v42  ;;  %v1988_v28 = vmul.f32 %v1927_v10, %v1892_v44  ;;  %v2005_v44 = vld [vmem:[#allocation4 + $0xa0] sm:$0xff] }
 0x3a3   :  { %v2119_v22 = vadd.f32 %v3598_v59, %v1989_v60 }
 0x3a4   :  { %v2117_v56 = vadd.f32 %v3598_v59, %v1988_v28  ;;  %v1942_v61 = vpop.permute.xlu1 %1941 }
 0x3a5   :  { %2151 = vst [vmem:[%s3738_s6 + $0x50] sm:$0xff] %v2119_v22  ;;  %v1991_v62 = vmul.f32 %v1942_v61, %v1895_v48  ;;  %v1937_v30 = vpop.permute.xlu0 %1936  ;;  %v2008_v61 = vld [vmem:[#allocation4 + $0xb8] sm:$0xff] }
 0x3a6   :  { %2149 = vst [vmem:[%s3738_s6 + $0x40] sm:$0xff] %v2117_v56  ;;  %v1990_v11 = vmul.f32 %v1937_v30, %v1894_v6  ;;  %v2007_v6 = vld [vmem:[#allocation4 + $0xb0] sm:$0xff] }
 0x3a7   :  { %v2123_v40 = vadd.f32 %v3598_v59, %v1991_v62 }
 0x3a8   :  { %v2121_v63 = vadd.f32 %v3598_v59, %v1990_v11  ;;  %v1952_v45 = vpop.permute.xlu1 %1951 }
 0x3a9   :  { %2155 = vst [vmem:[%s3738_s6 + $0x70] sm:$0xff] %v2123_v40  ;;  %v1993_v34 = vmul.f32 %v1952_v45, %v1897_v32  ;;  %v1947_v55 = vpop.permute.xlu0 %1946  ;;  %v2010_v45 = vld [vmem:[#allocation4 + $0xc8] sm:$0xff] }
 0x3aa   :  { %2153 = vst [vmem:[%s3738_s6 + $0x60] sm:$0xff] %v2121_v63  ;;  %v1992_v33 = vmul.f32 %v1947_v55, %v1896_v31  ;;  %v2009_v31 = vld [vmem:[#allocation4 + $0xc0] sm:$0xff] }
 0x3ab   :  { %v2127_v5 = vadd.f32 %v3598_v59, %v1993_v34 }
 0x3ac   :  { %v2125_v24 = vadd.f32 %v3598_v59, %v1992_v33  ;;  %v1962_v53 = vpop.permute.xlu1 %1961 }
 0x3ad   :  { %2159 = vst [vmem:[%s3738_s6 + $0x90] sm:$0xff] %v2127_v5  ;;  %v1995_v21 = vmul.f32 %v1962_v53, %v1899_v51  ;;  %v1957_v54 = vpop.permute.xlu0 %1956  ;;  %v2012_v53 = vld [vmem:[#allocation4 + $0xd8] sm:$0xff] }
 0x3ae   :  { %2157 = vst [vmem:[%s3738_s6 + $0x80] sm:$0xff] %v2125_v24  ;;  %v1994_v58 = vmul.f32 %v1957_v54, %v1898_v52  ;;  %v2011_v52 = vld [vmem:[#allocation4 + $0xd0] sm:$0xff] }
 0x3af   :  { %v2131_v35 = vadd.f32 %v3598_v59, %v1995_v21 }
 0x3b0   :  { %v2129_v0 = vadd.f32 %v3598_v59, %v1994_v58  ;;  %v1972_v20 = vpop.permute.xlu1 %1971 }
 0x3b1   :  { %2163 = vst [vmem:[%s3738_s6 + $0xb0] sm:$0xff] %v2131_v35  ;;  %v1997_v1 = vmul.f32 %v1972_v20, %v1901_v46  ;;  %v1967_v37 = vpop.permute.xlu0 %1966  ;;  %v2014_v20 = vld [vmem:[#allocation4 + $0xe8] sm:$0xff] }
 0x3b2   :  { %2161 = vst [vmem:[%s3738_s6 + $0xa0] sm:$0xff] %v2129_v0  ;;  %v1996_v26 = vmul.f32 %v1967_v37, %v1900_v50  ;;  %v2013_v50 = vld [vmem:[#allocation4 + $0xe0] sm:$0xff] }
 0x3b3   :  { %v2135_v17 = vadd.f32 %v3598_v59, %v1997_v1 }
 0x3b4   :  { %v2133_v23 = vadd.f32 %v3598_v59, %v1996_v26  ;;  %v1982_v12 = vpop.permute.xlu1 %1981 }
 0x3b5   :  { %2167 = vst [vmem:[%s3738_s6 + $0xd0] sm:$0xff] %v2135_v17  ;;  %v1999_v8 = vmul.f32 %v1982_v12, %v1903_v2  ;;  %v1977_v49 = vpop.permute.xlu0 %1976  ;;  %v2016_v12 = vld [vmem:[#allocation4 + $0xf8] sm:$0xff] }
 0x3b6   :  { %2165 = vst [vmem:[%s3738_s6 + $0xc0] sm:$0xff] %v2133_v23  ;;  %v1998_v3 = vmul.f32 %v1977_v49, %v1902_v57  ;;  %v2015_v57 = vld [vmem:[#allocation4 + $0xf0] sm:$0xff] }
 0x3b7   :  { %v2139_v38 = vadd.f32 %v3598_v59, %v1999_v8 }
 0x3b8   :  { %v2137_v36 = vadd.f32 %v3598_v59, %v1998_v3  ;;  %v2004_v59 = vld [vmem:[#allocation4 + $0x98] sm:$0xff] }
 0x3b9   :  { %2171 = vst [vmem:[%s3738_s6 + $0xf0] sm:$0xff] %v2139_v38  ;;  %v2023_v14 = vpop.permute.xlu1 %2022 }
 0x3ba   :  { %2169 = vst [vmem:[%s3738_s6 + $0xe0] sm:$0xff] %v2137_v36  ;;  %v2082_v15 = vmul.f32 %v2023_v14, %v2002_v39  ;;  %v2019_v47 = vpop.permute.xlu0 %2018 }
 0x3bb   :  { %v2081_v19 = vmul.f32 %v2019_v47, %v2001_v29 }
 0x3bc   :  { %v2112_v43 = vadd.f32 %v3660_v18, %v2082_v15 }
 0x3bd   :  { %v2110_v4 = vadd.f32 %v3660_v18, %v2081_v19  ;;  %v2027_v13 = vpop.permute.xlu1 %2026 }
 0x3be   :  { %2144 = vst [vmem:[%s3738_s6 + $0x18] sm:$0xff] %v2112_v43  ;;  %v2083_v7 = vmul.f32 %v2027_v13, %v2003_v25  ;;  %v2031_v9 = vpop.permute.xlu0 %2030 }
 0x3bf   :  { %2142 = vst [vmem:[%s3738_s6 + $0x8] sm:$0xff] %v2110_v4  ;;  %v2084_v27 = vmul.f32 %v2031_v9, %v2004_v59 }
 0x3c0   :  { %v2114_v42 = vadd.f32 %v3660_v18, %v2083_v7 }
 0x3c1   :  { %v2116_v60 = vadd.f32 %v3660_v18, %v2084_v27  ;;  %v2035_v10 = vpop.permute.xlu1 %2034 }
 0x3c2   :  { %2146 = vst [vmem:[%s3738_s6 + $0x28] sm:$0xff] %v2114_v42  ;;  %v2085_v28 = vmul.f32 %v2035_v10, %v2005_v44  ;;  %v2039_v48 = vpop.permute.xlu0 %2038 }
 0x3c3   :  { %2148 = vst [vmem:[%s3738_s6 + $0x38] sm:$0xff] %v2116_v60  ;;  %v2086_v22 = vmul.f32 %v2039_v48, %v2006_v41 }
 0x3c4   :  { %v2118_v56 = vadd.f32 %v3660_v18, %v2085_v28 }
 0x3c5   :  { %v2120_v62 = vadd.f32 %v3660_v18, %v2086_v22  ;;  %v2043_v30 = vpop.permute.xlu1 %2042 }
 0x3c6   :  { %2150 = vst [vmem:[%s3738_s6 + $0x48] sm:$0xff] %v2118_v56  ;;  %v2087_v11 = vmul.f32 %v2043_v30, %v2007_v6  ;;  %v2047_v32 = vpop.permute.xlu0 %2046 }
 0x3c7   :  { %2152 = vst [vmem:[%s3738_s6 + $0x58] sm:$0xff] %v2120_v62  ;;  %v2088_v40 = vmul.f32 %v2047_v32, %v2008_v61 }
 0x3c8   :  { %v2122_v63 = vadd.f32 %v3660_v18, %v2087_v11 }
 0x3c9   :  { %v2124_v34 = vadd.f32 %v3660_v18, %v2088_v40  ;;  %v2051_v55 = vpop.permute.xlu1 %2050 }
 0x3ca   :  { %2154 = vst [vmem:[%s3738_s6 + $0x68] sm:$0xff] %v2122_v63  ;;  %v2089_v33 = vmul.f32 %v2051_v55, %v2009_v31  ;;  %v2055_v51 = vpop.permute.xlu0 %2054 }
 0x3cb   :  { %2156 = vst [vmem:[%s3738_s6 + $0x78] sm:$0xff] %v2124_v34  ;;  %v2090_v5 = vmul.f32 %v2055_v51, %v2010_v45 }
 0x3cc   :  { %v2126_v24 = vadd.f32 %v3660_v18, %v2089_v33 }
 0x3cd   :  { %v2128_v21 = vadd.f32 %v3660_v18, %v2090_v5  ;;  %v2059_v54 = vpop.permute.xlu1 %2058 }
 0x3ce   :  { %2158 = vst [vmem:[%s3738_s6 + $0x88] sm:$0xff] %v2126_v24  ;;  %v2091_v58 = vmul.f32 %v2059_v54, %v2011_v52  ;;  %v2063_v46 = vpop.permute.xlu0 %2062 }
 0x3cf   :  { %2160 = vst [vmem:[%s3738_s6 + $0x98] sm:$0xff] %v2128_v21  ;;  %v2092_v35 = vmul.f32 %v2063_v46, %v2012_v53 }
 0x3d0   :  { %v2130_v0 = vadd.f32 %v3660_v18, %v2091_v58 }
 0x3d1   :  { %v2132_v1 = vadd.f32 %v3660_v18, %v2092_v35  ;;  %v2067_v37 = vpop.permute.xlu1 %2066 }
 0x3d2   :  { %2162 = vst [vmem:[%s3738_s6 + $0xa8] sm:$0xff] %v2130_v0  ;;  %v2093_v26 = vmul.f32 %v2067_v37, %v2013_v50  ;;  %v2071_v2 = vpop.permute.xlu0 %2070 }
 0x3d3   :  { %2164 = vst [vmem:[%s3738_s6 + $0xb8] sm:$0xff] %v2132_v1  ;;  %v2094_v17 = vmul.f32 %v2071_v2, %v2014_v20 }
 0x3d4   :  { %v2134_v23 = vadd.f32 %v3660_v18, %v2093_v26 }
 0x3d5   :  { %v2136_v16 = vadd.f32 %v3660_v18, %v2094_v17  ;;  %v2075_v8 = vpop.permute.xlu1 %2074 }
 0x3d6   :  { %2166 = vst [vmem:[%s3738_s6 + $0xc8] sm:$0xff] %v2134_v23  ;;  %v2095_v49 = vmul.f32 %v2075_v8, %v2015_v57  ;;  %v2079_v3 = vpop.permute.xlu0 %2078 }
 0x3d7   :  { %2168 = vst [vmem:[%s3738_s6 + $0xd8] sm:$0xff] %v2136_v16  ;;  %v2096_v38 = vmul.f32 %v2079_v3, %v2016_v12 }
 0x3d8   :  { %v2138_v39 = vadd.f32 %v3660_v18, %v2095_v49 }
 0x3d9   :  { %v2140_v36 = vadd.f32 %v3660_v18, %v2096_v38 }
 0x3da   :  { %2170 = vst [vmem:[%s3738_s6 + $0xe8] sm:$0xff] %v2138_v39 }
 0x3db   :  { %2172 = vst [vmem:[%s3738_s6 + $0xf8] sm:$0xff] %v2140_v36 }

</bundles_post_ra>
